<compile_context>
chip_gen: v7x
topology: tpu7x:2x2x1
jax: 0.10.0
libtpu: 0.0.40
codegen_flags: <defaults>
</compile_context>

<pallas_src>
import functools

import jax
import jax.numpy as jnp
from jax.experimental import pallas as pl
from jax.experimental.pallas import tpu as pltpu


def _cbam_kernel(x_ref, w1_ref, w2_ref, wsp_ref, o_ref, *, bt, h, w):
    # x_ref block: (bt, C, HW) lane-dense view of `bt` images.
    C = x_ref.shape[1]
    HW = x_ref.shape[2]
    W = w
    inv_hw = 1.0 / float(HW)
    inv_c = 1.0 / float(C)

    w1 = w1_ref[...]
    if w1.dtype != jnp.float32:
        w1 = w1.astype(jnp.float32)
    w2m = w2_ref[...]
    if w2m.dtype != jnp.float32:
        w2m = w2m.astype(jnp.float32)

    # Hoist all 98 spatial-conv scalars (1-D SMEM ref) out of the tap loop.
    wsp = [wsp_ref[k] for k in range(98)]

    # Trace-time column masks for the flat 7x7 conv, one per dj in [-3, 3].
    col = jax.lax.broadcasted_iota(jnp.int32, (1, HW), 1) % W
    col_masks = []
    for dj in range(-3, 4):
        valid = jnp.logical_and(col + dj >= 0, col + dj < W)
        col_masks.append(valid.astype(jnp.float32))

    pad_w = 4 * W  # flat zero pad on each side (covers 3 rows + 3 cols of shift)
    zpad = jnp.zeros((1, pad_w), jnp.float32)

    for b in range(bt):
        xb = x_ref[b]
        if xb.dtype != jnp.float32:
            xb = xb.astype(jnp.float32)

        # ---------------- Channel attention ----------------
        avg_p = jnp.sum(xb, axis=1, keepdims=True) * inv_hw      # (C, 1)
        max_p = jnp.max(xb, axis=1, keepdims=True)                # (C, 1)
        pooled = jnp.concatenate([avg_p, max_p], axis=1)          # (C, 2)

        hid = jnp.dot(w1, pooled, preferred_element_type=jnp.float32)   # (Cr, 2)
        hid = jnp.maximum(hid, 0.0)                                      # ReLU
        out2 = jnp.dot(w2m, hid, preferred_element_type=jnp.float32)    # (C, 2)
        ca = jax.nn.sigmoid(out2[:, 0:1] + out2[:, 1:2])          # (C, 1)

        x1 = xb * ca                                              # (C, HW)

        # ---------------- Spatial attention ----------------
        avg_m = jnp.sum(x1, axis=0, keepdims=True) * inv_c        # (1, HW)
        max_m = jnp.max(x1, axis=0, keepdims=True)                # (1, HW)

        pa = jnp.concatenate([zpad, avg_m, zpad], axis=1)         # (1, HW + 8W)
        pm = jnp.concatenate([zpad, max_m, zpad], axis=1)

        # 7x7 conv on the flat layout: tap (ki, kj) is a flat shift of
        # di*W + dj; the column mask zeroes positions whose true column
        # index would fall outside [0, W) (i.e. the conv's zero padding).
        acc = jnp.zeros((1, HW), jnp.float32)
        for ki in range(7):
            di = ki - 3
            for kj in range(7):
                dj = kj - 3
                s0 = pad_w + di * W + dj
                wa = wsp[ki * 7 + kj]          # plane 0: avg map
                wm = wsp[49 + ki * 7 + kj]     # plane 1: max map
                tap = wa * pa[:, s0:s0 + HW] + wm * pm[:, s0:s0 + HW]
                acc = acc + col_masks[kj] * tap

        sa = jax.nn.sigmoid(acc)                                  # (1, HW)

        # Single lane-dense full-width store.
        o_ref[b] = (x1 * sa).astype(o_ref.dtype)


@functools.partial(jax.jit, static_argnames=("batch_tile", "h", "w"))
def _cbam_call(x2, w1, w2, wsp_flat, *, batch_tile, h, w):
    N, C, HW = x2.shape
    Cr = w1.shape[0]
    grid = (N // batch_tile,)
    kernel = functools.partial(_cbam_kernel, bt=batch_tile, h=h, w=w)
    return pl.pallas_call(
        kernel,
        out_shape=jax.ShapeDtypeStruct((N, C, HW), x2.dtype),
        grid=grid,
        in_specs=[
            pl.BlockSpec((batch_tile, C, HW), lambda n: (n, 0, 0)),
            pl.BlockSpec((Cr, C), lambda n: (0, 0)),
            pl.BlockSpec((C, Cr), lambda n: (0, 0)),
            pl.BlockSpec(memory_space=pltpu.MemorySpace.SMEM),  # (98,) conv scalars
        ],
        out_specs=pl.BlockSpec((batch_tile, C, HW), lambda n: (n, 0, 0)),
        compiler_params=pltpu.CompilerParams(
            dimension_semantics=("parallel",),
            vmem_limit_bytes=32 * 1024 * 1024,
        ),
    )(x2, w1, w2, wsp_flat)


def cbam_pallas(x, w1, w2, wsp, *, batch_tile=None):
    N, C, H, W = x.shape
    if batch_tile is None:
        img_bytes = C * H * W * x.dtype.itemsize
        # Grow the block toward ~2 MiB per step, but keep >= 2 parallel grid
        # steps when possible so both v7x TensorCores get work.
        bt = max(1, min(N, (2 * 1024 * 1024) // max(img_bytes, 1)))
        if N >= 2:
            bt = min(bt, max(1, N // 2))
        while N % bt:
            bt -= 1
        batch_tile = bt
    assert N % batch_tile == 0
    x2 = x.reshape(N, C, H * W)
    wsp_flat = jnp.asarray(wsp, jnp.float32).reshape(-1)  # (98,)
    out = _cbam_call(x2, w1, w2, wsp_flat, batch_tile=batch_tile, h=H, w=W)
    return out.reshape(N, C, H, W)


def cbam_reference(x, w1, w2, wsp):
    """Pure-JAX reference mirroring the PyTorch forward."""
    avg_p = jnp.mean(x, axis=(2, 3), keepdims=True)          # (N,C,1,1)
    max_p = jnp.max(x, axis=(2, 3), keepdims=True)

    def fc(p):
        h = jnp.einsum('rc,nchw->nrhw', w1, p)
        h = jnp.maximum(h, 0.0)
        return jnp.einsum('cr,nrhw->nchw', w2, h)

    ca = jax.nn.sigmoid(fc(avg_p) + fc(max_p))
    x1 = x * ca

    avg_m = jnp.mean(x1, axis=1, keepdims=True)
    max_m = jnp.max(x1, axis=1, keepdims=True)
    cat = jnp.concatenate([avg_m, max_m], axis=1)            # (N,2,H,W)
    out = jax.lax.conv_general_dilated(
        cat, wsp[None], window_strides=(1, 1), padding='SAME',
        dimension_numbers=('NCHW', 'OIHW', 'NCHW'))
    sa = jax.nn.sigmoid(out)
    return x1 * sa


if __name__ == "__main__":
    N, C, H, W = 2, 32, 16, 16
    reduction = 16
    Cr = C // reduction

    key = jax.random.PRNGKey(0)
    kx, k1, k2, k3 = jax.random.split(key, 4)

    x = jax.random.normal(kx, (N, C, H, W), dtype=jnp.float32)
    # Parameters: 1x1 conv weights (bias=False) and 7x7 spatial conv weight (bias=False).
    w1 = jax.random.normal(k1, (Cr, C), dtype=jnp.float32) * 0.1     # fc[0]: Conv2d(C, C//r, 1)
    w2 = jax.random.normal(k2, (C, Cr), dtype=jnp.float32) * 0.1     # fc[2]: Conv2d(C//r, C, 1)
    wsp = jax.random.normal(k3, (2, 7, 7), dtype=jnp.float32) * 0.05  # SpatialAttention conv (1,2,7,7)

    out = cbam_pallas(x, w1, w2, wsp)
    out = jax.block_until_ready(out)

    ref = cbam_reference(x, w1, w2, wsp)
    assert out.shape == (N, C, H, W)
    assert jnp.allclose(out, ref, atol=1e-3, rtol=1e-3), "mismatch vs reference"

    print("KERNEL_OK")
</pallas_src>

<mosaic_0001>
module attributes {stable_mosaic.version = 11 : i64} {
  func.func @_cbam_kernel(%arg0: i32, %arg1: memref<1x32x256xf32, #tpu.memory_space<vmem>>, %arg2: memref<2x32xf32, #tpu.memory_space<vmem>>, %arg3: memref<32x2xf32, #tpu.memory_space<vmem>>, %arg4: memref<98xf32, #tpu.memory_space<smem>>, %arg5: memref<1x32x256xf32, #tpu.memory_space<vmem>>) attributes {dimension_semantics = [#tpu.dimension_semantics<parallel>], iteration_bounds = array<i64: 2>, scalar_prefetch = 0 : i64, scratch_operands = 0 : i64, tpu.core_type = #tpu.core_type<tc>, window_params = [{transform_indices = @transform_0, window_bounds = array<i64: 1, 32, 256>}, {pipeline_mode = #tpu.pipeline_mode<synchronous>, transform_indices = @transform_1, window_bounds = array<i64: 2, 32>}, {pipeline_mode = #tpu.pipeline_mode<synchronous>, transform_indices = @transform_2, window_bounds = array<i64: 32, 2>}, {transform_indices = @transform_3, window_bounds = array<i64: 98>}, {transform_indices = @transform_4, window_bounds = array<i64: 1, 32, 256>}]} {
    %c0 = arith.constant 0 : index
    %c0_0 = arith.constant 0 : index
    %0 = vector.load %arg2[%c0, %c0_0] : memref<2x32xf32, #tpu.memory_space<vmem>>, vector<2x32xf32>
    %c0_1 = arith.constant 0 : index
    %c0_2 = arith.constant 0 : index
    %1 = vector.load %arg3[%c0_1, %c0_2] : memref<32x2xf32, #tpu.memory_space<vmem>>, vector<32x2xf32>
    %c0_3 = arith.constant 0 : index
    %2 = memref.load %arg4[%c0_3] : memref<98xf32, #tpu.memory_space<smem>>
    %c1 = arith.constant 1 : index
    %3 = memref.load %arg4[%c1] : memref<98xf32, #tpu.memory_space<smem>>
    %c2 = arith.constant 2 : index
    %4 = memref.load %arg4[%c2] : memref<98xf32, #tpu.memory_space<smem>>
    %c3 = arith.constant 3 : index
    %5 = memref.load %arg4[%c3] : memref<98xf32, #tpu.memory_space<smem>>
    %c4 = arith.constant 4 : index
    %6 = memref.load %arg4[%c4] : memref<98xf32, #tpu.memory_space<smem>>
    %c5 = arith.constant 5 : index
    %7 = memref.load %arg4[%c5] : memref<98xf32, #tpu.memory_space<smem>>
    %c6 = arith.constant 6 : index
    %8 = memref.load %arg4[%c6] : memref<98xf32, #tpu.memory_space<smem>>
    %c7 = arith.constant 7 : index
    %9 = memref.load %arg4[%c7] : memref<98xf32, #tpu.memory_space<smem>>
    %c8 = arith.constant 8 : index
    %10 = memref.load %arg4[%c8] : memref<98xf32, #tpu.memory_space<smem>>
    %c9 = arith.constant 9 : index
    %11 = memref.load %arg4[%c9] : memref<98xf32, #tpu.memory_space<smem>>
    %c10 = arith.constant 10 : index
    %12 = memref.load %arg4[%c10] : memref<98xf32, #tpu.memory_space<smem>>
    %c11 = arith.constant 11 : index
    %13 = memref.load %arg4[%c11] : memref<98xf32, #tpu.memory_space<smem>>
    %c12 = arith.constant 12 : index
    %14 = memref.load %arg4[%c12] : memref<98xf32, #tpu.memory_space<smem>>
    %c13 = arith.constant 13 : index
    %15 = memref.load %arg4[%c13] : memref<98xf32, #tpu.memory_space<smem>>
    %c14 = arith.constant 14 : index
    %16 = memref.load %arg4[%c14] : memref<98xf32, #tpu.memory_space<smem>>
    %c15 = arith.constant 15 : index
    %17 = memref.load %arg4[%c15] : memref<98xf32, #tpu.memory_space<smem>>
    %c16 = arith.constant 16 : index
    %18 = memref.load %arg4[%c16] : memref<98xf32, #tpu.memory_space<smem>>
    %c17 = arith.constant 17 : index
    %19 = memref.load %arg4[%c17] : memref<98xf32, #tpu.memory_space<smem>>
    %c18 = arith.constant 18 : index
    %20 = memref.load %arg4[%c18] : memref<98xf32, #tpu.memory_space<smem>>
    %c19 = arith.constant 19 : index
    %21 = memref.load %arg4[%c19] : memref<98xf32, #tpu.memory_space<smem>>
    %c20 = arith.constant 20 : index
    %22 = memref.load %arg4[%c20] : memref<98xf32, #tpu.memory_space<smem>>
    %c21 = arith.constant 21 : index
    %23 = memref.load %arg4[%c21] : memref<98xf32, #tpu.memory_space<smem>>
    %c22 = arith.constant 22 : index
    %24 = memref.load %arg4[%c22] : memref<98xf32, #tpu.memory_space<smem>>
    %c23 = arith.constant 23 : index
    %25 = memref.load %arg4[%c23] : memref<98xf32, #tpu.memory_space<smem>>
    %c24 = arith.constant 24 : index
    %26 = memref.load %arg4[%c24] : memref<98xf32, #tpu.memory_space<smem>>
    %c25 = arith.constant 25 : index
    %27 = memref.load %arg4[%c25] : memref<98xf32, #tpu.memory_space<smem>>
    %c26 = arith.constant 26 : index
    %28 = memref.load %arg4[%c26] : memref<98xf32, #tpu.memory_space<smem>>
    %c27 = arith.constant 27 : index
    %29 = memref.load %arg4[%c27] : memref<98xf32, #tpu.memory_space<smem>>
    %c28 = arith.constant 28 : index
    %30 = memref.load %arg4[%c28] : memref<98xf32, #tpu.memory_space<smem>>
    %c29 = arith.constant 29 : index
    %31 = memref.load %arg4[%c29] : memref<98xf32, #tpu.memory_space<smem>>
    %c30 = arith.constant 30 : index
    %32 = memref.load %arg4[%c30] : memref<98xf32, #tpu.memory_space<smem>>
    %c31 = arith.constant 31 : index
    %33 = memref.load %arg4[%c31] : memref<98xf32, #tpu.memory_space<smem>>
    %c32 = arith.constant 32 : index
    %34 = memref.load %arg4[%c32] : memref<98xf32, #tpu.memory_space<smem>>
    %c33 = arith.constant 33 : index
    %35 = memref.load %arg4[%c33] : memref<98xf32, #tpu.memory_space<smem>>
    %c34 = arith.constant 34 : index
    %36 = memref.load %arg4[%c34] : memref<98xf32, #tpu.memory_space<smem>>
    %c35 = arith.constant 35 : index
    %37 = memref.load %arg4[%c35] : memref<98xf32, #tpu.memory_space<smem>>
    %c36 = arith.constant 36 : index
    %38 = memref.load %arg4[%c36] : memref<98xf32, #tpu.memory_space<smem>>
    %c37 = arith.constant 37 : index
    %39 = memref.load %arg4[%c37] : memref<98xf32, #tpu.memory_space<smem>>
    %c38 = arith.constant 38 : index
    %40 = memref.load %arg4[%c38] : memref<98xf32, #tpu.memory_space<smem>>
    %c39 = arith.constant 39 : index
    %41 = memref.load %arg4[%c39] : memref<98xf32, #tpu.memory_space<smem>>
    %c40 = arith.constant 40 : index
    %42 = memref.load %arg4[%c40] : memref<98xf32, #tpu.memory_space<smem>>
    %c41 = arith.constant 41 : index
    %43 = memref.load %arg4[%c41] : memref<98xf32, #tpu.memory_space<smem>>
    %c42 = arith.constant 42 : index
    %44 = memref.load %arg4[%c42] : memref<98xf32, #tpu.memory_space<smem>>
    %c43 = arith.constant 43 : index
    %45 = memref.load %arg4[%c43] : memref<98xf32, #tpu.memory_space<smem>>
    %c44 = arith.constant 44 : index
    %46 = memref.load %arg4[%c44] : memref<98xf32, #tpu.memory_space<smem>>
    %c45 = arith.constant 45 : index
    %47 = memref.load %arg4[%c45] : memref<98xf32, #tpu.memory_space<smem>>
    %c46 = arith.constant 46 : index
    %48 = memref.load %arg4[%c46] : memref<98xf32, #tpu.memory_space<smem>>
    %c47 = arith.constant 47 : index
    %49 = memref.load %arg4[%c47] : memref<98xf32, #tpu.memory_space<smem>>
    %c48 = arith.constant 48 : index
    %50 = memref.load %arg4[%c48] : memref<98xf32, #tpu.memory_space<smem>>
    %c49 = arith.constant 49 : index
    %51 = memref.load %arg4[%c49] : memref<98xf32, #tpu.memory_space<smem>>
    %c50 = arith.constant 50 : index
    %52 = memref.load %arg4[%c50] : memref<98xf32, #tpu.memory_space<smem>>
    %c51 = arith.constant 51 : index
    %53 = memref.load %arg4[%c51] : memref<98xf32, #tpu.memory_space<smem>>
    %c52 = arith.constant 52 : index
    %54 = memref.load %arg4[%c52] : memref<98xf32, #tpu.memory_space<smem>>
    %c53 = arith.constant 53 : index
    %55 = memref.load %arg4[%c53] : memref<98xf32, #tpu.memory_space<smem>>
    %c54 = arith.constant 54 : index
    %56 = memref.load %arg4[%c54] : memref<98xf32, #tpu.memory_space<smem>>
    %c55 = arith.constant 55 : index
    %57 = memref.load %arg4[%c55] : memref<98xf32, #tpu.memory_space<smem>>
    %c56 = arith.constant 56 : index
    %58 = memref.load %arg4[%c56] : memref<98xf32, #tpu.memory_space<smem>>
    %c57 = arith.constant 57 : index
    %59 = memref.load %arg4[%c57] : memref<98xf32, #tpu.memory_space<smem>>
    %c58 = arith.constant 58 : index
    %60 = memref.load %arg4[%c58] : memref<98xf32, #tpu.memory_space<smem>>
    %c59 = arith.constant 59 : index
    %61 = memref.load %arg4[%c59] : memref<98xf32, #tpu.memory_space<smem>>
    %c60 = arith.constant 60 : index
    %62 = memref.load %arg4[%c60] : memref<98xf32, #tpu.memory_space<smem>>
    %c61 = arith.constant 61 : index
    %63 = memref.load %arg4[%c61] : memref<98xf32, #tpu.memory_space<smem>>
    %c62 = arith.constant 62 : index
    %64 = memref.load %arg4[%c62] : memref<98xf32, #tpu.memory_space<smem>>
    %c63 = arith.constant 63 : index
    %65 = memref.load %arg4[%c63] : memref<98xf32, #tpu.memory_space<smem>>
    %c64 = arith.constant 64 : index
    %66 = memref.load %arg4[%c64] : memref<98xf32, #tpu.memory_space<smem>>
    %c65 = arith.constant 65 : index
    %67 = memref.load %arg4[%c65] : memref<98xf32, #tpu.memory_space<smem>>
    %c66 = arith.constant 66 : index
    %68 = memref.load %arg4[%c66] : memref<98xf32, #tpu.memory_space<smem>>
    %c67 = arith.constant 67 : index
    %69 = memref.load %arg4[%c67] : memref<98xf32, #tpu.memory_space<smem>>
    %c68 = arith.constant 68 : index
    %70 = memref.load %arg4[%c68] : memref<98xf32, #tpu.memory_space<smem>>
    %c69 = arith.constant 69 : index
    %71 = memref.load %arg4[%c69] : memref<98xf32, #tpu.memory_space<smem>>
    %c70 = arith.constant 70 : index
    %72 = memref.load %arg4[%c70] : memref<98xf32, #tpu.memory_space<smem>>
    %c71 = arith.constant 71 : index
    %73 = memref.load %arg4[%c71] : memref<98xf32, #tpu.memory_space<smem>>
    %c72 = arith.constant 72 : index
    %74 = memref.load %arg4[%c72] : memref<98xf32, #tpu.memory_space<smem>>
    %c73 = arith.constant 73 : index
    %75 = memref.load %arg4[%c73] : memref<98xf32, #tpu.memory_space<smem>>
    %c74 = arith.constant 74 : index
    %76 = memref.load %arg4[%c74] : memref<98xf32, #tpu.memory_space<smem>>
    %c75 = arith.constant 75 : index
    %77 = memref.load %arg4[%c75] : memref<98xf32, #tpu.memory_space<smem>>
    %c76 = arith.constant 76 : index
    %78 = memref.load %arg4[%c76] : memref<98xf32, #tpu.memory_space<smem>>
    %c77 = arith.constant 77 : index
    %79 = memref.load %arg4[%c77] : memref<98xf32, #tpu.memory_space<smem>>
    %c78 = arith.constant 78 : index
    %80 = memref.load %arg4[%c78] : memref<98xf32, #tpu.memory_space<smem>>
    %c79 = arith.constant 79 : index
    %81 = memref.load %arg4[%c79] : memref<98xf32, #tpu.memory_space<smem>>
    %c80 = arith.constant 80 : index
    %82 = memref.load %arg4[%c80] : memref<98xf32, #tpu.memory_space<smem>>
    %c81 = arith.constant 81 : index
    %83 = memref.load %arg4[%c81] : memref<98xf32, #tpu.memory_space<smem>>
    %c82 = arith.constant 82 : index
    %84 = memref.load %arg4[%c82] : memref<98xf32, #tpu.memory_space<smem>>
    %c83 = arith.constant 83 : index
    %85 = memref.load %arg4[%c83] : memref<98xf32, #tpu.memory_space<smem>>
    %c84 = arith.constant 84 : index
    %86 = memref.load %arg4[%c84] : memref<98xf32, #tpu.memory_space<smem>>
    %c85 = arith.constant 85 : index
    %87 = memref.load %arg4[%c85] : memref<98xf32, #tpu.memory_space<smem>>
    %c86 = arith.constant 86 : index
    %88 = memref.load %arg4[%c86] : memref<98xf32, #tpu.memory_space<smem>>
    %c87 = arith.constant 87 : index
    %89 = memref.load %arg4[%c87] : memref<98xf32, #tpu.memory_space<smem>>
    %c88 = arith.constant 88 : index
    %90 = memref.load %arg4[%c88] : memref<98xf32, #tpu.memory_space<smem>>
    %c89 = arith.constant 89 : index
    %91 = memref.load %arg4[%c89] : memref<98xf32, #tpu.memory_space<smem>>
    %c90 = arith.constant 90 : index
    %92 = memref.load %arg4[%c90] : memref<98xf32, #tpu.memory_space<smem>>
    %c91 = arith.constant 91 : index
    %93 = memref.load %arg4[%c91] : memref<98xf32, #tpu.memory_space<smem>>
    %c92 = arith.constant 92 : index
    %94 = memref.load %arg4[%c92] : memref<98xf32, #tpu.memory_space<smem>>
    %c93 = arith.constant 93 : index
    %95 = memref.load %arg4[%c93] : memref<98xf32, #tpu.memory_space<smem>>
    %c94 = arith.constant 94 : index
    %96 = memref.load %arg4[%c94] : memref<98xf32, #tpu.memory_space<smem>>
    %c95 = arith.constant 95 : index
    %97 = memref.load %arg4[%c95] : memref<98xf32, #tpu.memory_space<smem>>
    %c96 = arith.constant 96 : index
    %98 = memref.load %arg4[%c96] : memref<98xf32, #tpu.memory_space<smem>>
    %c97 = arith.constant 97 : index
    %99 = memref.load %arg4[%c97] : memref<98xf32, #tpu.memory_space<smem>>
    %100 = tpu.iota {dimensions = array<i32: 1>} : vector<1x256xi32>
    %c16_i32 = arith.constant 16 : i32
    %c0_i32 = arith.constant 0 : i32
    %101 = arith.cmpi eq, %c16_i32, %c0_i32 : i32
    %c1_i32 = arith.constant 1 : i32
    %102 = arith.select %101, %c1_i32, %c16_i32 : i32
    %103 = vector.broadcast %102 : i32 to vector<1x256xi32>
    %104 = arith.remsi %100, %103 : vector<1x256xi32>
    %c0_i32_4 = arith.constant 0 : i32
    %105 = vector.broadcast %c0_i32_4 : i32 to vector<1x256xi32>
    %106 = arith.cmpi ne, %104, %105 : vector<1x256xi32>
    %c0_i32_5 = arith.constant 0 : i32
    %107 = vector.broadcast %c0_i32_5 : i32 to vector<1x256xi32>
    %108 = arith.cmpi slt, %104, %107 : vector<1x256xi32>
    %c0_i32_6 = arith.constant 0 : i32
    %109 = arith.cmpi slt, %102, %c0_i32_6 : i32
    %110 = vector.broadcast %109 : i1 to vector<1x256xi1>
    %111 = vector.broadcast %110 : vector<1x256xi1> to vector<1x256xi1>
    %112 = arith.xori %108, %111 : vector<1x256xi1>
    %113 = arith.andi %112, %106 : vector<1x256xi1>
    %114 = vector.broadcast %102 : i32 to vector<1x256xi32>
    %115 = arith.addi %104, %114 : vector<1x256xi32>
    %116 = arith.select %113, %115, %104 : vector<1x256xi1>, vector<1x256xi32>
    %c-3_i32 = arith.constant -3 : i32
    %117 = vector.broadcast %c-3_i32 : i32 to vector<1x256xi32>
    %118 = arith.addi %116, %117 : vector<1x256xi32>
    %c0_i32_7 = arith.constant 0 : i32
    %119 = vector.broadcast %c0_i32_7 : i32 to vector<1x256xi32>
    %120 = arith.cmpi sge, %118, %119 : vector<1x256xi32>
    %c-3_i32_8 = arith.constant -3 : i32
    %121 = vector.broadcast %c-3_i32_8 : i32 to vector<1x256xi32>
    %122 = arith.addi %116, %121 : vector<1x256xi32>
    %c16_i32_9 = arith.constant 16 : i32
    %123 = vector.broadcast %c16_i32_9 : i32 to vector<1x256xi32>
    %124 = arith.cmpi slt, %122, %123 : vector<1x256xi32>
    %125 = arith.andi %120, %124 : vector<1x256xi1>
    %126 = arith.extui %125 : vector<1x256xi1> to vector<1x256xi32>
    %127 = arith.sitofp %126 : vector<1x256xi32> to vector<1x256xf32>
    %c-2_i32 = arith.constant -2 : i32
    %128 = vector.broadcast %c-2_i32 : i32 to vector<1x256xi32>
    %129 = arith.addi %116, %128 : vector<1x256xi32>
    %c0_i32_10 = arith.constant 0 : i32
    %130 = vector.broadcast %c0_i32_10 : i32 to vector<1x256xi32>
    %131 = arith.cmpi sge, %129, %130 : vector<1x256xi32>
    %c-2_i32_11 = arith.constant -2 : i32
    %132 = vector.broadcast %c-2_i32_11 : i32 to vector<1x256xi32>
    %133 = arith.addi %116, %132 : vector<1x256xi32>
    %c16_i32_12 = arith.constant 16 : i32
    %134 = vector.broadcast %c16_i32_12 : i32 to vector<1x256xi32>
    %135 = arith.cmpi slt, %133, %134 : vector<1x256xi32>
    %136 = arith.andi %131, %135 : vector<1x256xi1>
    %137 = arith.extui %136 : vector<1x256xi1> to vector<1x256xi32>
    %138 = arith.sitofp %137 : vector<1x256xi32> to vector<1x256xf32>
    %c-1_i32 = arith.constant -1 : i32
    %139 = vector.broadcast %c-1_i32 : i32 to vector<1x256xi32>
    %140 = arith.addi %116, %139 : vector<1x256xi32>
    %c0_i32_13 = arith.constant 0 : i32
    %141 = vector.broadcast %c0_i32_13 : i32 to vector<1x256xi32>
    %142 = arith.cmpi sge, %140, %141 : vector<1x256xi32>
    %c-1_i32_14 = arith.constant -1 : i32
    %143 = vector.broadcast %c-1_i32_14 : i32 to vector<1x256xi32>
    %144 = arith.addi %116, %143 : vector<1x256xi32>
    %c16_i32_15 = arith.constant 16 : i32
    %145 = vector.broadcast %c16_i32_15 : i32 to vector<1x256xi32>
    %146 = arith.cmpi slt, %144, %145 : vector<1x256xi32>
    %147 = arith.andi %142, %146 : vector<1x256xi1>
    %148 = arith.extui %147 : vector<1x256xi1> to vector<1x256xi32>
    %149 = arith.sitofp %148 : vector<1x256xi32> to vector<1x256xf32>
    %c0_i32_16 = arith.constant 0 : i32
    %150 = vector.broadcast %c0_i32_16 : i32 to vector<1x256xi32>
    %151 = arith.addi %116, %150 : vector<1x256xi32>
    %c0_i32_17 = arith.constant 0 : i32
    %152 = vector.broadcast %c0_i32_17 : i32 to vector<1x256xi32>
    %153 = arith.cmpi sge, %151, %152 : vector<1x256xi32>
    %c0_i32_18 = arith.constant 0 : i32
    %154 = vector.broadcast %c0_i32_18 : i32 to vector<1x256xi32>
    %155 = arith.addi %116, %154 : vector<1x256xi32>
    %c16_i32_19 = arith.constant 16 : i32
    %156 = vector.broadcast %c16_i32_19 : i32 to vector<1x256xi32>
    %157 = arith.cmpi slt, %155, %156 : vector<1x256xi32>
    %158 = arith.andi %153, %157 : vector<1x256xi1>
    %159 = arith.extui %158 : vector<1x256xi1> to vector<1x256xi32>
    %160 = arith.sitofp %159 : vector<1x256xi32> to vector<1x256xf32>
    %c1_i32_20 = arith.constant 1 : i32
    %161 = vector.broadcast %c1_i32_20 : i32 to vector<1x256xi32>
    %162 = arith.addi %116, %161 : vector<1x256xi32>
    %c0_i32_21 = arith.constant 0 : i32
    %163 = vector.broadcast %c0_i32_21 : i32 to vector<1x256xi32>
    %164 = arith.cmpi sge, %162, %163 : vector<1x256xi32>
    %c1_i32_22 = arith.constant 1 : i32
    %165 = vector.broadcast %c1_i32_22 : i32 to vector<1x256xi32>
    %166 = arith.addi %116, %165 : vector<1x256xi32>
    %c16_i32_23 = arith.constant 16 : i32
    %167 = vector.broadcast %c16_i32_23 : i32 to vector<1x256xi32>
    %168 = arith.cmpi slt, %166, %167 : vector<1x256xi32>
    %169 = arith.andi %164, %168 : vector<1x256xi1>
    %170 = arith.extui %169 : vector<1x256xi1> to vector<1x256xi32>
    %171 = arith.sitofp %170 : vector<1x256xi32> to vector<1x256xf32>
    %c2_i32 = arith.constant 2 : i32
    %172 = vector.broadcast %c2_i32 : i32 to vector<1x256xi32>
    %173 = arith.addi %116, %172 : vector<1x256xi32>
    %c0_i32_24 = arith.constant 0 : i32
    %174 = vector.broadcast %c0_i32_24 : i32 to vector<1x256xi32>
    %175 = arith.cmpi sge, %173, %174 : vector<1x256xi32>
    %c2_i32_25 = arith.constant 2 : i32
    %176 = vector.broadcast %c2_i32_25 : i32 to vector<1x256xi32>
    %177 = arith.addi %116, %176 : vector<1x256xi32>
    %c16_i32_26 = arith.constant 16 : i32
    %178 = vector.broadcast %c16_i32_26 : i32 to vector<1x256xi32>
    %179 = arith.cmpi slt, %177, %178 : vector<1x256xi32>
    %180 = arith.andi %175, %179 : vector<1x256xi1>
    %181 = arith.extui %180 : vector<1x256xi1> to vector<1x256xi32>
    %182 = arith.sitofp %181 : vector<1x256xi32> to vector<1x256xf32>
    %c3_i32 = arith.constant 3 : i32
    %183 = vector.broadcast %c3_i32 : i32 to vector<1x256xi32>
    %184 = arith.addi %116, %183 : vector<1x256xi32>
    %c0_i32_27 = arith.constant 0 : i32
    %185 = vector.broadcast %c0_i32_27 : i32 to vector<1x256xi32>
    %186 = arith.cmpi sge, %184, %185 : vector<1x256xi32>
    %c3_i32_28 = arith.constant 3 : i32
    %187 = vector.broadcast %c3_i32_28 : i32 to vector<1x256xi32>
    %188 = arith.addi %116, %187 : vector<1x256xi32>
    %c16_i32_29 = arith.constant 16 : i32
    %189 = vector.broadcast %c16_i32_29 : i32 to vector<1x256xi32>
    %190 = arith.cmpi slt, %188, %189 : vector<1x256xi32>
    %191 = arith.andi %186, %190 : vector<1x256xi1>
    %192 = arith.extui %191 : vector<1x256xi1> to vector<1x256xi32>
    %193 = arith.sitofp %192 : vector<1x256xi32> to vector<1x256xf32>
    %cst = arith.constant 0.000000e+00 : f32
    %194 = vector.broadcast %cst : f32 to vector<1x64xf32>
    %c0_30 = arith.constant 0 : index
    %c0_31 = arith.constant 0 : index
    %c0_32 = arith.constant 0 : index
    %195 = vector.load %arg1[%c0_30, %c0_31, %c0_32] : memref<1x32x256xf32, #tpu.memory_space<vmem>>, vector<1x32x256xf32>
    %196 = vector.shape_cast %195 : vector<1x32x256xf32> to vector<32x256xf32>
    %cst_33 = arith.constant dense<0.000000e+00> : vector<32xf32>
    %197 = vector.multi_reduction <add>, %196, %cst_33 [1] : vector<32x256xf32> to vector<32xf32>
    %198 = vector.shape_cast %197 : vector<32xf32> to vector<32x1xf32>
    %cst_34 = arith.constant 3.906250e-03 : f32
    %199 = vector.broadcast %cst_34 : f32 to vector<32x1xf32>
    %200 = arith.mulf %198, %199 : vector<32x1xf32>
    %cst_35 = arith.constant dense<0xFF800000> : vector<32xf32>
    %201 = vector.multi_reduction <maximumf>, %196, %cst_35 [1] : vector<32x256xf32> to vector<32xf32>
    %202 = vector.shape_cast %201 : vector<32xf32> to vector<32x1xf32>
    %203 = tpu.concatenate %200, %202 in 1 : vector<32x1xf32>, vector<32x1xf32> -> vector<32x2xf32>
    %cst_36 = arith.constant dense<0.000000e+00> : vector<2x2xf32>
    %204 = tpu.matmul %0, %203, %cst_36 {dimension_numbers = #tpu.dot_dimension_numbers<[1], [0], [0], [1], [0, 0, 1, 1], [], []>} : vector<2x32xf32>, vector<32x2xf32>, vector<2x2xf32> -> vector<2x2xf32>
    %cst_37 = arith.constant 0.000000e+00 : f32
    %205 = vector.broadcast %cst_37 : f32 to vector<2x2xf32>
    %206 = arith.maximumf %204, %205 : vector<2x2xf32>
    %cst_38 = arith.constant dense<0.000000e+00> : vector<32x2xf32>
    %207 = tpu.matmul %1, %206, %cst_38 {dimension_numbers = #tpu.dot_dimension_numbers<[1], [0], [0], [1], [0, 0, 1, 1], [], []>} : vector<32x2xf32>, vector<2x2xf32>, vector<32x2xf32> -> vector<32x2xf32>
    %208 = vector.extract_strided_slice %207 {offsets = [0, 0], sizes = [32, 1], strides = [1, 1]} : vector<32x2xf32> to vector<32x1xf32>
    %209 = vector.extract_strided_slice %207 {offsets = [0, 1], sizes = [32, 1], strides = [1, 1]} : vector<32x2xf32> to vector<32x1xf32>
    %210 = arith.addf %208, %209 : vector<32x1xf32>
    %211 = arith.negf %210 : vector<32x1xf32>
    %212 = math.exp %211 : vector<32x1xf32>
    %cst_39 = arith.constant 1.000000e+00 : f32
    %213 = vector.broadcast %cst_39 : f32 to vector<32x1xf32>
    %214 = arith.addf %213, %212 : vector<32x1xf32>
    %215 = arith.divf %213, %214 : vector<32x1xf32>
    %216 = vector.broadcast %215 : vector<32x1xf32> to vector<32x256xf32>
    %217 = arith.mulf %196, %216 : vector<32x256xf32>
    %cst_40 = arith.constant dense<0.000000e+00> : vector<256xf32>
    %218 = vector.multi_reduction <add>, %217, %cst_40 [0] : vector<32x256xf32> to vector<256xf32>
    %219 = vector.shape_cast %218 : vector<256xf32> to vector<1x256xf32>
    %cst_41 = arith.constant 3.125000e-02 : f32
    %220 = vector.broadcast %cst_41 : f32 to vector<1x256xf32>
    %221 = arith.mulf %219, %220 : vector<1x256xf32>
    %cst_42 = arith.constant dense<0xFF800000> : vector<256xf32>
    %222 = vector.multi_reduction <maximumf>, %217, %cst_42 [0] : vector<32x256xf32> to vector<256xf32>
    %223 = vector.shape_cast %222 : vector<256xf32> to vector<1x256xf32>
    %224 = tpu.concatenate %194, %221, %194 in 1 : vector<1x64xf32>, vector<1x256xf32>, vector<1x64xf32> -> vector<1x384xf32>
    %225 = tpu.concatenate %194, %223, %194 in 1 : vector<1x64xf32>, vector<1x256xf32>, vector<1x64xf32> -> vector<1x384xf32>
    %cst_43 = arith.constant 0.000000e+00 : f32
    %226 = vector.broadcast %cst_43 : f32 to vector<1x256xf32>
    %227 = vector.extract_strided_slice %224 {offsets = [0, 13], sizes = [1, 256], strides = [1, 1]} : vector<1x384xf32> to vector<1x256xf32>
    %228 = vector.broadcast %2 : f32 to vector<1x256xf32>
    %229 = arith.mulf %228, %227 : vector<1x256xf32>
    %230 = vector.extract_strided_slice %225 {offsets = [0, 13], sizes = [1, 256], strides = [1, 1]} : vector<1x384xf32> to vector<1x256xf32>
    %231 = vector.broadcast %51 : f32 to vector<1x256xf32>
    %232 = arith.mulf %231, %230 : vector<1x256xf32>
    %233 = arith.addf %229, %232 : vector<1x256xf32>
    %234 = arith.mulf %127, %233 : vector<1x256xf32>
    %235 = arith.addf %226, %234 : vector<1x256xf32>
    %236 = vector.extract_strided_slice %224 {offsets = [0, 14], sizes = [1, 256], strides = [1, 1]} : vector<1x384xf32> to vector<1x256xf32>
    %237 = vector.broadcast %3 : f32 to vector<1x256xf32>
    %238 = arith.mulf %237, %236 : vector<1x256xf32>
    %239 = vector.extract_strided_slice %225 {offsets = [0, 14], sizes = [1, 256], strides = [1, 1]} : vector<1x384xf32> to vector<1x256xf32>
    %240 = vector.broadcast %52 : f32 to vector<1x256xf32>
    %241 = arith.mulf %240, %239 : vector<1x256xf32>
    %242 = arith.addf %238, %241 : vector<1x256xf32>
    %243 = arith.mulf %138, %242 : vector<1x256xf32>
    %244 = arith.addf %235, %243 : vector<1x256xf32>
    %245 = vector.extract_strided_slice %224 {offsets = [0, 15], sizes = [1, 256], strides = [1, 1]} : vector<1x384xf32> to vector<1x256xf32>
    %246 = vector.broadcast %4 : f32 to vector<1x256xf32>
    %247 = arith.mulf %246, %245 : vector<1x256xf32>
    %248 = vector.extract_strided_slice %225 {offsets = [0, 15], sizes = [1, 256], strides = [1, 1]} : vector<1x384xf32> to vector<1x256xf32>
    %249 = vector.broadcast %53 : f32 to vector<1x256xf32>
    %250 = arith.mulf %249, %248 : vector<1x256xf32>
    %251 = arith.addf %247, %250 : vector<1x256xf32>
    %252 = arith.mulf %149, %251 : vector<1x256xf32>
    %253 = arith.addf %244, %252 : vector<1x256xf32>
    %254 = vector.extract_strided_slice %224 {offsets = [0, 16], sizes = [1, 256], strides = [1, 1]} : vector<1x384xf32> to vector<1x256xf32>
    %255 = vector.broadcast %5 : f32 to vector<1x256xf32>
    %256 = arith.mulf %255, %254 : vector<1x256xf32>
    %257 = vector.extract_strided_slice %225 {offsets = [0, 16], sizes = [1, 256], strides = [1, 1]} : vector<1x384xf32> to vector<1x256xf32>
    %258 = vector.broadcast %54 : f32 to vector<1x256xf32>
    %259 = arith.mulf %258, %257 : vector<1x256xf32>
    %260 = arith.addf %256, %259 : vector<1x256xf32>
    %261 = arith.mulf %160, %260 : vector<1x256xf32>
    %262 = arith.addf %253, %261 : vector<1x256xf32>
    %263 = vector.extract_strided_slice %224 {offsets = [0, 17], sizes = [1, 256], strides = [1, 1]} : vector<1x384xf32> to vector<1x256xf32>
    %264 = vector.broadcast %6 : f32 to vector<1x256xf32>
    %265 = arith.mulf %264, %263 : vector<1x256xf32>
    %266 = vector.extract_strided_slice %225 {offsets = [0, 17], sizes = [1, 256], strides = [1, 1]} : vector<1x384xf32> to vector<1x256xf32>
    %267 = vector.broadcast %55 : f32 to vector<1x256xf32>
    %268 = arith.mulf %267, %266 : vector<1x256xf32>
    %269 = arith.addf %265, %268 : vector<1x256xf32>
    %270 = arith.mulf %171, %269 : vector<1x256xf32>
    %271 = arith.addf %262, %270 : vector<1x256xf32>
    %272 = vector.extract_strided_slice %224 {offsets = [0, 18], sizes = [1, 256], strides = [1, 1]} : vector<1x384xf32> to vector<1x256xf32>
    %273 = vector.broadcast %7 : f32 to vector<1x256xf32>
    %274 = arith.mulf %273, %272 : vector<1x256xf32>
    %275 = vector.extract_strided_slice %225 {offsets = [0, 18], sizes = [1, 256], strides = [1, 1]} : vector<1x384xf32> to vector<1x256xf32>
    %276 = vector.broadcast %56 : f32 to vector<1x256xf32>
    %277 = arith.mulf %276, %275 : vector<1x256xf32>
    %278 = arith.addf %274, %277 : vector<1x256xf32>
    %279 = arith.mulf %182, %278 : vector<1x256xf32>
    %280 = arith.addf %271, %279 : vector<1x256xf32>
    %281 = vector.extract_strided_slice %224 {offsets = [0, 19], sizes = [1, 256], strides = [1, 1]} : vector<1x384xf32> to vector<1x256xf32>
    %282 = vector.broadcast %8 : f32 to vector<1x256xf32>
    %283 = arith.mulf %282, %281 : vector<1x256xf32>
    %284 = vector.extract_strided_slice %225 {offsets = [0, 19], sizes = [1, 256], strides = [1, 1]} : vector<1x384xf32> to vector<1x256xf32>
    %285 = vector.broadcast %57 : f32 to vector<1x256xf32>
    %286 = arith.mulf %285, %284 : vector<1x256xf32>
    %287 = arith.addf %283, %286 : vector<1x256xf32>
    %288 = arith.mulf %193, %287 : vector<1x256xf32>
    %289 = arith.addf %280, %288 : vector<1x256xf32>
    %290 = vector.extract_strided_slice %224 {offsets = [0, 29], sizes = [1, 256], strides = [1, 1]} : vector<1x384xf32> to vector<1x256xf32>
    %291 = vector.broadcast %9 : f32 to vector<1x256xf32>
    %292 = arith.mulf %291, %290 : vector<1x256xf32>
    %293 = vector.extract_strided_slice %225 {offsets = [0, 29], sizes = [1, 256], strides = [1, 1]} : vector<1x384xf32> to vector<1x256xf32>
    %294 = vector.broadcast %58 : f32 to vector<1x256xf32>
    %295 = arith.mulf %294, %293 : vector<1x256xf32>
    %296 = arith.addf %292, %295 : vector<1x256xf32>
    %297 = arith.mulf %127, %296 : vector<1x256xf32>
    %298 = arith.addf %289, %297 : vector<1x256xf32>
    %299 = vector.extract_strided_slice %224 {offsets = [0, 30], sizes = [1, 256], strides = [1, 1]} : vector<1x384xf32> to vector<1x256xf32>
    %300 = vector.broadcast %10 : f32 to vector<1x256xf32>
    %301 = arith.mulf %300, %299 : vector<1x256xf32>
    %302 = vector.extract_strided_slice %225 {offsets = [0, 30], sizes = [1, 256], strides = [1, 1]} : vector<1x384xf32> to vector<1x256xf32>
    %303 = vector.broadcast %59 : f32 to vector<1x256xf32>
    %304 = arith.mulf %303, %302 : vector<1x256xf32>
    %305 = arith.addf %301, %304 : vector<1x256xf32>
    %306 = arith.mulf %138, %305 : vector<1x256xf32>
    %307 = arith.addf %298, %306 : vector<1x256xf32>
    %308 = vector.extract_strided_slice %224 {offsets = [0, 31], sizes = [1, 256], strides = [1, 1]} : vector<1x384xf32> to vector<1x256xf32>
    %309 = vector.broadcast %11 : f32 to vector<1x256xf32>
    %310 = arith.mulf %309, %308 : vector<1x256xf32>
    %311 = vector.extract_strided_slice %225 {offsets = [0, 31], sizes = [1, 256], strides = [1, 1]} : vector<1x384xf32> to vector<1x256xf32>
    %312 = vector.broadcast %60 : f32 to vector<1x256xf32>
    %313 = arith.mulf %312, %311 : vector<1x256xf32>
    %314 = arith.addf %310, %313 : vector<1x256xf32>
    %315 = arith.mulf %149, %314 : vector<1x256xf32>
    %316 = arith.addf %307, %315 : vector<1x256xf32>
    %317 = vector.extract_strided_slice %224 {offsets = [0, 32], sizes = [1, 256], strides = [1, 1]} : vector<1x384xf32> to vector<1x256xf32>
    %318 = vector.broadcast %12 : f32 to vector<1x256xf32>
    %319 = arith.mulf %318, %317 : vector<1x256xf32>
    %320 = vector.extract_strided_slice %225 {offsets = [0, 32], sizes = [1, 256], strides = [1, 1]} : vector<1x384xf32> to vector<1x256xf32>
    %321 = vector.broadcast %61 : f32 to vector<1x256xf32>
    %322 = arith.mulf %321, %320 : vector<1x256xf32>
    %323 = arith.addf %319, %322 : vector<1x256xf32>
    %324 = arith.mulf %160, %323 : vector<1x256xf32>
    %325 = arith.addf %316, %324 : vector<1x256xf32>
    %326 = vector.extract_strided_slice %224 {offsets = [0, 33], sizes = [1, 256], strides = [1, 1]} : vector<1x384xf32> to vector<1x256xf32>
    %327 = vector.broadcast %13 : f32 to vector<1x256xf32>
    %328 = arith.mulf %327, %326 : vector<1x256xf32>
    %329 = vector.extract_strided_slice %225 {offsets = [0, 33], sizes = [1, 256], strides = [1, 1]} : vector<1x384xf32> to vector<1x256xf32>
    %330 = vector.broadcast %62 : f32 to vector<1x256xf32>
    %331 = arith.mulf %330, %329 : vector<1x256xf32>
    %332 = arith.addf %328, %331 : vector<1x256xf32>
    %333 = arith.mulf %171, %332 : vector<1x256xf32>
    %334 = arith.addf %325, %333 : vector<1x256xf32>
    %335 = vector.extract_strided_slice %224 {offsets = [0, 34], sizes = [1, 256], strides = [1, 1]} : vector<1x384xf32> to vector<1x256xf32>
    %336 = vector.broadcast %14 : f32 to vector<1x256xf32>
    %337 = arith.mulf %336, %335 : vector<1x256xf32>
    %338 = vector.extract_strided_slice %225 {offsets = [0, 34], sizes = [1, 256], strides = [1, 1]} : vector<1x384xf32> to vector<1x256xf32>
    %339 = vector.broadcast %63 : f32 to vector<1x256xf32>
    %340 = arith.mulf %339, %338 : vector<1x256xf32>
    %341 = arith.addf %337, %340 : vector<1x256xf32>
    %342 = arith.mulf %182, %341 : vector<1x256xf32>
    %343 = arith.addf %334, %342 : vector<1x256xf32>
    %344 = vector.extract_strided_slice %224 {offsets = [0, 35], sizes = [1, 256], strides = [1, 1]} : vector<1x384xf32> to vector<1x256xf32>
    %345 = vector.broadcast %15 : f32 to vector<1x256xf32>
    %346 = arith.mulf %345, %344 : vector<1x256xf32>
    %347 = vector.extract_strided_slice %225 {offsets = [0, 35], sizes = [1, 256], strides = [1, 1]} : vector<1x384xf32> to vector<1x256xf32>
    %348 = vector.broadcast %64 : f32 to vector<1x256xf32>
    %349 = arith.mulf %348, %347 : vector<1x256xf32>
    %350 = arith.addf %346, %349 : vector<1x256xf32>
    %351 = arith.mulf %193, %350 : vector<1x256xf32>
    %352 = arith.addf %343, %351 : vector<1x256xf32>
    %353 = vector.extract_strided_slice %224 {offsets = [0, 45], sizes = [1, 256], strides = [1, 1]} : vector<1x384xf32> to vector<1x256xf32>
    %354 = vector.broadcast %16 : f32 to vector<1x256xf32>
    %355 = arith.mulf %354, %353 : vector<1x256xf32>
    %356 = vector.extract_strided_slice %225 {offsets = [0, 45], sizes = [1, 256], strides = [1, 1]} : vector<1x384xf32> to vector<1x256xf32>
    %357 = vector.broadcast %65 : f32 to vector<1x256xf32>
    %358 = arith.mulf %357, %356 : vector<1x256xf32>
    %359 = arith.addf %355, %358 : vector<1x256xf32>
    %360 = arith.mulf %127, %359 : vector<1x256xf32>
    %361 = arith.addf %352, %360 : vector<1x256xf32>
    %362 = vector.extract_strided_slice %224 {offsets = [0, 46], sizes = [1, 256], strides = [1, 1]} : vector<1x384xf32> to vector<1x256xf32>
    %363 = vector.broadcast %17 : f32 to vector<1x256xf32>
    %364 = arith.mulf %363, %362 : vector<1x256xf32>
    %365 = vector.extract_strided_slice %225 {offsets = [0, 46], sizes = [1, 256], strides = [1, 1]} : vector<1x384xf32> to vector<1x256xf32>
    %366 = vector.broadcast %66 : f32 to vector<1x256xf32>
    %367 = arith.mulf %366, %365 : vector<1x256xf32>
    %368 = arith.addf %364, %367 : vector<1x256xf32>
    %369 = arith.mulf %138, %368 : vector<1x256xf32>
    %370 = arith.addf %361, %369 : vector<1x256xf32>
    %371 = vector.extract_strided_slice %224 {offsets = [0, 47], sizes = [1, 256], strides = [1, 1]} : vector<1x384xf32> to vector<1x256xf32>
    %372 = vector.broadcast %18 : f32 to vector<1x256xf32>
    %373 = arith.mulf %372, %371 : vector<1x256xf32>
    %374 = vector.extract_strided_slice %225 {offsets = [0, 47], sizes = [1, 256], strides = [1, 1]} : vector<1x384xf32> to vector<1x256xf32>
    %375 = vector.broadcast %67 : f32 to vector<1x256xf32>
    %376 = arith.mulf %375, %374 : vector<1x256xf32>
    %377 = arith.addf %373, %376 : vector<1x256xf32>
    %378 = arith.mulf %149, %377 : vector<1x256xf32>
    %379 = arith.addf %370, %378 : vector<1x256xf32>
    %380 = vector.extract_strided_slice %224 {offsets = [0, 48], sizes = [1, 256], strides = [1, 1]} : vector<1x384xf32> to vector<1x256xf32>
    %381 = vector.broadcast %19 : f32 to vector<1x256xf32>
    %382 = arith.mulf %381, %380 : vector<1x256xf32>
    %383 = vector.extract_strided_slice %225 {offsets = [0, 48], sizes = [1, 256], strides = [1, 1]} : vector<1x384xf32> to vector<1x256xf32>
    %384 = vector.broadcast %68 : f32 to vector<1x256xf32>
    %385 = arith.mulf %384, %383 : vector<1x256xf32>
    %386 = arith.addf %382, %385 : vector<1x256xf32>
    %387 = arith.mulf %160, %386 : vector<1x256xf32>
    %388 = arith.addf %379, %387 : vector<1x256xf32>
    %389 = vector.extract_strided_slice %224 {offsets = [0, 49], sizes = [1, 256], strides = [1, 1]} : vector<1x384xf32> to vector<1x256xf32>
    %390 = vector.broadcast %20 : f32 to vector<1x256xf32>
    %391 = arith.mulf %390, %389 : vector<1x256xf32>
    %392 = vector.extract_strided_slice %225 {offsets = [0, 49], sizes = [1, 256], strides = [1, 1]} : vector<1x384xf32> to vector<1x256xf32>
    %393 = vector.broadcast %69 : f32 to vector<1x256xf32>
    %394 = arith.mulf %393, %392 : vector<1x256xf32>
    %395 = arith.addf %391, %394 : vector<1x256xf32>
    %396 = arith.mulf %171, %395 : vector<1x256xf32>
    %397 = arith.addf %388, %396 : vector<1x256xf32>
    %398 = vector.extract_strided_slice %224 {offsets = [0, 50], sizes = [1, 256], strides = [1, 1]} : vector<1x384xf32> to vector<1x256xf32>
    %399 = vector.broadcast %21 : f32 to vector<1x256xf32>
    %400 = arith.mulf %399, %398 : vector<1x256xf32>
    %401 = vector.extract_strided_slice %225 {offsets = [0, 50], sizes = [1, 256], strides = [1, 1]} : vector<1x384xf32> to vector<1x256xf32>
    %402 = vector.broadcast %70 : f32 to vector<1x256xf32>
    %403 = arith.mulf %402, %401 : vector<1x256xf32>
    %404 = arith.addf %400, %403 : vector<1x256xf32>
    %405 = arith.mulf %182, %404 : vector<1x256xf32>
    %406 = arith.addf %397, %405 : vector<1x256xf32>
    %407 = vector.extract_strided_slice %224 {offsets = [0, 51], sizes = [1, 256], strides = [1, 1]} : vector<1x384xf32> to vector<1x256xf32>
    %408 = vector.broadcast %22 : f32 to vector<1x256xf32>
    %409 = arith.mulf %408, %407 : vector<1x256xf32>
    %410 = vector.extract_strided_slice %225 {offsets = [0, 51], sizes = [1, 256], strides = [1, 1]} : vector<1x384xf32> to vector<1x256xf32>
    %411 = vector.broadcast %71 : f32 to vector<1x256xf32>
    %412 = arith.mulf %411, %410 : vector<1x256xf32>
    %413 = arith.addf %409, %412 : vector<1x256xf32>
    %414 = arith.mulf %193, %413 : vector<1x256xf32>
    %415 = arith.addf %406, %414 : vector<1x256xf32>
    %416 = vector.extract_strided_slice %224 {offsets = [0, 61], sizes = [1, 256], strides = [1, 1]} : vector<1x384xf32> to vector<1x256xf32>
    %417 = vector.broadcast %23 : f32 to vector<1x256xf32>
    %418 = arith.mulf %417, %416 : vector<1x256xf32>
    %419 = vector.extract_strided_slice %225 {offsets = [0, 61], sizes = [1, 256], strides = [1, 1]} : vector<1x384xf32> to vector<1x256xf32>
    %420 = vector.broadcast %72 : f32 to vector<1x256xf32>
    %421 = arith.mulf %420, %419 : vector<1x256xf32>
    %422 = arith.addf %418, %421 : vector<1x256xf32>
    %423 = arith.mulf %127, %422 : vector<1x256xf32>
    %424 = arith.addf %415, %423 : vector<1x256xf32>
    %425 = vector.extract_strided_slice %224 {offsets = [0, 62], sizes = [1, 256], strides = [1, 1]} : vector<1x384xf32> to vector<1x256xf32>
    %426 = vector.broadcast %24 : f32 to vector<1x256xf32>
    %427 = arith.mulf %426, %425 : vector<1x256xf32>
    %428 = vector.extract_strided_slice %225 {offsets = [0, 62], sizes = [1, 256], strides = [1, 1]} : vector<1x384xf32> to vector<1x256xf32>
    %429 = vector.broadcast %73 : f32 to vector<1x256xf32>
    %430 = arith.mulf %429, %428 : vector<1x256xf32>
    %431 = arith.addf %427, %430 : vector<1x256xf32>
    %432 = arith.mulf %138, %431 : vector<1x256xf32>
    %433 = arith.addf %424, %432 : vector<1x256xf32>
    %434 = vector.extract_strided_slice %224 {offsets = [0, 63], sizes = [1, 256], strides = [1, 1]} : vector<1x384xf32> to vector<1x256xf32>
    %435 = vector.broadcast %25 : f32 to vector<1x256xf32>
    %436 = arith.mulf %435, %434 : vector<1x256xf32>
    %437 = vector.extract_strided_slice %225 {offsets = [0, 63], sizes = [1, 256], strides = [1, 1]} : vector<1x384xf32> to vector<1x256xf32>
    %438 = vector.broadcast %74 : f32 to vector<1x256xf32>
    %439 = arith.mulf %438, %437 : vector<1x256xf32>
    %440 = arith.addf %436, %439 : vector<1x256xf32>
    %441 = arith.mulf %149, %440 : vector<1x256xf32>
    %442 = arith.addf %433, %441 : vector<1x256xf32>
    %443 = vector.extract_strided_slice %224 {offsets = [0, 64], sizes = [1, 256], strides = [1, 1]} : vector<1x384xf32> to vector<1x256xf32>
    %444 = vector.broadcast %26 : f32 to vector<1x256xf32>
    %445 = arith.mulf %444, %443 : vector<1x256xf32>
    %446 = vector.extract_strided_slice %225 {offsets = [0, 64], sizes = [1, 256], strides = [1, 1]} : vector<1x384xf32> to vector<1x256xf32>
    %447 = vector.broadcast %75 : f32 to vector<1x256xf32>
    %448 = arith.mulf %447, %446 : vector<1x256xf32>
    %449 = arith.addf %445, %448 : vector<1x256xf32>
    %450 = arith.mulf %160, %449 : vector<1x256xf32>
    %451 = arith.addf %442, %450 : vector<1x256xf32>
    %452 = vector.extract_strided_slice %224 {offsets = [0, 65], sizes = [1, 256], strides = [1, 1]} : vector<1x384xf32> to vector<1x256xf32>
    %453 = vector.broadcast %27 : f32 to vector<1x256xf32>
    %454 = arith.mulf %453, %452 : vector<1x256xf32>
    %455 = vector.extract_strided_slice %225 {offsets = [0, 65], sizes = [1, 256], strides = [1, 1]} : vector<1x384xf32> to vector<1x256xf32>
    %456 = vector.broadcast %76 : f32 to vector<1x256xf32>
    %457 = arith.mulf %456, %455 : vector<1x256xf32>
    %458 = arith.addf %454, %457 : vector<1x256xf32>
    %459 = arith.mulf %171, %458 : vector<1x256xf32>
    %460 = arith.addf %451, %459 : vector<1x256xf32>
    %461 = vector.extract_strided_slice %224 {offsets = [0, 66], sizes = [1, 256], strides = [1, 1]} : vector<1x384xf32> to vector<1x256xf32>
    %462 = vector.broadcast %28 : f32 to vector<1x256xf32>
    %463 = arith.mulf %462, %461 : vector<1x256xf32>
    %464 = vector.extract_strided_slice %225 {offsets = [0, 66], sizes = [1, 256], strides = [1, 1]} : vector<1x384xf32> to vector<1x256xf32>
    %465 = vector.broadcast %77 : f32 to vector<1x256xf32>
    %466 = arith.mulf %465, %464 : vector<1x256xf32>
    %467 = arith.addf %463, %466 : vector<1x256xf32>
    %468 = arith.mulf %182, %467 : vector<1x256xf32>
    %469 = arith.addf %460, %468 : vector<1x256xf32>
    %470 = vector.extract_strided_slice %224 {offsets = [0, 67], sizes = [1, 256], strides = [1, 1]} : vector<1x384xf32> to vector<1x256xf32>
    %471 = vector.broadcast %29 : f32 to vector<1x256xf32>
    %472 = arith.mulf %471, %470 : vector<1x256xf32>
    %473 = vector.extract_strided_slice %225 {offsets = [0, 67], sizes = [1, 256], strides = [1, 1]} : vector<1x384xf32> to vector<1x256xf32>
    %474 = vector.broadcast %78 : f32 to vector<1x256xf32>
    %475 = arith.mulf %474, %473 : vector<1x256xf32>
    %476 = arith.addf %472, %475 : vector<1x256xf32>
    %477 = arith.mulf %193, %476 : vector<1x256xf32>
    %478 = arith.addf %469, %477 : vector<1x256xf32>
    %479 = vector.extract_strided_slice %224 {offsets = [0, 77], sizes = [1, 256], strides = [1, 1]} : vector<1x384xf32> to vector<1x256xf32>
    %480 = vector.broadcast %30 : f32 to vector<1x256xf32>
    %481 = arith.mulf %480, %479 : vector<1x256xf32>
    %482 = vector.extract_strided_slice %225 {offsets = [0, 77], sizes = [1, 256], strides = [1, 1]} : vector<1x384xf32> to vector<1x256xf32>
    %483 = vector.broadcast %79 : f32 to vector<1x256xf32>
    %484 = arith.mulf %483, %482 : vector<1x256xf32>
    %485 = arith.addf %481, %484 : vector<1x256xf32>
    %486 = arith.mulf %127, %485 : vector<1x256xf32>
    %487 = arith.addf %478, %486 : vector<1x256xf32>
    %488 = vector.extract_strided_slice %224 {offsets = [0, 78], sizes = [1, 256], strides = [1, 1]} : vector<1x384xf32> to vector<1x256xf32>
    %489 = vector.broadcast %31 : f32 to vector<1x256xf32>
    %490 = arith.mulf %489, %488 : vector<1x256xf32>
    %491 = vector.extract_strided_slice %225 {offsets = [0, 78], sizes = [1, 256], strides = [1, 1]} : vector<1x384xf32> to vector<1x256xf32>
    %492 = vector.broadcast %80 : f32 to vector<1x256xf32>
    %493 = arith.mulf %492, %491 : vector<1x256xf32>
    %494 = arith.addf %490, %493 : vector<1x256xf32>
    %495 = arith.mulf %138, %494 : vector<1x256xf32>
    %496 = arith.addf %487, %495 : vector<1x256xf32>
    %497 = vector.extract_strided_slice %224 {offsets = [0, 79], sizes = [1, 256], strides = [1, 1]} : vector<1x384xf32> to vector<1x256xf32>
    %498 = vector.broadcast %32 : f32 to vector<1x256xf32>
    %499 = arith.mulf %498, %497 : vector<1x256xf32>
    %500 = vector.extract_strided_slice %225 {offsets = [0, 79], sizes = [1, 256], strides = [1, 1]} : vector<1x384xf32> to vector<1x256xf32>
    %501 = vector.broadcast %81 : f32 to vector<1x256xf32>
    %502 = arith.mulf %501, %500 : vector<1x256xf32>
    %503 = arith.addf %499, %502 : vector<1x256xf32>
    %504 = arith.mulf %149, %503 : vector<1x256xf32>
    %505 = arith.addf %496, %504 : vector<1x256xf32>
    %506 = vector.extract_strided_slice %224 {offsets = [0, 80], sizes = [1, 256], strides = [1, 1]} : vector<1x384xf32> to vector<1x256xf32>
    %507 = vector.broadcast %33 : f32 to vector<1x256xf32>
    %508 = arith.mulf %507, %506 : vector<1x256xf32>
    %509 = vector.extract_strided_slice %225 {offsets = [0, 80], sizes = [1, 256], strides = [1, 1]} : vector<1x384xf32> to vector<1x256xf32>
    %510 = vector.broadcast %82 : f32 to vector<1x256xf32>
    %511 = arith.mulf %510, %509 : vector<1x256xf32>
    %512 = arith.addf %508, %511 : vector<1x256xf32>
    %513 = arith.mulf %160, %512 : vector<1x256xf32>
    %514 = arith.addf %505, %513 : vector<1x256xf32>
    %515 = vector.extract_strided_slice %224 {offsets = [0, 81], sizes = [1, 256], strides = [1, 1]} : vector<1x384xf32> to vector<1x256xf32>
    %516 = vector.broadcast %34 : f32 to vector<1x256xf32>
    %517 = arith.mulf %516, %515 : vector<1x256xf32>
    %518 = vector.extract_strided_slice %225 {offsets = [0, 81], sizes = [1, 256], strides = [1, 1]} : vector<1x384xf32> to vector<1x256xf32>
    %519 = vector.broadcast %83 : f32 to vector<1x256xf32>
    %520 = arith.mulf %519, %518 : vector<1x256xf32>
    %521 = arith.addf %517, %520 : vector<1x256xf32>
    %522 = arith.mulf %171, %521 : vector<1x256xf32>
    %523 = arith.addf %514, %522 : vector<1x256xf32>
    %524 = vector.extract_strided_slice %224 {offsets = [0, 82], sizes = [1, 256], strides = [1, 1]} : vector<1x384xf32> to vector<1x256xf32>
    %525 = vector.broadcast %35 : f32 to vector<1x256xf32>
    %526 = arith.mulf %525, %524 : vector<1x256xf32>
    %527 = vector.extract_strided_slice %225 {offsets = [0, 82], sizes = [1, 256], strides = [1, 1]} : vector<1x384xf32> to vector<1x256xf32>
    %528 = vector.broadcast %84 : f32 to vector<1x256xf32>
    %529 = arith.mulf %528, %527 : vector<1x256xf32>
    %530 = arith.addf %526, %529 : vector<1x256xf32>
    %531 = arith.mulf %182, %530 : vector<1x256xf32>
    %532 = arith.addf %523, %531 : vector<1x256xf32>
    %533 = vector.extract_strided_slice %224 {offsets = [0, 83], sizes = [1, 256], strides = [1, 1]} : vector<1x384xf32> to vector<1x256xf32>
    %534 = vector.broadcast %36 : f32 to vector<1x256xf32>
    %535 = arith.mulf %534, %533 : vector<1x256xf32>
    %536 = vector.extract_strided_slice %225 {offsets = [0, 83], sizes = [1, 256], strides = [1, 1]} : vector<1x384xf32> to vector<1x256xf32>
    %537 = vector.broadcast %85 : f32 to vector<1x256xf32>
    %538 = arith.mulf %537, %536 : vector<1x256xf32>
    %539 = arith.addf %535, %538 : vector<1x256xf32>
    %540 = arith.mulf %193, %539 : vector<1x256xf32>
    %541 = arith.addf %532, %540 : vector<1x256xf32>
    %542 = vector.extract_strided_slice %224 {offsets = [0, 93], sizes = [1, 256], strides = [1, 1]} : vector<1x384xf32> to vector<1x256xf32>
    %543 = vector.broadcast %37 : f32 to vector<1x256xf32>
    %544 = arith.mulf %543, %542 : vector<1x256xf32>
    %545 = vector.extract_strided_slice %225 {offsets = [0, 93], sizes = [1, 256], strides = [1, 1]} : vector<1x384xf32> to vector<1x256xf32>
    %546 = vector.broadcast %86 : f32 to vector<1x256xf32>
    %547 = arith.mulf %546, %545 : vector<1x256xf32>
    %548 = arith.addf %544, %547 : vector<1x256xf32>
    %549 = arith.mulf %127, %548 : vector<1x256xf32>
    %550 = arith.addf %541, %549 : vector<1x256xf32>
    %551 = vector.extract_strided_slice %224 {offsets = [0, 94], sizes = [1, 256], strides = [1, 1]} : vector<1x384xf32> to vector<1x256xf32>
    %552 = vector.broadcast %38 : f32 to vector<1x256xf32>
    %553 = arith.mulf %552, %551 : vector<1x256xf32>
    %554 = vector.extract_strided_slice %225 {offsets = [0, 94], sizes = [1, 256], strides = [1, 1]} : vector<1x384xf32> to vector<1x256xf32>
    %555 = vector.broadcast %87 : f32 to vector<1x256xf32>
    %556 = arith.mulf %555, %554 : vector<1x256xf32>
    %557 = arith.addf %553, %556 : vector<1x256xf32>
    %558 = arith.mulf %138, %557 : vector<1x256xf32>
    %559 = arith.addf %550, %558 : vector<1x256xf32>
    %560 = vector.extract_strided_slice %224 {offsets = [0, 95], sizes = [1, 256], strides = [1, 1]} : vector<1x384xf32> to vector<1x256xf32>
    %561 = vector.broadcast %39 : f32 to vector<1x256xf32>
    %562 = arith.mulf %561, %560 : vector<1x256xf32>
    %563 = vector.extract_strided_slice %225 {offsets = [0, 95], sizes = [1, 256], strides = [1, 1]} : vector<1x384xf32> to vector<1x256xf32>
    %564 = vector.broadcast %88 : f32 to vector<1x256xf32>
    %565 = arith.mulf %564, %563 : vector<1x256xf32>
    %566 = arith.addf %562, %565 : vector<1x256xf32>
    %567 = arith.mulf %149, %566 : vector<1x256xf32>
    %568 = arith.addf %559, %567 : vector<1x256xf32>
    %569 = vector.extract_strided_slice %224 {offsets = [0, 96], sizes = [1, 256], strides = [1, 1]} : vector<1x384xf32> to vector<1x256xf32>
    %570 = vector.broadcast %40 : f32 to vector<1x256xf32>
    %571 = arith.mulf %570, %569 : vector<1x256xf32>
    %572 = vector.extract_strided_slice %225 {offsets = [0, 96], sizes = [1, 256], strides = [1, 1]} : vector<1x384xf32> to vector<1x256xf32>
    %573 = vector.broadcast %89 : f32 to vector<1x256xf32>
    %574 = arith.mulf %573, %572 : vector<1x256xf32>
    %575 = arith.addf %571, %574 : vector<1x256xf32>
    %576 = arith.mulf %160, %575 : vector<1x256xf32>
    %577 = arith.addf %568, %576 : vector<1x256xf32>
    %578 = vector.extract_strided_slice %224 {offsets = [0, 97], sizes = [1, 256], strides = [1, 1]} : vector<1x384xf32> to vector<1x256xf32>
    %579 = vector.broadcast %41 : f32 to vector<1x256xf32>
    %580 = arith.mulf %579, %578 : vector<1x256xf32>
    %581 = vector.extract_strided_slice %225 {offsets = [0, 97], sizes = [1, 256], strides = [1, 1]} : vector<1x384xf32> to vector<1x256xf32>
    %582 = vector.broadcast %90 : f32 to vector<1x256xf32>
    %583 = arith.mulf %582, %581 : vector<1x256xf32>
    %584 = arith.addf %580, %583 : vector<1x256xf32>
    %585 = arith.mulf %171, %584 : vector<1x256xf32>
    %586 = arith.addf %577, %585 : vector<1x256xf32>
    %587 = vector.extract_strided_slice %224 {offsets = [0, 98], sizes = [1, 256], strides = [1, 1]} : vector<1x384xf32> to vector<1x256xf32>
    %588 = vector.broadcast %42 : f32 to vector<1x256xf32>
    %589 = arith.mulf %588, %587 : vector<1x256xf32>
    %590 = vector.extract_strided_slice %225 {offsets = [0, 98], sizes = [1, 256], strides = [1, 1]} : vector<1x384xf32> to vector<1x256xf32>
    %591 = vector.broadcast %91 : f32 to vector<1x256xf32>
    %592 = arith.mulf %591, %590 : vector<1x256xf32>
    %593 = arith.addf %589, %592 : vector<1x256xf32>
    %594 = arith.mulf %182, %593 : vector<1x256xf32>
    %595 = arith.addf %586, %594 : vector<1x256xf32>
    %596 = vector.extract_strided_slice %224 {offsets = [0, 99], sizes = [1, 256], strides = [1, 1]} : vector<1x384xf32> to vector<1x256xf32>
    %597 = vector.broadcast %43 : f32 to vector<1x256xf32>
    %598 = arith.mulf %597, %596 : vector<1x256xf32>
    %599 = vector.extract_strided_slice %225 {offsets = [0, 99], sizes = [1, 256], strides = [1, 1]} : vector<1x384xf32> to vector<1x256xf32>
    %600 = vector.broadcast %92 : f32 to vector<1x256xf32>
    %601 = arith.mulf %600, %599 : vector<1x256xf32>
    %602 = arith.addf %598, %601 : vector<1x256xf32>
    %603 = arith.mulf %193, %602 : vector<1x256xf32>
    %604 = arith.addf %595, %603 : vector<1x256xf32>
    %605 = vector.extract_strided_slice %224 {offsets = [0, 109], sizes = [1, 256], strides = [1, 1]} : vector<1x384xf32> to vector<1x256xf32>
    %606 = vector.broadcast %44 : f32 to vector<1x256xf32>
    %607 = arith.mulf %606, %605 : vector<1x256xf32>
    %608 = vector.extract_strided_slice %225 {offsets = [0, 109], sizes = [1, 256], strides = [1, 1]} : vector<1x384xf32> to vector<1x256xf32>
    %609 = vector.broadcast %93 : f32 to vector<1x256xf32>
    %610 = arith.mulf %609, %608 : vector<1x256xf32>
    %611 = arith.addf %607, %610 : vector<1x256xf32>
    %612 = arith.mulf %127, %611 : vector<1x256xf32>
    %613 = arith.addf %604, %612 : vector<1x256xf32>
    %614 = vector.extract_strided_slice %224 {offsets = [0, 110], sizes = [1, 256], strides = [1, 1]} : vector<1x384xf32> to vector<1x256xf32>
    %615 = vector.broadcast %45 : f32 to vector<1x256xf32>
    %616 = arith.mulf %615, %614 : vector<1x256xf32>
    %617 = vector.extract_strided_slice %225 {offsets = [0, 110], sizes = [1, 256], strides = [1, 1]} : vector<1x384xf32> to vector<1x256xf32>
    %618 = vector.broadcast %94 : f32 to vector<1x256xf32>
    %619 = arith.mulf %618, %617 : vector<1x256xf32>
    %620 = arith.addf %616, %619 : vector<1x256xf32>
    %621 = arith.mulf %138, %620 : vector<1x256xf32>
    %622 = arith.addf %613, %621 : vector<1x256xf32>
    %623 = vector.extract_strided_slice %224 {offsets = [0, 111], sizes = [1, 256], strides = [1, 1]} : vector<1x384xf32> to vector<1x256xf32>
    %624 = vector.broadcast %46 : f32 to vector<1x256xf32>
    %625 = arith.mulf %624, %623 : vector<1x256xf32>
    %626 = vector.extract_strided_slice %225 {offsets = [0, 111], sizes = [1, 256], strides = [1, 1]} : vector<1x384xf32> to vector<1x256xf32>
    %627 = vector.broadcast %95 : f32 to vector<1x256xf32>
    %628 = arith.mulf %627, %626 : vector<1x256xf32>
    %629 = arith.addf %625, %628 : vector<1x256xf32>
    %630 = arith.mulf %149, %629 : vector<1x256xf32>
    %631 = arith.addf %622, %630 : vector<1x256xf32>
    %632 = vector.extract_strided_slice %224 {offsets = [0, 112], sizes = [1, 256], strides = [1, 1]} : vector<1x384xf32> to vector<1x256xf32>
    %633 = vector.broadcast %47 : f32 to vector<1x256xf32>
    %634 = arith.mulf %633, %632 : vector<1x256xf32>
    %635 = vector.extract_strided_slice %225 {offsets = [0, 112], sizes = [1, 256], strides = [1, 1]} : vector<1x384xf32> to vector<1x256xf32>
    %636 = vector.broadcast %96 : f32 to vector<1x256xf32>
    %637 = arith.mulf %636, %635 : vector<1x256xf32>
    %638 = arith.addf %634, %637 : vector<1x256xf32>
    %639 = arith.mulf %160, %638 : vector<1x256xf32>
    %640 = arith.addf %631, %639 : vector<1x256xf32>
    %641 = vector.extract_strided_slice %224 {offsets = [0, 113], sizes = [1, 256], strides = [1, 1]} : vector<1x384xf32> to vector<1x256xf32>
    %642 = vector.broadcast %48 : f32 to vector<1x256xf32>
    %643 = arith.mulf %642, %641 : vector<1x256xf32>
    %644 = vector.extract_strided_slice %225 {offsets = [0, 113], sizes = [1, 256], strides = [1, 1]} : vector<1x384xf32> to vector<1x256xf32>
    %645 = vector.broadcast %97 : f32 to vector<1x256xf32>
    %646 = arith.mulf %645, %644 : vector<1x256xf32>
    %647 = arith.addf %643, %646 : vector<1x256xf32>
    %648 = arith.mulf %171, %647 : vector<1x256xf32>
    %649 = arith.addf %640, %648 : vector<1x256xf32>
    %650 = vector.extract_strided_slice %224 {offsets = [0, 114], sizes = [1, 256], strides = [1, 1]} : vector<1x384xf32> to vector<1x256xf32>
    %651 = vector.broadcast %49 : f32 to vector<1x256xf32>
    %652 = arith.mulf %651, %650 : vector<1x256xf32>
    %653 = vector.extract_strided_slice %225 {offsets = [0, 114], sizes = [1, 256], strides = [1, 1]} : vector<1x384xf32> to vector<1x256xf32>
    %654 = vector.broadcast %98 : f32 to vector<1x256xf32>
    %655 = arith.mulf %654, %653 : vector<1x256xf32>
    %656 = arith.addf %652, %655 : vector<1x256xf32>
    %657 = arith.mulf %182, %656 : vector<1x256xf32>
    %658 = arith.addf %649, %657 : vector<1x256xf32>
    %659 = vector.extract_strided_slice %224 {offsets = [0, 115], sizes = [1, 256], strides = [1, 1]} : vector<1x384xf32> to vector<1x256xf32>
    %660 = vector.broadcast %50 : f32 to vector<1x256xf32>
    %661 = arith.mulf %660, %659 : vector<1x256xf32>
    %662 = vector.extract_strided_slice %225 {offsets = [0, 115], sizes = [1, 256], strides = [1, 1]} : vector<1x384xf32> to vector<1x256xf32>
    %663 = vector.broadcast %99 : f32 to vector<1x256xf32>
    %664 = arith.mulf %663, %662 : vector<1x256xf32>
    %665 = arith.addf %661, %664 : vector<1x256xf32>
    %666 = arith.mulf %193, %665 : vector<1x256xf32>
    %667 = arith.addf %658, %666 : vector<1x256xf32>
    %668 = arith.negf %667 : vector<1x256xf32>
    %669 = math.exp %668 : vector<1x256xf32>
    %cst_44 = arith.constant 1.000000e+00 : f32
    %670 = vector.broadcast %cst_44 : f32 to vector<1x256xf32>
    %671 = arith.addf %670, %669 : vector<1x256xf32>
    %672 = arith.divf %670, %671 : vector<1x256xf32>
    %673 = vector.broadcast %672 : vector<1x256xf32> to vector<32x256xf32>
    %674 = arith.mulf %217, %673 : vector<32x256xf32>
    %c0_45 = arith.constant 0 : index
    %c0_46 = arith.constant 0 : index
    %c0_47 = arith.constant 0 : index
    %675 = vector.load %arg5[%c0_45, %c0_46, %c0_47] : memref<1x32x256xf32, #tpu.memory_space<vmem>>, vector<1x32x256xf32>
    %676 = vector.shape_cast %675 : vector<1x32x256xf32> to vector<32x256xf32>
    %677 = vector.shape_cast %674 : vector<32x256xf32> to vector<1x32x256xf32>
    tpu.vector_store %arg5[%c0_45, %c0_46, %c0_47], %677 {strides = array<i32>} : memref<1x32x256xf32, #tpu.memory_space<vmem>>, vector<1x32x256xf32>,
    return
  }
  func.func @transform_0(%arg0: i32) -> (i32, i32, i32) {
    %c0_i32 = arith.constant 0 : i32
    %c0_i32_0 = arith.constant 0 : i32
    %c0_i32_1 = arith.constant 0 : i32
    return %arg0, %c0_i32, %c0_i32_0 : i32, i32, i32
  }
  func.func @transform_1(%arg0: i32) -> (i32, i32) {
    %c0_i32 = arith.constant 0 : i32
    %c0_i32_0 = arith.constant 0 : i32
    %c0_i32_1 = arith.constant 0 : i32
    return %c0_i32, %c0_i32_0 : i32, i32
  }
  func.func @transform_2(%arg0: i32) -> (i32, i32) {
    %c0_i32 = arith.constant 0 : i32
    %c0_i32_0 = arith.constant 0 : i32
    %c0_i32_1 = arith.constant 0 : i32
    return %c0_i32, %c0_i32_0 : i32, i32
  }
  func.func @transform_3(%arg0: i32) -> i32 {
    %c0_i32 = arith.constant 0 : i32
    %c0_i32_0 = arith.constant 0 : i32
    return %c0_i32 : i32
  }
  func.func @transform_4(%arg0: i32) -> (i32, i32, i32) {
    %c0_i32 = arith.constant 0 : i32
    %c0_i32_0 = arith.constant 0 : i32
    %c0_i32_1 = arith.constant 0 : i32
    return %arg0, %c0_i32, %c0_i32_0 : i32, i32, i32
  }
}

</mosaic_0001>

<bundles_post_ra>
// kernel: _cbam_call.1
= control target key start
LH: loop header
LB: loop body
LE: loop exit
PB: predicated region body
PF: predicated region fallthrough
CT: control target
= control target key end

     0   :  { %s4082_s0 = inlined_call_operand.hbm [shape: f32[2,32,256], index: 0, kind: input, shape index: {}]   ;;  %s4083_s1 = inlined_call_operand.vmem [shape: f32[2,32], index: 1, kind: input, shape index: {}]   ;;  %s4084_s2 = inlined_call_operand.vmem [shape: f32[32,2], index: 2, kind: input, shape index: {}]   ;;  %s4085_s3 = inlined_call_operand.vmem [shape: f32[98], index: 3, kind: input, shape index: {}]   ;;  %s4086_s4 = inlined_call_operand.hbm [shape: f32[2,32,256], index: 4, kind: output, shape index: {}]  }
   0x1   :  { %4113 = sst [smem:[#allocation37_spill]] %s4082_s0 }
   0x2   :  { %4114 = sst [smem:[#allocation38_spill]] %s4083_s1 }
   0x3   :  { %4115 = sst [smem:[#allocation39_spill]] %s4084_s2 }
   0x4   :  { %9 = vsyncpa [#allocation3], 0 }
   0x5   :  { %11 = vsyncpa [#allocation3 + $0x1], 0 }
   0x6   :  { %12 = vsyncpa [#allocation5], 0 }
   0x7   :  { %13 = vsyncpa [#allocation4], 0 }
   0x8   :  { %15 = vsyncpa [#allocation4 + $0x1], 0  ;;  %s2865_s15 = smov 0   ;;  %s2867_s16 = smov 0  }
   0x9   :  { %s2869_s17 = smov 0   ;;  %s2871_s18 = smov 0  }
   0xa LB: > { %s2886_s19 = sadd.s32 4294967295, %s2778_s18   ;;  %s2349_s20 = sadd.s32 4294967294, %s2778_s18   ;;  %s2778_s18 = sphi %s2871_s18, %s4190_s18   ;;  %s2774_s17 = sphi %s2869_s17, %s4189_s17   ;;  %s2770_s16 = sphi %s2867_s16, %s4188_s16   ;;  %s2766_s15 = sphi %s2865_s15, %s4187_s15  }
   0xb   : > { %s2890_s21 = sadd.s32 1, %s2778_s18   ;;  %s28_s22 = sadd.s32 1, %s2774_s17 }
   0xc   : > { %s25_s23 = ssub.s32 %s2778_s18, %s2890_s21  ;;  %p35_p0 = scmp.ne.s32.totalorder %s2774_s17, %s2770_s16 }
   0xd   : > { %p26_p1 = scmp.eq.s32.totalorder %s25_s23, 0  ;;  %p36_p2 = scmp.eq.s32.totalorder %s2778_s18, 0 }
   0xe   : > { %p41_p3 = scmp.ne.s32.totalorder %s2770_s16, %s2766_s15  ;;  %p4088_p4 = scmp.eq.s32.totalorder %s2886_s19, 0 }
   0xf   : > { %s2902_s24 = scalar_select %p26_p1, %s2774_s17, %s28_s22  }
  0x10   : > { %p2904_p5 = por %p36_p2, %p35_p0  ;;  %p2910_p6 = por %p4088_p4, %p41_p3 }
  0x11   : > { %p128_p7 = scmp.eq.s32.totalorder %s2886_s19, 1  ;;  %p134_p8 = scmp.eq.s32.totalorder %s2349_s20, 1 }
  0x12   : > { %s4117_s26 = scalar_select %p2910_p6, 1, 0 }
  0x13   : > { %p2350_p9 = scmp.ge.s32.totalorder %s2778_s18, 1  ;;  %p141_p10 = scmp.lt.s32.totalorder %s2778_s18, 3 }
  0x14   : > { %p2917_p11 = por %p128_p7, %p35_p0  ;;  %p2921_p12 = por %p134_p8, %p41_p3 }
  0x15   : > { %p2925_p13 = pnand %p2350_p9, %p141_p10  ;;  %s160_s6 = sshll.u32 %s4085_s3, 4  ;;  %s161_s6 = int_to_ptr.vmem [resolvable:$true] %s160_s6 }
  0x16   : > { %s4118_s27 = scalar_select %p2917_p11, 1, 0 }
  0x17   : > { %s4119_s28 = scalar_select %p2921_p12, 1, 0 }
  0x18   : > { %p2531_p1 = pneg %p2925_p13  ;;  %p2544_p2 = scmp.lt.s32.totalorder %s2778_s18, 2 }
  0x19   : > { %s171_s8 = sand.u32 1, %s2774_s17   ;;  %s2663_s11 = scalar_lea.vmem %s161_s6, 16 }
  0x1a   : > { %p2938_p7 = pnand %p2531_p1, %p4088_p4  ;;  %p2945_p3 = pnand %p2544_p2, %p2904_p5 }
  0x1b   : > { %s2353_s10 = sshll.u32 %s171_s8, 6  ;;  %p2664_p8 = scmp.ne.s32.totalorder %s161_s6, %s2663_s11 }
  0x1c   : > { %p2665_p9 = pneg %p2938_p7  ;;  %p2671_p12 = scmp.lt.s32.totalorder %s161_s6, %s161_s6 }
  0x1d   : > { %p2672_p11 = scmp.lt.s32.totalorder %s2663_s11, %s2663_s11 }
  0x1e   : > { %p2666_p10 = pnand %p2665_p9, %p2664_p8 }
  0x1f   : > { %p2673_p1 = por %p2672_p11, %p2671_p12 }
  0x20   : > { %p2667_p0 = pneg %p2666_p10 }
  0x22   : > { %p2674_p4 = pnand %p2673_p1, %p2667_p0 }
  0x24   : > { %2677 = shalt.err (!%p2674_p4)
}
  0x25   : > { %s2780_s12 = smov [#allocation6]   ;;  %s2486_s13 = sshll.u32 %s2778_s18, 10 }
  0x26   : > { %2534 = dma.vmem_to_smem (!%p2938_p7), %s161_s6, 16, %s2780_s12, [#allocation5]  }
  0x27   : > { %s175_s14 = scalar_lea.vmem [#allocation2], %s2353_s10  ;;  %s4123_s0 = sld [smem:[#allocation37_spill]] }
  0x28   : > { %s182_s20 = sshll.u32 %s175_s14, 4  ;;  %s2961_s30 = scalar_lea.sflag [#allocation3], %s171_s8  ;;  %s2959_s20 = int_to_ptr.vmem [resolvable:$true] %s182_s20 }
  0x29   : > { %p2680_p5 = pneg %p2945_p3 }
  0x2d   : > { %s2957_s25 = scalar_lea.hbm %s4123_s0, %s2486_s13  ;;  %s2683_s10 = scalar_lea.hbm %s4123_s0, 2048 }
  0x2e   : > { %s2678_s5 = scalar_lea.hbm %s2957_s25, 1024  ;;  %p2684_p0 = scmp.lt.u32.totalorder %s2957_s25, %s4123_s0 }
  0x2f   : > { %p2679_p4 = scmp.ne.s32.totalorder %s2957_s25, %s2678_s5  ;;  %p2685_p2 = scmp.lt.u32.totalorder %s2683_s10, %s2678_s5 }
  0x30   : > { %p2687_p8 = scmp.lt.u32.totalorder %s2678_s5, %s2957_s25 }
  0x31   : > { %p2681_p11 = pnand %p2680_p5, %p2679_p4  ;;  %p2686_p7 = por %p2685_p2, %p2684_p0 }
  0x33   : > { %p2682_p12 = pneg %p2681_p11  ;;  %p2688_p9 = por %p2687_p8, %p2686_p7 }
  0x35   : > { %p2689_p10 = pnand %p2688_p9, %p2682_p12 }
  0x37   : > { %2692 = shalt.err (!%p2689_p10)
}
  0x38   : > { %s2693_s8 = scalar_lea.vmem %s2959_s20, 1024  ;;  %s2781_s13 = smov [#allocation2]  }
  0x39   : > { %p2694_p1 = scmp.ne.s32.totalorder %s2959_s20, %s2693_s8  ;;  %s2698_s14 = sshll.u32 %s2781_s13, 4  ;;  %s2699_s14 = int_to_ptr.vmem [resolvable:$false] %s2698_s14 }
  0x3a   : > { %s2700_s22 = scalar_lea.vmem %s2699_s14, 2048  ;;  %p2701_p6 = scmp.lt.s32.totalorder %s2959_s20, %s2699_s14 }
  0x3b   : > { %p2696_p4 = pnand %p2694_p1, %p2680_p5  ;;  %p2702_p0 = scmp.lt.s32.totalorder %s2700_s22, %s2693_s8 }
  0x3d   : > { %p2697_p11 = pneg %p2696_p4  ;;  %p2703_p2 = por %p2702_p0, %p2701_p6 }
  0x3f   : > { %p2704_p7 = pnand %p2703_p2, %p2697_p11 }
  0x41   : > { %2707 = shalt.err (!%p2704_p7)
}
  0x42   : > { %s2782_s23 = smov 256   ;;  %s2783_s5 = smov 16  }
  0x43   : > { %2538 = dma.hbm_to_vmem [thread:$0]  (!%p2945_p3), %s2957_s25, 1024, %s2959_s20, %s2961_s30, %s2782_s23, %s2782_s23, %s2783_s5  }
  0x44   : > { %194 = sbr.rel (%p2925_p13) target bundleno = 1556 (0x614), region = 36 }
  0x4b   : > { %s2992_s6 = sand.u32 1, %s2770_s16   ;;  %p4124_p6 = scmp.ne.s32.totalorder %s4117_s26, 0 }
  0x4c   : > { %s4090_s7 = sshll.u32 %s2992_s6, 6  ;;  %s197_s10 = scalar_lea.sflag [#allocation3], %s2992_s6 }
  0x4d   : > { %s200_s11 = scalar_lea.vmem [#allocation2], %s4090_s7 }
  0x4e   : > { %2753 = dma.done.wait (%p4124_p6), %s197_s10, 1024  }
  0x4f   : > { %2755 = vsyncadd (%p4124_p6), %s197_s10, 4294966272  ;;  %p4125_p3 = scmp.eq.s32.totalorder %s2886_s19, 0 }
  0x51   : > { %2757 = dma.done.wait (%p4125_p3), [#allocation5], 16   ;;  %p4126_p13 = pmov %p4125_p3 }
  0x53   : > { %2759 = vsyncadd (%p4126_p13), [#allocation5], 4294967280 }
  0x54   : > { %209 = sfence }
  0x55   : > { %v3006_v0 = vld [vmem:[%s200_s11] sm:$0xff]  ;;  %v3008_v1 = vld [vmem:[%s200_s11 + $0x8] sm:$0xff]  ;;  %v3010_v2 = vld [vmem:[%s200_s11 + $0x10] sm:$0xff]  ;;  %v2784_v16 = vmov 0.0|0.0   ;;  %vm2785_vm0 = vmmov 0   ;;  %v4092_v17 = vmov 0.0  }
  0x56   : > { %v466_v3 = vmax.f32 %v3006_v0, %v3008_v1  ;;  %v450_v4 = vadd.f32 %v3008_v1, %v3006_v0  ;;  %v3016_v5 = vld [vmem:[%s200_s11 + $0x18] sm:$0xff]  ;;  %v3022_v8 = vld [vmem:[%s200_s11 + $0x30] sm:$0xff]  ;;  %v3026_v10 = vld [vmem:[%s200_s11 + $0x20] sm:$0xff]  ;;  %2517 = vmatprep.subr.bf16.mxu0 %v2784_v16  ;;  %2506 = vmatprep.mubr.msk.f32.mxu0 %vm2785_vm0, %v4092_v17  ;;  %vm478_vm1 = vcmask 7168   ;;  %s4127_s1 = sld [smem:[#allocation38_spill]]  ;;  %vm483_vm2 = vcmask 261120  }
  0x57   : > { %v469_v6 = vmax.f32 %v3010_v2, %v3016_v5  ;;  %v453_v7 = vadd.f32 %v3016_v5, %v3010_v2  ;;  %v3024_v9 = vld [vmem:[%s200_s11 + $0x38] sm:$0xff]  ;;  %v3028_v11 = vld [vmem:[%s200_s11 + $0x28] sm:$0xff]  ;;  %s4128_s2 = sld [smem:[#allocation39_spill]]  ;;  %vm558_vm3 = vcmask 15360   ;;  %vm571_vm4 = vcmask 1041408   ;;  %s2787_s22 = smov 127  }
  0x58   : > { %467 = vmax.xlane.f32.xlu1 %v466_v3  ;;  %451 = vadd.xlane.f32.xlu0 %v450_v4  ;;  %v459_v12 = vadd.f32 %v3024_v9, %v3022_v8  ;;  %v456_v13 = vadd.f32 %v3028_v11, %v3026_v10  ;;  %v475_v14 = vmax.f32 %v3022_v8, %v3024_v9  ;;  %v2788_v48 = vmov 0   ;;  %s2789_s23 = smov 64   ;;  %s235_s5 = sld [smem:[#allocation6]] }
  0x59   : > { %v472_v15 = vmax.f32 %v3026_v10, %v3028_v11  ;;  %2637 = vset.pattern.permute.xlu1 %v2788_v48  ;;  %2638 = vset.pattern.permute.xlu0 %v2788_v48  ;;  %s2408_s10 = sld [smem:[#allocation6 + $0x31]]  ;;  %s2409_s26 = sld [smem:[#allocation6 + $0x32]]  ;;  %vm776_vm5 = vcmask 523264   ;;  %vm844_vm11 = vcmask 932864   ;;  %vm815_vm15 = vcmask 941056  }
  0x5a   : > { %s2360_s11 = sld [smem:[#allocation6 + $0x1]]  ;;  %s2361_s29 = sld [smem:[#allocation6 + $0x2]]  ;;  %vm873_vm0 = vcmask 924672  }
  0x5b   : > { %s2410_s9 = sld [smem:[#allocation6 + $0x33]]  ;;  %s2790_s25 = smov 115  }
  0x5c   : > { %470 = vmax.xlane.f32.xlu1 %v469_v6  ;;  %454 = vadd.xlane.f32.xlu0 %v453_v7  ;;  %v230_v36 = vld [vmem:[%s4127_s1] sm:$0x3]  ;;  %s2362_s20 = sld [smem:[#allocation6 + $0x3]]  ;;  %s2411_s30 = sld [smem:[#allocation6 + $0x34]] }
  0x5d   : > { %v231_v37 = vld [vmem:[%s4128_s2] sm:$0xff]  ;;  %v232_v41 = vld [vmem:[%s4128_s2 + $0x8] sm:$0xff]  ;;  %v233_v42 = vld [vmem:[%s4128_s2 + $0x10] sm:$0xff]  ;;  %s2791_s12 = smov 114   ;;  %s2363_s8 = sld [smem:[#allocation6 + $0x4]] }
  0x5e   : > { %2511 = vmatprep.mubr.msk.f32.mxu1 %vm558_vm3, %v231_v37  ;;  %v234_v43 = vld [vmem:[%s4128_s2 + $0x18] sm:$0xff]  ;;  %s2412_s13 = sld [smem:[#allocation6 + $0x35]]  ;;  %s3340_s7 = sld [smem:[#allocation6 + $0x20]] }
  0x5f   : > { %s2364_s14 = sld [smem:[#allocation6 + $0x5]]  ;;  %s3342_s0 = sld [smem:[#allocation6 + $0x52]] }
  0x60   : > { %460 = vadd.xlane.f32.xlu1 %v459_v12  ;;  %457 = vadd.xlane.f32.xlu0 %v456_v13  ;;  %s3347_s1 = sld [smem:[#allocation6 + $0x53]]  ;;  %s3364_s2 = sld [smem:[#allocation6 + $0x55]] }
  0x61   : > { %p4184_p12 = scmp.ne.s32.totalorder %s4118_s27, 0 }
  0x64   : > { %476 = vmax.xlane.f32.xlu1 %v475_v14  ;;  %473 = vmax.xlane.f32.xlu0 %v472_v15 }
  0xe5   : > { %v468_v18 = vpop.xlane.xlu1 %467  ;;  %v452_v19 = vpop.xlane.xlu0 %451 }
  0xe6   : > { %v462_v20 = vmul.f32 0.00390625, %v452_v19 }
  0xe8   : > { %v479_v24 = vsel %vm478_vm1, %v462_v20, %v468_v18 }
  0xe9   : > { %v471_v21 = vpop.xlane.xlu1 %470  ;;  %v455_v22 = vpop.xlane.xlu0 %454 }
  0xea   : > { %v463_v23 = vmul.f32 0.00390625, %v455_v22 }
  0xec   : > { %v480_v25 = vsel %vm478_vm1, %v463_v23, %v471_v21 }
  0xed   : > { %v461_v26 = vpop.xlane.xlu1 %460  ;;  %v458_v27 = vpop.xlane.xlu0 %457  ;;  %v2518_v28 = vpack.c.bf16 %v480_v25, %v479_v24 }
  0xee   : > { %v465_v29 = vmul.f32 0.00390625, %v461_v26  ;;  %v464_v30 = vmul.f32 0.00390625, %v458_v27 }
  0xef   : > { %2519 = vmatpush3.bf16.msra.mxu0 %v2518_v28 }
  0xf0   : > { %2520 = vmatprep.subr.bf16.mxu0 %v2784_v16 }
  0xf1   : > { %v477_v31 = vpop.xlane.xlu1 %476  ;;  %v474_v32 = vpop.xlane.xlu0 %473 }
  0xf2   : > { %v482_v33 = vsel %vm478_vm1, %v465_v29, %v477_v31  ;;  %v481_v34 = vsel %vm478_vm1, %v464_v30, %v474_v32 }
  0xf3   : > { %v2521_v35 = vpack.c.bf16 %v482_v33, %v481_v34 }
  0xf5   : > { %2522 = vmatpush3.bf16.msra.mxu0 %v2521_v35 }
  0xf8   : > { %2507 = vmatmul.mubr.msk.f32.vlgmr.msra.gmra.mrb[0].mxu0 %vm483_vm2, %v230_v36 }
 0x1cb   : > { %v553_v38 = vpop.f32.mrb[0].mxu0 }
 0x1cc   : > { %v557_v39 = vmax.f32 %v553_v38, 0.0  ;;  %v2508_v40 = vpop.f32.mrb[1].mxu0 }
 0x1ce   : > { %2509 = vmatprep.subr.msk.mxu1 %vm571_vm4, %v557_v39 }
 0x1cf   : > { %2510 = vmatpush3.msk.msra.mxu1 %vm571_vm4, %v557_v39  ;;  %vm931_vm4 = vcmask 908288  }
 0x1d0   : > { %2512 = vmatmul.mubr.msk.f32.vlgmr.msra.gmra.mrb[0].mxu1 %vm558_vm3, %v232_v41 }
 0x1d1   : > { %2514 = vmatprep.mubr.msk.f32.mxu1 %vm558_vm3, %v233_v42 }
 0x1d4   : > { %2515 = vmatmul.mubr.msk.f32.gmra.mrb[2].mxu1 %vm558_vm3, %v234_v43 }
 0x2a3   : > { %v2513_v44 = vpop.f32.mrb[0].mxu1 }
 0x2a4   : > { %666 = vrot.lane.b32.xlu1 %v2513_v44, %s2787_s22  ;;  %v641_v45 = vpop.f32.mrb[1].mxu1 }
 0x2a5   : > { %664 = vrot.lane.b32.xlu0 %v641_v45, %s2787_s22 }
 0x2a7   : > { %v2516_v46 = vpop.f32.mrb[2].mxu1 }
 0x2a8   : > { %v651_v47 = vpop.f32.mrb[3].mxu1 }
 0x2a9   : > { %668 = vrot.lane.b32.xlu1 %v651_v47, %s2787_s22 }
 0x2ad   : > { %670 = vrot.lane.b32.xlu1 %v2516_v46, %s2787_s22  ;;  %s2792_s22 = smov 113  }
 0x316   : > { %v667_v49 = vpop.permute.xlu1 %666 }
 0x317   : > { %v677_v50 = vadd.f32 %v2513_v44, %v667_v49  ;;  %v665_v51 = vpop.permute.xlu0 %664 }
 0x318   : > { %v676_v52 = vadd.f32 %v665_v51, %v641_v45 }
 0x319   : > { %v2476_v53 = vmul.f32 -1.442695, %v677_v50 }
 0x31a   : > { %v2475_v54 = vmul.f32 -1.442695, %v676_v52 }
 0x31b   : > { %2639 = vpow2.f32 %v2476_v53  ;;  %v669_v55 = vpop.permute.xlu1 %668 }
 0x31c   : > { %2641 = vpow2.f32 %v2475_v54  ;;  %v678_v56 = vadd.f32 %v669_v55, %v651_v47 }
 0x31e   : > { %v2477_v57 = vmul.f32 -1.442695, %v678_v56 }
 0x31f   : > { %v671_v58 = vpop.permute.xlu1 %670 }
 0x320   : > { %2643 = vpow2.f32 %v2477_v57  ;;  %v679_v59 = vadd.f32 %v2516_v46, %v671_v58 }
 0x322   : > { %v2478_v60 = vmul.f32 -1.442695, %v679_v59 }
 0x324   : > { %2645 = vpow2.f32 %v2478_v60 }
 0x325   : > { %v2640_v61 = vpop.eup %2639 }
 0x326   : > { %v2642_v62 = vpop.eup %2641  ;;  %v693_v63 = vadd.f32 1.0, %v2640_v61 }
 0x327   : > { %v692_v3 = vadd.f32 1.0, %v2642_v62 }
 0x328   : > { %2647 = vrcp.f32 %v693_v63 }
 0x329   : > { %2649 = vrcp.f32 %v692_v3  ;;  %v795_v3 = vstv %s235_s5  ;;  %s2413_s5 = sld [smem:[#allocation6 + $0x36]] }
 0x32a   : > { %v2644_v4 = vpop.eup %2643 }
 0x32b   : > { %v694_v6 = vadd.f32 1.0, %v2644_v4  ;;  %v799_v4 = vstv %s2408_s10  ;;  %s2793_s10 = smov 112  }
 0x32d   : > { %2651 = vrcp.f32 %v694_v6 }
 0x32e   : > { %v2646_v7 = vpop.eup %2645 }
 0x32f   : > { %v695_v12 = vadd.f32 1.0, %v2646_v7 }
 0x331   : > { %2653 = vrcp.f32 %v695_v12 }
 0x332   : > { %v2648_v13 = vpop.eup %2647 }
 0x333   : > { %v2650_v14 = vpop.eup %2649  ;;  %711 = vperm.xlu1 %2637, %v2648_v13  }
 0x334   : > { %706 = vperm.xlu0 %2638, %v2650_v14  }
 0x337   : > { %v2652_v15 = vpop.eup %2651 }
 0x338   : > { %716 = vperm.xlu1 %2637, %v2652_v15   ;;  %v824_v15 = vstv %s2360_s11  ;;  %s2365_s11 = sld [smem:[#allocation6 + $0x6]] }
 0x33b   : > { %v2654_v16 = vpop.eup %2653 }
 0x33c   : > { %721 = vperm.xlu0 %2638, %v2654_v16  }
 0x3b2   : > { %v712_v18 = vpop.permute.xlu1 %711 }
 0x3b3   : > { %v707_v19 = vpop.permute.xlu0 %706  ;;  %v3056_v20 = vmul.f32 %v712_v18, %v3010_v2  ;;  %v3059_v21 = vmul.f32 %v712_v18, %v3016_v5 }
 0x3b4   : > { %v3062_v22 = vmul.f32 %v707_v19, %v3006_v0  ;;  %v3065_v23 = vmul.f32 %v707_v19, %v3008_v1 }
 0x3b5   : > { %4129 = vst [vmem:[#allocation11_spill] sm:$0xff] %v3056_v20  ;;  %4130 = vst [vmem:[#allocation12_spill] sm:$0xff] %v3059_v21 }
 0x3b6   : > { %4131 = vst [vmem:[#allocation13_spill] sm:$0xff] %v3062_v22  ;;  %4132 = vst [vmem:[#allocation14_spill] sm:$0xff] %v3065_v23  ;;  %v732_v2 = vadd.f32 %v3056_v20, %v3062_v22  ;;  %v741_v5 = vadd.f32 %v3059_v21, %v3065_v23 }
 0x3b7   : > { %v717_v24 = vpop.permute.xlu1 %716 }
 0x3b8   : > { %v3068_v25 = vmul.f32 %v717_v24, %v3026_v10  ;;  %v3071_v26 = vmul.f32 %v717_v24, %v3028_v11 }
 0x3ba   : > { %4133 = vst [vmem:[#allocation15_spill] sm:$0xff] %v3068_v25  ;;  %4134 = vst [vmem:[#allocation16_spill] sm:$0xff] %v3071_v26  ;;  %v733_v0 = vadd.f32 %v732_v2, %v3068_v25  ;;  %v742_v28 = vadd.f32 %v741_v5, %v3071_v26  ;;  %v752_v11 = vmax.f32 %v3062_v22, %v3068_v25  ;;  %v828_v5 = vstv %s2409_s26  ;;  %s2414_s26 = sld [smem:[#allocation6 + $0x37]] }
 0x3bb   : > { %v722_v27 = vpop.permute.xlu0 %721  ;;  %v761_v29 = vmax.f32 %v3065_v23, %v3071_v26 }
 0x3bc   : > { %v3080_v1 = vmul.f32 %v722_v27, %v3022_v8  ;;  %v3083_v10 = vmul.f32 %v722_v27, %v3024_v9 }
 0x3be   : > { %4135 = vst [vmem:[#allocation17_spill] sm:$0xff] %v3080_v1  ;;  %4136 = vst [vmem:[#allocation18_spill] sm:$0xff] %v3083_v10  ;;  %v734_v30 = vadd.f32 %v733_v0, %v3080_v1  ;;  %v743_v31 = vadd.f32 %v742_v28, %v3083_v10  ;;  %v753_v32 = vmax.f32 %v3056_v20, %v3080_v1  ;;  %v3438_v1 = vstv %s3364_s2  ;;  %s2818_s2 = smov 50  }
 0x3bf   : > { %v762_v8 = vmax.f32 %v3059_v21, %v3083_v10  ;;  %4142 = vst [vmem:[#allocation24_spill] sm:$0xff] %v3438_v1 }
 0x3c0   : > { %v735_v33 = vrot.slane %v734_v30, 4  ;;  %v744_v34 = vrot.slane %v743_v31, 4  ;;  %v754_v35 = vmax.f32 %v752_v11, %v753_v32 }
 0x3c1   : > { %v763_v9 = vmax.f32 %v761_v29, %v762_v8 }
 0x3c2   : > { %v755_v37 = vrot.slane %v754_v35, 4  ;;  %v745_v38 = vadd.f32 %v744_v34, %v743_v31  ;;  %v736_v39 = vadd.f32 %v735_v33, %v734_v30  ;;  %v853_v34 = vstv %s2361_s29  ;;  %s2366_s29 = sld [smem:[#allocation6 + $0x7]] }
 0x3c3   : > { %v764_v36 = vrot.slane %v763_v9, 4 }
 0x3c4   : > { %v756_v41 = vmax.f32 %v754_v35, %v755_v37  ;;  %v746_v42 = vrot.slane %v745_v38, 2  ;;  %v737_v43 = vrot.slane %v736_v39, 2 }
 0x3c5   : > { %v765_v40 = vmax.f32 %v763_v9, %v764_v36  ;;  %v857_v36 = vstv %s2410_s9  ;;  %s2794_s9 = smov 111  }
 0x3c6   : > { %v757_v45 = vrot.slane %v756_v41, 2  ;;  %v747_v46 = vadd.f32 %v746_v42, %v745_v38  ;;  %v738_v47 = vadd.f32 %v737_v43, %v736_v39 }
 0x3c7   : > { %v766_v44 = vrot.slane %v765_v40, 2 }
 0x3c8   : > { %v758_v49 = vmax.f32 %v756_v41, %v757_v45  ;;  %v748_v50 = vrot.slane %v747_v46, 1  ;;  %v739_v51 = vrot.slane %v738_v47, 1  ;;  %v882_v41 = vstv %s2362_s20  ;;  %s2415_s20 = sld [smem:[#allocation6 + $0x38]] }
 0x3c9   : > { %v767_v48 = vmax.f32 %v765_v40, %v766_v44  ;;  %v886_v44 = vstv %s2411_s30  ;;  %s2367_s30 = sld [smem:[#allocation6 + $0x8]] }
 0x3ca   : > { %v759_v53 = vrot.slane %v758_v49, 1  ;;  %v749_v56 = vadd.f32 %v748_v50, %v747_v46  ;;  %v740_v57 = vadd.f32 %v739_v51, %v738_v47 }
 0x3cb   : > { %v768_v52 = vrot.slane %v767_v48, 1 }
 0x3cc   : > { %v760_v55 = vmax.f32 %v758_v49, %v759_v53  ;;  %v751_v58 = vmul.f32 0.03125, %v749_v56  ;;  %v750_v59 = vmul.f32 0.03125, %v740_v57 }
 0x3cd   : > { %v769_v54 = vmax.f32 %v767_v48, %v768_v52 }
 0x3ce   : > { %785 = vrot.lane.b32.xlu1 %v760_v55, %s2789_s23  ;;  %v911_v55 = vstv %s2363_s8  ;;  %s2368_s8 = sld [smem:[#allocation6 + $0x9]] }
 0x3cf   : > { %787 = vrot.lane.b32.xlu0 %v769_v54, %s2789_s23 }
 0x3d2   : > { %772 = vrot.lane.b32.xlu1 %v750_v59, %s2789_s23 }
 0x3d3   : > { %774 = vrot.lane.b32.xlu0 %v751_v58, %s2789_s23  ;;  %v915_v58 = vstv %s2412_s13  ;;  %s2796_s13 = smov 109  }
 0x440   : > { %v786_v61 = vpop.permute.xlu1 %785 }
 0x441   : > { %v788_v60 = vpop.permute.xlu0 %787  ;;  %v3103_v63 = vsel %vm776_vm5, 0.0, %v786_v61 }
 0x442   : > { %v3100_v62 = vsel %vm776_vm5, %v786_v61, %v788_v60  ;;  %v800_v18 = vmul.f32 %v799_v4, %v3103_v63  ;;  %v3119_v2 = vsel %vm776_vm5, %v788_v60, 0.0  ;;  %v829_v30 = vmul.f32 %v828_v5, %v3103_v63 }
 0x443   : > { %v801_v24 = vmul.f32 %v799_v4, %v3100_v62  ;;  %v802_v29 = vmul.f32 %v799_v4, %v3119_v2  ;;  %v830_v9 = vmul.f32 %v828_v5, %v3100_v62  ;;  %v831_v35 = vmul.f32 %v828_v5, %v3119_v2 }
 0x444   : > { %v773_v7 = vpop.permute.xlu1 %772  ;;  %v858_v42 = vmul.f32 %v857_v36, %v3103_v63  ;;  %v859_v43 = vmul.f32 %v857_v36, %v3100_v62  ;;  %v860_v49 = vmul.f32 %v857_v36, %v3119_v2  ;;  %v887_v50 = vmul.f32 %v886_v44, %v3103_v63 }
 0x445   : > { %v775_v6 = vpop.permute.xlu0 %774  ;;  %v3112_v14 = vsel %vm776_vm5, 0.0, %v773_v7  ;;  %v888_v56 = vmul.f32 %v886_v44, %v3100_v62  ;;  %v889_v57 = vmul.f32 %v886_v44, %v3119_v2  ;;  %v940_v4 = vstv %s2364_s14  ;;  %s2417_s14 = sld [smem:[#allocation6 + $0x3a]] }
 0x446   : > { %v3106_v12 = vsel %vm776_vm5, %v775_v6, 0.0  ;;  %v3109_v13 = vsel %vm776_vm5, %v773_v7, %v775_v6  ;;  %v796_v16 = vmul.f32 %v795_v3, %v3112_v14  ;;  %v825_v11 = vmul.f32 %v824_v15, %v3112_v14 }
 0x447   : > { %v797_v19 = vmul.f32 %v795_v3, %v3109_v13  ;;  %v798_v28 = vmul.f32 %v795_v3, %v3106_v12  ;;  %v826_v8 = vmul.f32 %v824_v15, %v3109_v13  ;;  %v827_v33 = vmul.f32 %v824_v15, %v3106_v12 }
 0x448   : > { %v803_v27 = vadd.f32 %v800_v18, %v796_v16  ;;  %v832_v32 = vadd.f32 %v829_v30, %v825_v11  ;;  %v854_v39 = vmul.f32 %v853_v34, %v3112_v14  ;;  %v855_v40 = vmul.f32 %v853_v34, %v3109_v13 }
 0x449   : > { %v804_v0 = vadd.f32 %v801_v24, %v797_v19  ;;  %v805_v31 = vadd.f32 %v802_v29, %v798_v28  ;;  %v833_v37 = vadd.f32 %v830_v9, %v826_v8  ;;  %v834_v38 = vadd.f32 %v831_v35, %v827_v33 }
 0x44a   : > { %809 = vrot.lane.b32.xlu1 %v803_v27, %s2790_s25  ;;  %v861_v45 = vadd.f32 %v858_v42, %v854_v39  ;;  %v862_v46 = vadd.f32 %v859_v43, %v855_v40  ;;  %v856_v47 = vmul.f32 %v853_v34, %v3106_v12  ;;  %v883_v48 = vmul.f32 %v882_v41, %v3112_v14 }
 0x44b   : > { %811 = vrot.lane.b32.xlu0 %v804_v0, %s2790_s25  ;;  %v884_v53 = vmul.f32 %v882_v41, %v3109_v13  ;;  %v885_v54 = vmul.f32 %v882_v41, %v3106_v12  ;;  %v912_v61 = vmul.f32 %v911_v55, %v3112_v14  ;;  %v913_v3 = vmul.f32 %v911_v55, %v3109_v13 }
 0x44c   : > { %v863_v51 = vadd.f32 %v860_v49, %v856_v47  ;;  %v890_v52 = vadd.f32 %v887_v50, %v883_v48  ;;  %v916_v6 = vmul.f32 %v915_v58, %v3103_v63  ;;  %v917_v7 = vmul.f32 %v915_v58, %v3100_v62 }
 0x44d   : > { %v891_v59 = vadd.f32 %v888_v56, %v884_v53  ;;  %v892_v60 = vadd.f32 %v889_v57, %v885_v54  ;;  %v944_v15 = vstv %s2413_s5  ;;  %v914_v19 = vmul.f32 %v911_v55, %v3106_v12  ;;  %s2369_s5 = sld [smem:[#allocation6 + $0xa]] }
 0x44e   : > { %813 = vrot.lane.b32.xlu1 %v805_v31, %s2790_s25  ;;  %v919_v16 = vadd.f32 %v916_v6, %v912_v61  ;;  %v920_v18 = vadd.f32 %v917_v7, %v913_v3  ;;  %v941_v24 = vmul.f32 %v940_v4, %v3112_v14  ;;  %v918_v5 = vmul.f32 %v915_v58, %v3119_v2  ;;  %s2795_s25 = smov 110  }
 0x44f   : > { %838 = vrot.lane.b32.xlu0 %v832_v32, %s2791_s12  ;;  %v945_v27 = vmul.f32 %v944_v15, %v3103_v63  ;;  %v942_v11 = vmul.f32 %v940_v4, %v3109_v13  ;;  %v943_v29 = vmul.f32 %v940_v4, %v3106_v12  ;;  %v969_v30 = vstv %s2365_s11  ;;  %s2370_s11 = sld [smem:[#allocation6 + $0xb]] }
 0x450   : > { %v921_v0 = vadd.f32 %v918_v5, %v914_v19  ;;  %v946_v31 = vmul.f32 %v944_v15, %v3100_v62  ;;  %v947_v32 = vmul.f32 %v944_v15, %v3119_v2  ;;  %v973_v8 = vstv %s2414_s26  ;;  %s2798_s26 = smov 98  }
 0x451   : > { %v948_v28 = vadd.f32 %v945_v27, %v941_v24  ;;  %v970_v9 = vmul.f32 %v969_v30, %v3112_v14  ;;  %v971_v35 = vmul.f32 %v969_v30, %v3109_v13  ;;  %v998_v36 = vstv %s2366_s29  ;;  %s2419_s29 = sld [smem:[#allocation6 + $0x3c]] }
 0x452   : > { %840 = vrot.lane.b32.xlu1 %v833_v37, %s2791_s12  ;;  %v949_v33 = vadd.f32 %v946_v31, %v942_v11  ;;  %v950_v34 = vadd.f32 %v947_v32, %v943_v29  ;;  %v974_v37 = vmul.f32 %v973_v8, %v3103_v63  ;;  %v1002_v39 = vstv %s2415_s20  ;;  %s2371_s20 = sld [smem:[#allocation6 + $0xc]] }
 0x453   : > { %842 = vrot.lane.b32.xlu0 %v834_v38, %s2791_s12  ;;  %v975_v38 = vmul.f32 %v973_v8, %v3100_v62  ;;  %s2416_s12 = sld [smem:[#allocation6 + $0x39]]  ;;  %v972_v42 = vmul.f32 %v969_v30, %v3106_v12  ;;  %v999_v43 = vmul.f32 %v998_v36, %v3112_v14  ;;  %v976_v44 = vmul.f32 %v973_v8, %v3119_v2 }
 0x454   : > { %v977_v40 = vadd.f32 %v974_v37, %v970_v9  ;;  %v1000_v48 = vmul.f32 %v998_v36, %v3109_v13  ;;  %v1001_v49 = vmul.f32 %v998_v36, %v3106_v12  ;;  %v1027_v50 = vstv %s2367_s30  ;;  %s2372_s30 = sld [smem:[#allocation6 + $0xd]] }
 0x455   : > { %v978_v41 = vadd.f32 %v975_v38, %v971_v35  ;;  %v1028_v56 = vmul.f32 %v1027_v50, %v3112_v14  ;;  %v1029_v57 = vmul.f32 %v1027_v50, %v3109_v13  ;;  %v1056_v58 = vstv %s2368_s8  ;;  %s2421_s8 = sld [smem:[#allocation6 + $0x3e]] }
 0x456   : > { %867 = vrot.lane.b32.xlu1 %v861_v45, %s2792_s22  ;;  %v1003_v45 = vmul.f32 %v1002_v39, %v3103_v63  ;;  %v1060_v61 = vstv %s2417_s14  ;;  %v1030_v6 = vmul.f32 %v1027_v50, %v3106_v12  ;;  %v1057_v7 = vmul.f32 %v1056_v58, %v3112_v14  ;;  %s2373_s14 = sld [smem:[#allocation6 + $0xe]] }
 0x457   : > { %869 = vrot.lane.b32.xlu0 %v862_v46, %s2792_s22  ;;  %v979_v46 = vadd.f32 %v976_v44, %v972_v42  ;;  %v1058_v24 = vmul.f32 %v1056_v58, %v3109_v13  ;;  %v1059_v5 = vmul.f32 %v1056_v58, %v3106_v12  ;;  %v1085_v27 = vstv %s2369_s5  ;;  %s2374_s5 = sld [smem:[#allocation6 + $0xf]] }
 0x458   : > { %v1006_v47 = vadd.f32 %v1003_v45, %v999_v43  ;;  %v1086_v31 = vmul.f32 %v1085_v27, %v3112_v14  ;;  %v1087_v32 = vmul.f32 %v1085_v27, %v3109_v13  ;;  %v1114_v8 = vstv %s2370_s11  ;;  %s2423_s11 = sld [smem:[#allocation6 + $0x40]] }
 0x459   : > { %v1031_v53 = vstv %s2416_s12  ;;  %v1118_v9 = vstv %s2419_s29  ;;  %v1088_v37 = vmul.f32 %v1085_v27, %v3106_v12  ;;  %v1115_v38 = vmul.f32 %v1114_v8, %v3112_v14  ;;  %s2800_s12 = smov 96   ;;  %s2375_s29 = sld [smem:[#allocation6 + $0x10]] }
 0x45a   : > { %871 = vrot.lane.b32.xlu1 %v863_v51, %s2792_s22  ;;  %s2797_s22 = smov 99   ;;  %v1004_v51 = vmul.f32 %v1002_v39, %v3100_v62  ;;  %v1034_v15 = vmul.f32 %v1031_v53, %v3119_v2  ;;  %v1116_v43 = vmul.f32 %v1114_v8, %v3109_v13  ;;  %v1117_v44 = vmul.f32 %v1114_v8, %v3106_v12 }
 0x45b   : > { %896 = vrot.lane.b32.xlu0 %v890_v52, %s2793_s10  ;;  %v1005_v52 = vmul.f32 %v1002_v39, %v3119_v2  ;;  %v1143_v45 = vstv %s2371_s20  ;;  %s2376_s20 = sld [smem:[#allocation6 + $0x11]] }
 0x45c   : > { %v1007_v54 = vadd.f32 %v1004_v51, %v1000_v48  ;;  %v1144_v51 = vmul.f32 %v1143_v45, %v3112_v14 }
 0x45d   : > { %v1008_v55 = vadd.f32 %v1005_v52, %v1001_v49  ;;  %v1145_v52 = vmul.f32 %v1143_v45, %v3109_v13 }
 0x45e   : > { %898 = vrot.lane.b32.xlu1 %v891_v59, %s2793_s10  ;;  %v1032_v59 = vmul.f32 %v1031_v53, %v3103_v63 }
 0x45f   : > { %900 = vrot.lane.b32.xlu0 %v892_v60, %s2793_s10  ;;  %v1033_v60 = vmul.f32 %v1031_v53, %v3100_v62  ;;  %s2418_s10 = sld [smem:[#allocation6 + $0x3b]]  ;;  %v1172_v53 = vstv %s2372_s30  ;;  %s2425_s30 = sld [smem:[#allocation6 + $0x42]] }
 0x460   : > { %v1035_v3 = vadd.f32 %v1032_v59, %v1028_v56  ;;  %v1176_v56 = vstv %s2421_s8  ;;  %v1146_v59 = vmul.f32 %v1143_v45, %v3106_v12  ;;  %s2377_s8 = sld [smem:[#allocation6 + $0x12]] }
 0x461   : > { %v1036_v4 = vadd.f32 %v1033_v60, %v1029_v57  ;;  %v1173_v60 = vmul.f32 %v1172_v53, %v3112_v14 }
 0x462   : > { %925 = vrot.lane.b32.xlu1 %v919_v16, %s2794_s9  ;;  %v1061_v16 = vmul.f32 %v1060_v61, %v3103_v63 }
 0x463   : > { %927 = vrot.lane.b32.xlu0 %v920_v18, %s2794_s9  ;;  %v1037_v18 = vadd.f32 %v1034_v15, %v1030_v6  ;;  %v1175_v15 = vmul.f32 %v1172_v53, %v3106_v12 }
 0x464   : > { %v1064_v19 = vadd.f32 %v1061_v16, %v1057_v7  ;;  %v1174_v7 = vmul.f32 %v1172_v53, %v3109_v13  ;;  %v1201_v16 = vstv %s2373_s14  ;;  %s2378_s14 = sld [smem:[#allocation6 + $0x13]] }
 0x465   : > { %v1089_v11 = vstv %s2418_s10  ;;  %s2802_s10 = smov 94  }
 0x466   : > { %929 = vrot.lane.b32.xlu1 %v921_v0, %s2794_s9  ;;  %s2799_s9 = smov 97   ;;  %v1062_v0 = vmul.f32 %v1060_v61, %v3100_v62  ;;  %v1092_v39 = vmul.f32 %v1089_v11, %v3119_v2 }
 0x467   : > { %954 = vrot.lane.b32.xlu0 %v948_v28, %s2795_s25  ;;  %v1063_v28 = vmul.f32 %v1060_v61, %v3119_v2 }
 0x468   : > { %v1065_v29 = vadd.f32 %v1062_v0, %v1058_v24  ;;  %v1202_v0 = vmul.f32 %v1201_v16, %v3112_v14 }
 0x469   : > { %v1066_v30 = vadd.f32 %v1063_v28, %v1059_v5  ;;  %v1203_v28 = vmul.f32 %v1201_v16, %v3109_v13 }
 0x46a   : > { %956 = vrot.lane.b32.xlu1 %v949_v33, %s2795_s25  ;;  %v1090_v33 = vmul.f32 %v1089_v11, %v3103_v63 }
 0x46b   : > { %958 = vrot.lane.b32.xlu0 %v950_v34, %s2795_s25  ;;  %v1091_v34 = vmul.f32 %v1089_v11, %v3100_v62  ;;  %s2420_s25 = sld [smem:[#allocation6 + $0x3d]]  ;;  %v1230_v11 = vstv %s2374_s5  ;;  %s2427_s5 = sld [smem:[#allocation6 + $0x44]] }
 0x46c   : > { %v1093_v35 = vadd.f32 %v1090_v33, %v1086_v31  ;;  %v1234_v31 = vstv %s2423_s11  ;;  %v1204_v33 = vmul.f32 %v1201_v16, %v3106_v12  ;;  %s2379_s11 = sld [smem:[#allocation6 + $0x14]] }
 0x46d   : > { %v1094_v36 = vadd.f32 %v1091_v34, %v1087_v32  ;;  %v1231_v34 = vmul.f32 %v1230_v11, %v3112_v14 }
 0x46e   : > { %983 = vrot.lane.b32.xlu1 %v977_v40, %s2796_s13  ;;  %v1119_v40 = vmul.f32 %v1118_v9, %v3103_v63 }
 0x46f   : > { %985 = vrot.lane.b32.xlu0 %v978_v41, %s2796_s13  ;;  %v1095_v41 = vadd.f32 %v1092_v39, %v1088_v37  ;;  %v1233_v39 = vmul.f32 %v1230_v11, %v3106_v12 }
 0x470   : > { %v1122_v42 = vadd.f32 %v1119_v40, %v1115_v38  ;;  %v1232_v38 = vmul.f32 %v1230_v11, %v3109_v13  ;;  %v1259_v40 = vstv %s2375_s29  ;;  %s2380_s29 = sld [smem:[#allocation6 + $0x15]] }
 0x471   : > { %v1147_v48 = vstv %s2420_s25  ;;  %s2804_s25 = smov 83  }
 0x472   : > { %987 = vrot.lane.b32.xlu1 %v979_v46, %s2796_s13  ;;  %s2801_s13 = smov 95   ;;  %v1120_v46 = vmul.f32 %v1118_v9, %v3100_v62  ;;  %v1150_v61 = vmul.f32 %v1147_v48, %v3119_v2 }
 0x473   : > { %1012 = vrot.lane.b32.xlu0 %v1006_v47, %s2797_s22  ;;  %v1121_v47 = vmul.f32 %v1118_v9, %v3119_v2 }
 0x474   : > { %v1123_v49 = vadd.f32 %v1120_v46, %v1116_v43  ;;  %v1260_v46 = vmul.f32 %v1259_v40, %v3112_v14 }
 0x475   : > { %v1124_v50 = vadd.f32 %v1121_v47, %v1117_v44  ;;  %v1261_v47 = vmul.f32 %v1259_v40, %v3109_v13 }
 0x476   : > { %1014 = vrot.lane.b32.xlu1 %v1007_v54, %s2797_s22  ;;  %v1148_v54 = vmul.f32 %v1147_v48, %v3103_v63 }
 0x477   : > { %1016 = vrot.lane.b32.xlu0 %v1008_v55, %s2797_s22  ;;  %v1149_v55 = vmul.f32 %v1147_v48, %v3100_v62  ;;  %s2422_s22 = sld [smem:[#allocation6 + $0x3f]]  ;;  %v1288_v48 = vstv %s2376_s20  ;;  %s2429_s20 = sld [smem:[#allocation6 + $0x46]] }
 0x478   : > { %v1151_v57 = vadd.f32 %v1148_v54, %v1144_v51  ;;  %v1292_v51 = vstv %s2425_s30  ;;  %v1262_v54 = vmul.f32 %v1259_v40, %v3106_v12  ;;  %s2381_s30 = sld [smem:[#allocation6 + $0x16]] }
 0x479   : > { %v1152_v58 = vadd.f32 %v1149_v55, %v1145_v52  ;;  %v1289_v55 = vmul.f32 %v1288_v48, %v3112_v14 }
 0x47a   : > { %1041 = vrot.lane.b32.xlu1 %v1035_v3, %s2798_s26  ;;  %v1177_v3 = vmul.f32 %v1176_v56, %v3103_v63 }
 0x47b   : > { %1043 = vrot.lane.b32.xlu0 %v1036_v4, %s2798_s26  ;;  %v1153_v4 = vadd.f32 %v1150_v61, %v1146_v59  ;;  %v1291_v61 = vmul.f32 %v1288_v48, %v3106_v12 }
 0x47c   : > { %v1180_v6 = vadd.f32 %v1177_v3, %v1173_v60  ;;  %v1290_v60 = vmul.f32 %v1288_v48, %v3109_v13  ;;  %v1317_v3 = vstv %s2377_s8  ;;  %s2382_s8 = sld [smem:[#allocation6 + $0x17]] }
 0x47d   : > { %v1205_v24 = vstv %s2422_s22  ;;  %s2806_s22 = smov 81   ;;  %v1408_v48 = vstv %s2429_s20  ;;  %s3291_s20 = sld [smem:[#allocation6 + $0x1a]] }
 0x47e   : > { %1045 = vrot.lane.b32.xlu1 %v1037_v18, %s2798_s26  ;;  %s2803_s26 = smov 93   ;;  %v1178_v18 = vmul.f32 %v1176_v56, %v3100_v62  ;;  %v1208_v9 = vmul.f32 %v1205_v24, %v3119_v2 }
 0x47f   : > { %1070 = vrot.lane.b32.xlu0 %v1064_v19, %s2799_s9  ;;  %v1179_v19 = vmul.f32 %v1176_v56, %v3119_v2 }
 0x480   : > { %v1181_v5 = vadd.f32 %v1178_v18, %v1174_v7  ;;  %v1318_v18 = vmul.f32 %v1317_v3, %v3112_v14 }
 0x481   : > { %v1182_v27 = vadd.f32 %v1179_v19, %v1175_v15  ;;  %v1319_v19 = vmul.f32 %v1317_v3, %v3109_v13 }
 0x482   : > { %1072 = vrot.lane.b32.xlu1 %v1065_v29, %s2799_s9  ;;  %v1206_v29 = vmul.f32 %v1205_v24, %v3103_v63 }
 0x483   : > { %1074 = vrot.lane.b32.xlu0 %v1066_v30, %s2799_s9  ;;  %v1207_v30 = vmul.f32 %v1205_v24, %v3100_v62  ;;  %s2424_s9 = sld [smem:[#allocation6 + $0x41]]  ;;  %v1346_v24 = vstv %s2378_s14  ;;  %s2431_s14 = sld [smem:[#allocation6 + $0x48]] }
 0x484   : > { %v1209_v32 = vadd.f32 %v1206_v29, %v1202_v0  ;;  %v1350_v0 = vstv %s2427_s5  ;;  %v1320_v29 = vmul.f32 %v1317_v3, %v3106_v12  ;;  %s2383_s5 = sld [smem:[#allocation6 + $0x18]] }
 0x485   : > { %v1210_v8 = vadd.f32 %v1207_v30, %v1203_v28  ;;  %v1347_v30 = vmul.f32 %v1346_v24, %v3112_v14 }
 0x486   : > { %1099 = vrot.lane.b32.xlu1 %v1093_v35, %s2800_s12  ;;  %v1235_v35 = vmul.f32 %v1234_v31, %v3103_v63 }
 0x487   : > { %1101 = vrot.lane.b32.xlu0 %v1094_v36, %s2800_s12  ;;  %v1211_v36 = vadd.f32 %v1208_v9, %v1204_v33  ;;  %v1349_v9 = vmul.f32 %v1346_v24, %v3106_v12 }
 0x488   : > { %v1238_v37 = vadd.f32 %v1235_v35, %v1231_v34  ;;  %v1348_v34 = vmul.f32 %v1346_v24, %v3109_v13  ;;  %v1375_v35 = vstv %s2379_s11  ;;  %s2384_s11 = sld [smem:[#allocation6 + $0x19]] }
 0x489   : > { %v1263_v43 = vstv %s2424_s9  ;;  %s2808_s9 = smov 79  }
 0x48a   : > { %1103 = vrot.lane.b32.xlu1 %v1095_v41, %s2800_s12  ;;  %s2805_s12 = smov 82   ;;  %v1236_v41 = vmul.f32 %v1234_v31, %v3100_v62  ;;  %v1266_v56 = vmul.f32 %v1263_v43, %v3119_v2 }
 0x48b   : > { %1128 = vrot.lane.b32.xlu0 %v1122_v42, %s2801_s13  ;;  %v1237_v42 = vmul.f32 %v1234_v31, %v3119_v2 }
 0x48c   : > { %v1239_v44 = vadd.f32 %v1236_v41, %v1232_v38 }
 0x48d   : > { %v1240_v45 = vadd.f32 %v1237_v42, %v1233_v39 }
 0x48e   : > { %1130 = vrot.lane.b32.xlu1 %v1123_v49, %s2801_s13  ;;  %v1264_v49 = vmul.f32 %v1263_v43, %v3103_v63 }
 0x48f   : > { %1132 = vrot.lane.b32.xlu0 %v1124_v50, %s2801_s13  ;;  %v1265_v50 = vmul.f32 %v1263_v43, %v3100_v62  ;;  %s2426_s13 = sld [smem:[#allocation6 + $0x43]]  ;;  %v1376_v43 = vmul.f32 %v1375_v35, %v3112_v14 }
 0x490   : > { %v1267_v52 = vadd.f32 %v1264_v49, %v1260_v46 }
 0x491   : > { %v1268_v53 = vadd.f32 %v1265_v50, %v1261_v47 }
 0x492   : > { %1157 = vrot.lane.b32.xlu1 %v1151_v57, %s2802_s10  ;;  %v1293_v57 = vmul.f32 %v1292_v51, %v3103_v63 }
 0x493   : > { %1159 = vrot.lane.b32.xlu0 %v1152_v58, %s2802_s10  ;;  %v1269_v58 = vadd.f32 %v1266_v56, %v1262_v54  ;;  %v1409_v56 = vmul.f32 %v1408_v48, %v3103_v63 }
 0x494   : > { %v1296_v59 = vadd.f32 %v1293_v57, %v1289_v55 }
 0x495   : > { %v1321_v7 = vstv %s2426_s13  ;;  %s2810_s13 = smov 77  }
 0x496   : > { %1161 = vrot.lane.b32.xlu1 %v1153_v4, %s2802_s10  ;;  %s2807_s10 = smov 80   ;;  %v1294_v4 = vmul.f32 %v1292_v51, %v3100_v62  ;;  %v1324_v31 = vmul.f32 %v1321_v7, %v3119_v2 }
 0x497   : > { %1186 = vrot.lane.b32.xlu0 %v1180_v6, %s2803_s26  ;;  %v1295_v6 = vmul.f32 %v1292_v51, %v3119_v2 }
 0x498   : > { %v1297_v15 = vadd.f32 %v1294_v4, %v1290_v60  ;;  %v1433_v4 = vstv %s2381_s30  ;;  %s3303_s30 = sld [smem:[#allocation6 + $0x4c]] }
 0x499   : > { %v1298_v16 = vadd.f32 %v1295_v6, %v1291_v61  ;;  %v1410_v6 = vmul.f32 %v1408_v48, %v3100_v62 }
 0x49a   : > { %1188 = vrot.lane.b32.xlu1 %v1181_v5, %s2803_s26  ;;  %v1322_v5 = vmul.f32 %v1321_v7, %v3103_v63 }
 0x49b   : > { %1190 = vrot.lane.b32.xlu0 %v1182_v27, %s2803_s26  ;;  %v1323_v27 = vmul.f32 %v1321_v7, %v3100_v62  ;;  %s2428_s26 = sld [smem:[#allocation6 + $0x45]]  ;;  %v1411_v7 = vmul.f32 %v1408_v48, %v3119_v2 }
 0x49c   : > { %v1325_v28 = vadd.f32 %v1322_v5, %v1318_v18  ;;  %v1434_v5 = vmul.f32 %v1433_v4, %v3112_v14 }
 0x49d   : > { %v1326_v11 = vadd.f32 %v1323_v27, %v1319_v19  ;;  %v1435_v27 = vmul.f32 %v1433_v4, %v3109_v13 }
 0x49e   : > { %1215 = vrot.lane.b32.xlu1 %v1209_v32, %s2804_s25  ;;  %v1351_v32 = vmul.f32 %v1350_v0, %v3103_v63 }
 0x49f   : > { %1217 = vrot.lane.b32.xlu0 %v1210_v8, %s2804_s25  ;;  %v1327_v8 = vadd.f32 %v1324_v31, %v1320_v29  ;;  %v1466_v29 = vstv %s2431_s14  ;;  %s3315_s14 = sld [smem:[#allocation6 + $0x1c]] }
 0x4a0   : > { %v1354_v33 = vadd.f32 %v1351_v32, %v1347_v30 }
 0x4a1   : > { %v1379_v38 = vstv %s2428_s26  ;;  %s2812_s26 = smov 66  }
 0x4a2   : > { %1219 = vrot.lane.b32.xlu1 %v1211_v36, %s2804_s25  ;;  %s2809_s25 = smov 78   ;;  %v1352_v36 = vmul.f32 %v1350_v0, %v3100_v62  ;;  %v1380_v46 = vmul.f32 %v1379_v38, %v3103_v63  ;;  %v1381_v47 = vmul.f32 %v1379_v38, %v3100_v62  ;;  %v1382_v55 = vmul.f32 %v1379_v38, %v3119_v2 }
 0x4a3   : > { %1244 = vrot.lane.b32.xlu0 %v1238_v37, %s2805_s12  ;;  %v1353_v37 = vmul.f32 %v1350_v0, %v3119_v2  ;;  %v1462_v0 = vstv %s2382_s8  ;;  %s3307_s8 = sld [smem:[#allocation6 + $0x1b]] }
 0x4a4   : > { %v1355_v41 = vadd.f32 %v1352_v36, %v1348_v34  ;;  %v1383_v51 = vadd.f32 %v1380_v46, %v1376_v43  ;;  %v1463_v34 = vmul.f32 %v1462_v0, %v3112_v14  ;;  %v1465_v43 = vmul.f32 %v1462_v0, %v3106_v12 }
 0x4a5   : > { %v1356_v42 = vadd.f32 %v1353_v37, %v1349_v9  ;;  %v1469_v46 = vmul.f32 %v1466_v29, %v3119_v2 }
 0x4a6   : > { %1246 = vrot.lane.b32.xlu1 %v1239_v44, %s2805_s12  ;;  %v1377_v44 = vmul.f32 %v1375_v35, %v3109_v13 }
 0x4a7   : > { %1248 = vrot.lane.b32.xlu0 %v1240_v45, %s2805_s12  ;;  %v1404_v45 = vstv %s2380_s29  ;;  %s2430_s12 = sld [smem:[#allocation6 + $0x47]]  ;;  %s2433_s29 = sld [smem:[#allocation6 + $0x4a]] }
 0x4a8   : > { %v1405_v54 = vmul.f32 %v1404_v45, %v3112_v14  ;;  %v1406_v61 = vmul.f32 %v1404_v45, %v3109_v13  ;;  %v1407_v3 = vmul.f32 %v1404_v45, %v3106_v12  ;;  %v1468_v45 = vmul.f32 %v1466_v29, %v3100_v62 }
 0x4aa   : > { %1273 = vrot.lane.b32.xlu1 %v1267_v52, %s2806_s22  ;;  %v1384_v52 = vadd.f32 %v1381_v47, %v1377_v44  ;;  %v1412_v60 = vadd.f32 %v1409_v56, %v1405_v54  ;;  %v1413_v19 = vadd.f32 %v1410_v6, %v1406_v61  ;;  %v1414_v24 = vadd.f32 %v1411_v7, %v1407_v3 }
 0x4ab   : > { %1275 = vrot.lane.b32.xlu0 %v1268_v53, %s2806_s22  ;;  %v1378_v53 = vmul.f32 %v1375_v35, %v3106_v12  ;;  %v1467_v35 = vmul.f32 %v1466_v29, %v3103_v63  ;;  %v1491_v44 = vstv %s2383_s5  ;;  %v1519_v56 = vstv %s2384_s11  ;;  %s3319_s5 = sld [smem:[#allocation6 + $0x1d]]  ;;  %s3329_s11 = sld [smem:[#allocation6 + $0x50]] }
 0x4ac   : > { %v1492_v54 = vmul.f32 %v1491_v44, %v3112_v14 }
 0x4ad   : > { %v1523_v61 = vstv %s2433_s29  ;;  %s3335_s29 = sld [smem:[#allocation6 + $0x51]] }
 0x4ae   : > { %1277 = vrot.lane.b32.xlu1 %v1269_v58, %s2806_s22  ;;  %s2811_s22 = smov 67  }
 0x4af   : > { %1302 = vrot.lane.b32.xlu0 %v1296_v59, %s2807_s10  ;;  %v1385_v59 = vadd.f32 %v1382_v55, %v1378_v53  ;;  %v1472_v53 = vadd.f32 %v1469_v46, %v1465_v43  ;;  %v1493_v55 = vmul.f32 %v1491_v44, %v3109_v13 }
 0x4b2   : > { %1304 = vrot.lane.b32.xlu1 %v1297_v15, %s2807_s10  ;;  %v1437_v15 = vstv %s2430_s12  ;;  %s3305_s12 = sld [smem:[#allocation6 + $0x4d]] }
 0x4b3   : > { %1306 = vrot.lane.b32.xlu0 %v1298_v16, %s2807_s10  ;;  %s2432_s10 = sld [smem:[#allocation6 + $0x49]]  ;;  %v1440_v9 = vmul.f32 %v1437_v15, %v3119_v2 }
 0x4b6   : > { %1331 = vrot.lane.b32.xlu1 %v1325_v28, %s2808_s9  ;;  %v1438_v28 = vmul.f32 %v1437_v15, %v3103_v63 }
 0x4b7   : > { %1333 = vrot.lane.b32.xlu0 %v1326_v11, %s2808_s9  ;;  %v1439_v11 = vmul.f32 %v1437_v15, %v3100_v62  ;;  %v1494_v15 = vmul.f32 %v1491_v44, %v3106_v12 }
 0x4b8   : > { %v1441_v32 = vadd.f32 %v1438_v28, %v1434_v5 }
 0x4b9   : > { %v1495_v47 = vstv %s2432_s10  ;;  %s3327_s10 = sld [smem:[#allocation6 + $0x1e]] }
 0x4ba   : > { %1335 = vrot.lane.b32.xlu1 %v1327_v8, %s2808_s9  ;;  %v1442_v8 = vadd.f32 %v1439_v11, %v1435_v27  ;;  %s2813_s9 = smov 65   ;;  %v1498_v5 = vmul.f32 %v1495_v47, %v3119_v2  ;;  %v1524_v27 = vmul.f32 %v1523_v61, %v3103_v63 }
 0x4bb   : > { %1360 = vrot.lane.b32.xlu0 %v1354_v33, %s2809_s25  ;;  %v1436_v33 = vmul.f32 %v1433_v4, %v3106_v12 }
 0x4bc   : > { %v3237_v39 = vpop.permute.xlu1 %809  ;;  %v1501_v11 = vadd.f32 %v1498_v5, %v1494_v15 }
 0x4bd   : > { %v3239_v40 = vpop.permute.xlu0 %811  ;;  %v1443_v38 = vadd.f32 %v1440_v9, %v1436_v33  ;;  %v1525_v9 = vmul.f32 %v1523_v61, %v3100_v62 }
 0x4be   : > { %1362 = vrot.lane.b32.xlu1 %v1355_v41, %s2809_s25  ;;  %v1470_v41 = vadd.f32 %v1467_v35, %v1463_v34  ;;  %v1548_v34 = vstv %s3291_s20  ;;  %v1526_v35 = vmul.f32 %v1523_v61, %v3119_v2  ;;  %s3345_s20 = sld [smem:[#allocation6 + $0x21]] }
 0x4bf   : > { %1364 = vrot.lane.b32.xlu0 %v1356_v42, %s2809_s25  ;;  %v1464_v42 = vmul.f32 %v1462_v0, %v3109_v13  ;;  %s3295_s25 = sld [smem:[#allocation6 + $0x4b]]  ;;  %v1549_v46 = vmul.f32 %v1548_v34, %v3112_v14 }
 0x4c0   : > { %v3245_v49 = vpop.permute.xlu1 %813 }
 0x4c1   : > { %v3247_v50 = vpop.permute.xlu0 %838 }
 0x4c2   : > { %1389 = vrot.lane.b32.xlu1 %v1383_v51, %s2810_s13 }
 0x4c3   : > { %1391 = vrot.lane.b32.xlu0 %v1384_v52, %s2810_s13  ;;  %v1471_v52 = vadd.f32 %v1468_v45, %v1464_v42 }
 0x4c4   : > { %v3253_v57 = vpop.permute.xlu1 %840 }
 0x4c5   : > { %v3255_v58 = vpop.permute.xlu0 %842 }
 0x4c6   : > { %1393 = vrot.lane.b32.xlu1 %v1385_v59, %s2810_s13  ;;  %v1496_v59 = vmul.f32 %v1495_v47, %v3103_v63  ;;  %s3309_s13 = sld [smem:[#allocation6 + $0x4e]] }
 0x4c7   : > { %1418 = vrot.lane.b32.xlu0 %v1412_v60, %s2811_s22  ;;  %v1497_v60 = vmul.f32 %v1495_v47, %v3100_v62  ;;  %v1550_v47 = vmul.f32 %v1548_v34, %v3109_v13 }
 0x4c8   : > { %v3261_v16 = vpop.permute.xlu1 %867  ;;  %v1499_v6 = vadd.f32 %v1496_v59, %v1492_v54  ;;  %v3360_v54 = vstv %s3305_s12  ;;  %s3386_s12 = sld [smem:[#allocation6 + $0x24]] }
 0x4c9   : > { %v3263_v18 = vpop.permute.xlu0 %869  ;;  %v1500_v7 = vadd.f32 %v1497_v60, %v1493_v55 }
 0x4ca   : > { %1420 = vrot.lane.b32.xlu1 %v1413_v19, %s2811_s22  ;;  %v1520_v19 = vmul.f32 %v1519_v56, %v3112_v14 }
 0x4cb   : > { %1422 = vrot.lane.b32.xlu0 %v1414_v24, %s2811_s22  ;;  %v4091_v24 = vlaneseq  ;;  %s3317_s22 = sld [smem:[#allocation6 + $0x4f]] }
 0x4cc   : > { %v3269_v30 = vpop.permute.xlu1 %871  ;;  %v1527_v29 = vadd.f32 %v1524_v27, %v1520_v19  ;;  %v3371_v60 = vstv %s3309_s13  ;;  %s2815_s13 = smov 62  }
 0x4cd   : > { %v3271_v31 = vpop.permute.xlu0 %896  ;;  %v334_v33 = vand.u32 127, %v4091_v24 }
 0x4ce   : > { %1447 = vrot.lane.b32.xlu1 %v1441_v32, %s2812_s26  ;;  %v1521_v32 = vmul.f32 %v1519_v56, %v3109_v13  ;;  %v3448_v25 = vstv %s3386_s12  ;;  %s3787_s12 = sld [smem:[#allocation6 + $0x28]] }
 0x4cf   : > { %1449 = vrot.lane.b32.xlu0 %v1442_v8, %s2812_s26  ;;  %v1522_v8 = vmul.f32 %v1519_v56, %v3106_v12  ;;  %v3366_v55 = vand.u32 15, %v334_v33  ;;  %4144 = vst [vmem:[#allocation26_spill] sm:$0xff] %v3448_v25 }
 0x4d0   : > { %v3277_v36 = vpop.permute.xlu1 %898  ;;  %v1528_v44 = vadd.f32 %v1525_v9, %v1521_v32  ;;  %v3401_v9 = vstv %s3329_s11  ;;  %s3733_s11 = sld [smem:[#allocation6 + $0x56]] }
 0x4d1   : > { %v3279_v37 = vpop.permute.xlu0 %900  ;;  %v1529_v45 = vadd.f32 %v1526_v35, %v1522_v8  ;;  %v3384_v15 = vstv %s3317_s22  ;;  %v3395_v8 = vstv %s3327_s10  ;;  %v3404_v35 = vstv %s3335_s29  ;;  %s2821_s22 = smov 47   ;;  %s2823_s10 = smov 45  }
 0x4d2   : > { %1451 = vrot.lane.b32.xlu1 %v1443_v38, %s2812_s26  ;;  %s3333_s26 = sld [smem:[#allocation6 + $0x1f]]  ;;  %v335_v38 = vadd.s32 128, %v334_v33  ;;  %v372_v26 = vadd.s32 4294967294, %v3366_v55  ;;  %s3750_s29 = sld [smem:[#allocation6 + $0x26]] }
 0x4d3   : > { %1476 = vrot.lane.b32.xlu0 %v1470_v41, %s2813_s9  ;;  %v1552_v41 = vstv %s3295_s25  ;;  %s3362_s25 = sld [smem:[#allocation6 + $0x22]] }
 0x4d4   : > { %v3285_v48 = vpop.permute.xlu1 %925  ;;  %v1553_v56 = vmul.f32 %v1552_v41, %v3103_v63  ;;  %v1554_v59 = vmul.f32 %v1552_v41, %v3100_v62  ;;  %v3375_v61 = vand.u32 15, %v335_v38  ;;  %v360_v38 = vadd.s32 4294967293, %v3366_v55 }
 0x4d5   : > { %v3287_v51 = vpop.permute.xlu0 %927  ;;  %vm374_vm8 = vcmp.ge.s32.totalorder %v372_v26, 0 }
 0x4d6   : > { %1478 = vrot.lane.b32.xlu1 %v1471_v52, %s2813_s9  ;;  %v1577_v52 = vstv %s3307_s8  ;;  %v1556_v27 = vadd.f32 %v1553_v56, %v1549_v46  ;;  %s3406_s8 = sld [smem:[#allocation6 + $0x25]]  ;;  %v361_v46 = vadd.s32 4294967293, %v3375_v61  ;;  %v3419_v56 = vstv %s3345_s20  ;;  %s3773_s20 = sld [smem:[#allocation6 + $0x27]] }
 0x4d7   : > { %1480 = vrot.lane.b32.xlu0 %v1472_v53, %s2813_s9  ;;  %s2814_s9 = smov 63   ;;  %v1581_v53 = vstv %s3303_s30  ;;  %s3373_s30 = sld [smem:[#allocation6 + $0x23]]  ;;  %v1578_v32 = vmul.f32 %v1577_v52, %v3112_v14  ;;  %v1579_v17 = vmul.f32 %v1577_v52, %v3109_v13  ;;  %v1580_v10 = vmul.f32 %v1577_v52, %v3106_v12 }
 0x4d8   : > { %v3297_v3 = vpop.permute.xlu1 %929  ;;  %v3398_v33 = vstv %s3333_s26  ;;  %vm362_vm6 = vcmp.ge.s32.totalorder %v360_v38, 0  ;;  %vm363_vm7 = vcmp.ge.s32.totalorder %v361_v46, 0  ;;  %v373_v52 = vadd.s32 4294967294, %v3375_v61  ;;  %s2824_s26 = smov 35  }
 0x4d9   : > { %v3299_v4 = vpop.permute.xlu0 %954  ;;  %v3432_v21 = vstv %s3362_s25  ;;  %s3779_s25 = sld [smem:[#allocation6 + $0x58]] }
 0x4da   : > { %1505 = vrot.lane.b32.xlu1 %v1499_v6, %s2789_s23  ;;  %v3378_v6 = vstv %s3315_s14  ;;  %4140 = vst [vmem:[#allocation22_spill] sm:$0xff] %v3432_v21  ;;  %vm375_vm9 = vcmp.ge.s32.totalorder %v373_v52, 0  ;;  %v419_v21 = vadd.s32 2, %v3375_v61  ;;  %s2820_s14 = smov 48  }
 0x4db   : > { %1507 = vrot.lane.b32.xlu0 %v1500_v7, %s2789_s23  ;;  %v3381_v7 = vstv %s3319_s5  ;;  %v1607_v1 = vmul.f32 %v3378_v6, %v3112_v14  ;;  %s2822_s5 = smov 46  }
 0x4dc   : > { %v3321_v0 = vpop.permute.xlu1 %956  ;;  %v3464_v25 = vstv %s3406_s8  ;;  %v1638_v52 = vmul.f32 %v3381_v7, %v3106_v12  ;;  %vm423_vm3 = vcmp.lt.s32.totalorder %v419_v21, 16  ;;  %v1698_v21 = vmul.f32 %v3401_v9, %v3103_v63  ;;  %s3793_s8 = sld [smem:[#allocation6 + $0x59]] }
 0x4dd   : > { %v3323_v28 = vpop.permute.xlu0 %958  ;;  %4148 = vst [vmem:[#allocation29_spill] sm:$0xff] %v3464_v25 }
 0x4de   : > { %1509 = vrot.lane.b32.xlu1 %v1501_v11, %s2789_s23  ;;  %s3355_s23 = sld [smem:[#allocation6 + $0x54]]  ;;  %v1557_v11 = vadd.f32 %v1554_v59, %v1550_v47  ;;  %v3416_v47 = vstv %s3340_s7  ;;  %v3422_v59 = vstv %s3347_s1  ;;  %s2817_s1 = smov 51  }
 0x4df   : > { %1533 = vrot.lane.b32.xlu0 %v1527_v29, %s2814_s9  ;;  %v1551_v29 = vmul.f32 %v1548_v34, %v3106_v12  ;;  %v1555_v34 = vmul.f32 %v1552_v41, %v3119_v2  ;;  %4138 = vst [vmem:[#allocation20_spill] sm:$0xff] %v3422_v59  ;;  %v385_v59 = vadd.s32 4294967295, %v3375_v61  ;;  %s2819_s7 = smov 49  }
 0x4e0   : > { %v3349_v42 = vpop.permute.xlu1 %983 }
 0x4e1   : > { %v3351_v43 = vpop.permute.xlu0 %985  ;;  %vm387_vm12 = vcmp.ge.s32.totalorder %v385_v59, 0  ;;  %v1665_v59 = vmul.f32 %v3395_v8, %v3112_v14 }
 0x4e2   : > { %1535 = vrot.lane.b32.xlu1 %v1528_v44, %s2814_s9  ;;  %v1582_v44 = vmul.f32 %v1581_v53, %v3103_v63 }
 0x4e3   : > { %1537 = vrot.lane.b32.xlu0 %v1529_v45, %s2814_s9  ;;  %v3412_v45 = vstv %s3342_s0  ;;  %s2816_s0 = smov 61   ;;  %s3759_s9 = sld [smem:[#allocation6 + $0x57]] }
 0x4e4   : > { %v3388_v19 = vpop.permute.xlu1 %987  ;;  %v1585_v41 = vadd.f32 %v1582_v44, %v1578_v32  ;;  %v3435_v23 = vstv %s3355_s23  ;;  %v1584_v32 = vmul.f32 %v1581_v53, %v3119_v2  ;;  %v384_v44 = vadd.s32 4294967295, %v3366_v55  ;;  %s2825_s23 = smov 34  }
 0x4e5   : > { %4137 = vst [vmem:[#allocation19_spill] sm:$0xff] %v3388_v19  ;;  %v3390_v5 = vpop.permute.xlu0 %1012  ;;  %4141 = vst [vmem:[#allocation23_spill] sm:$0xff] %v3435_v23  ;;  %v4147_v23 = vmov 0.0   ;;  %v1636_v19 = vmul.f32 %v3381_v7, %v3112_v14 }
 0x4e6   : > { %1562 = vrot.lane.b32.xlu1 %v1556_v27, %s2815_s13  ;;  %v3474_v38 = vsel %vm363_vm7, 1.0, %v4147_v23  ;;  %vm386_vm10 = vcmp.ge.s32.totalorder %v384_v44, 0  ;;  %v3487_v46 = vsel %vm374_vm8, 1.0, %v4147_v23  ;;  %v3496_v26 = vsel %vm375_vm9, 1.0, %v4147_v23 }
 0x4e7   : > { %1564 = vrot.lane.b32.xlu0 %v1557_v11, %s2815_s13  ;;  %v1558_v11 = vadd.f32 %v1555_v34, %v1551_v29  ;;  %v1583_v29 = vmul.f32 %v1581_v53, %v3100_v62  ;;  %v3443_v34 = vstv %s3373_s30  ;;  %v1608_v53 = vmul.f32 %v3378_v6, %v3109_v13  ;;  %s2826_s30 = smov 33  }
 0x4e8   : > { %v3424_v24 = vpop.permute.xlu1 %1014  ;;  %4143 = vst [vmem:[#allocation25_spill] sm:$0xff] %v3443_v34  ;;  %v3460_v34 = vsel %vm362_vm6, 1.0, %v4147_v23  ;;  %v3513_v44 = vsel %vm387_vm12, 1.0, %v4147_v23  ;;  %vm902_vm7 = vcmask 916480   ;;  %vm960_vm8 = vcmask 900096  }
 0x4e9   : > { %v3426_v27 = vpop.permute.xlu0 %1016  ;;  %vm1018_vm12 = vcmask 809984  }
 0x4ea   : > { %4139 = vst [vmem:[#allocation21_spill] sm:$0xff] %v3426_v27  ;;  %1566 = vrot.lane.b32.xlu1 %v1558_v11, %s2815_s13  ;;  %v1586_v11 = vadd.f32 %v1583_v29, %v1579_v17  ;;  %v406_v27 = vadd.s32 1, %v3366_v55  ;;  %v407_v17 = vadd.s32 1, %v3375_v61  ;;  %v1612_v29 = vmul.f32 %v3360_v54, %v3100_v62  ;;  %s3801_s13 = sld [smem:[#allocation6 + $0x29]] }
 0x4eb   : > { %1591 = vrot.lane.b32.xlu0 %v1585_v41, %s2816_s0  ;;  %v1587_v41 = vadd.f32 %v1584_v32, %v1580_v10  ;;  %v1611_v10 = vmul.f32 %v3360_v54, %v3103_v63  ;;  %v418_v32 = vadd.s32 2, %v3366_v55 }
 0x4ec   : > { %v3450_v20 = vpop.permute.xlu1 %1041  ;;  %vm410_vm13 = vcmp.lt.s32.totalorder %v406_v27, 16  ;;  %vm411_vm14 = vcmp.lt.s32.totalorder %v407_v17, 16  ;;  %v1667_v17 = vmul.f32 %v3395_v8, %v3106_v12 }
 0x4ed   : > { %4145 = vst [vmem:[#allocation27_spill] sm:$0xff] %v3450_v20  ;;  %v3452_v22 = vpop.permute.xlu0 %1043  ;;  %vm422_vm1 = vcmp.lt.s32.totalorder %v418_v32, 16  ;;  %v1694_v32 = vmul.f32 %v3398_v33, %v3112_v14 }
 0x4ee   : > { %4146 = vst [vmem:[#allocation28_spill] sm:$0xff] %v3452_v22  ;;  %1593 = vrot.lane.b32.xlu1 %v1586_v11, %s2816_s0  ;;  %v1614_v11 = vadd.f32 %v1611_v10, %v1607_v1  ;;  %v1609_v22 = vmul.f32 %v3378_v6, %v3106_v12  ;;  %v1613_v1 = vmul.f32 %v3360_v54, %v3119_v2  ;;  %v430_v10 = vadd.s32 3, %v3366_v55 }
 0x4ef   : > { %1595 = vrot.lane.b32.xlu0 %v1587_v41, %s2816_s0  ;;  %v1615_v41 = vadd.f32 %v1612_v29, %v1608_v53  ;;  %v1640_v6 = vmul.f32 %v3371_v60, %v3103_v63  ;;  %v3500_v53 = vsel %vm386_vm10, 1.0, %v4147_v23  ;;  %v3521_v55 = vsel %vm411_vm14, 1.0, %v4147_v23  ;;  %s2827_s0 = smov 32  }
 0x4f0   : > { %v3477_v25 = vpop.permute.xlu1 %1045  ;;  %v1616_v54 = vadd.f32 %v1613_v1, %v1609_v22  ;;  %v431_v22 = vadd.s32 3, %v3375_v61  ;;  %v3532_v27 = vsel %vm422_vm1, 1.0, %v4147_v23  ;;  %vm434_vm6 = vcmp.lt.s32.totalorder %v430_v10, 16 }
 0x4f1   : > { %4149 = vst [vmem:[#allocation30_spill] sm:$0xff] %v3477_v25  ;;  %v3479_v20 = vpop.permute.xlu0 %1070  ;;  %v1637_v25 = vmul.f32 %v3381_v7, %v3109_v13  ;;  %v1641_v7 = vmul.f32 %v3371_v60, %v3100_v62  ;;  %v1666_v61 = vmul.f32 %v3395_v8, %v3109_v13  ;;  %v3548_v10 = vsel %vm423_vm3, 1.0, %v4147_v23 }
 0x4f2   : > { %4150 = vst [vmem:[#allocation31_spill] sm:$0xff] %v3479_v20  ;;  %1620 = vrot.lane.b32.xlu1 %v1614_v11, %s2817_s1  ;;  %v3517_v20 = vsel %vm410_vm13, 1.0, %v4147_v23  ;;  %4155 = vst [vmem:[#allocation36_spill] sm:$0xff] %v3548_v10  ;;  %v1670_v8 = vmul.f32 %v3384_v15, %v3100_v62  ;;  %vm435_vm9 = vcmp.lt.s32.totalorder %v431_v22, 16  ;;  %vm989_vm10 = vcmask 891904  }
 0x4f3   : > { %1622 = vrot.lane.b32.xlu0 %v1615_v41, %s2817_s1  ;;  %v1643_v41 = vadd.f32 %v1640_v6, %v1636_v19  ;;  %v1642_v19 = vmul.f32 %v3371_v60, %v3119_v2  ;;  %v1644_v60 = vadd.f32 %v1641_v7, %v1637_v25  ;;  %v1695_v25 = vmul.f32 %v3398_v33, %v3109_v13 }
 0x4f4   : > { %v3503_v29 = vpop.permute.xlu1 %1072  ;;  %vm1076_vm13 = vcmask 793600   ;;  %vm1134_vm14 = vcmask 777216   ;;  %vm1192_vm1 = vcmask 760832   ;;  %vm1221_vm3 = vcmask 678912  }
 0x4f5   : > { %4151 = vst [vmem:[#allocation32_spill] sm:$0xff] %v3503_v29  ;;  %v3505_v11 = vpop.permute.xlu0 %1074  ;;  %v845_v29 = vsel %vm844_vm11, %v3247_v50, %v3253_v57  ;;  %v1727_v50 = vmul.f32 %v3404_v35, %v3103_v63 }
 0x4f6   : > { %4152 = vst [vmem:[#allocation33_spill] sm:$0xff] %v3505_v11  ;;  %1624 = vrot.lane.b32.xlu1 %v1616_v54, %s2817_s1  ;;  %v1645_v54 = vadd.f32 %v1642_v19, %v1638_v52  ;;  %v3557_v52 = vsel %vm434_vm6, 1.0, %v4147_v23  ;;  %v1673_v19 = vadd.f32 %v1670_v8, %v1666_v61  ;;  %v1699_v11 = vmul.f32 %v3401_v9, %v3100_v62  ;;  %s3808_s1 = sld [smem:[#allocation6 + $0x5a]] }
 0x4f7   : > { %1649 = vrot.lane.b32.xlu0 %v1643_v41, %s2818_s2  ;;  %v1669_v41 = vmul.f32 %v3384_v15, %v3103_v63  ;;  %v1723_v61 = vmul.f32 %v3416_v47, %v3112_v14  ;;  %vm1279_vm6 = vcmask 662528  }
 0x4f8   : > { %v3538_v1 = vpop.permute.xlu1 %1099 }
 0x4f9   : > { %4153 = vst [vmem:[#allocation34_spill] sm:$0xff] %v3538_v1  ;;  %v3540_v6 = vpop.permute.xlu0 %1101  ;;  %v1671_v1 = vmul.f32 %v3384_v15, %v3119_v2  ;;  %v1672_v7 = vadd.f32 %v1669_v41, %v1665_v59  ;;  %v1696_v15 = vmul.f32 %v3398_v33, %v3106_v12  ;;  %v1701_v59 = vadd.f32 %v1698_v21, %v1694_v32 }
 0x4fa   : > { %4154 = vst [vmem:[#allocation35_spill] sm:$0xff] %v3540_v6  ;;  %1651 = vrot.lane.b32.xlu1 %v1644_v60, %s2818_s2  ;;  %v1702_v33 = vadd.f32 %v1699_v11, %v1695_v25  ;;  %v816_v41 = vsel %vm815_vm15, %v3237_v39, %v3239_v40  ;;  %v3591_v32 = vsel %vm435_vm9, 1.0, %v4147_v23  ;;  %v849_v39 = vmul.f32 %v3487_v46, %v845_v29 }
 0x4fb   : > { %1653 = vrot.lane.b32.xlu0 %v1645_v54, %s2818_s2  ;;  %v1674_v6 = vadd.f32 %v1671_v1, %v1667_v17  ;;  %v1700_v54 = vmul.f32 %v3401_v9, %v3119_v2  ;;  %v846_v17 = vsel %vm844_vm11, %v3253_v57, %v3255_v58  ;;  %v1724_v1 = vmul.f32 %v3416_v47, %v3109_v13  ;;  %s2828_s2 = smov 31  }
 0x4fc   : > { %v3568_v10 = vpop.permute.xlu1 %1103  ;;  %v874_v9 = vsel %vm873_vm0, %v3261_v16, %v3263_v18  ;;  %v1728_v57 = vmul.f32 %v3404_v35, %v3100_v62  ;;  %v817_v58 = vsel %vm815_vm15, %v3239_v40, %v3245_v49  ;;  %v875_v16 = vsel %vm873_vm0, %v3263_v18, %v3269_v30 }
 0x4fd   : > { %v3570_v60 = vpop.permute.xlu0 %1128  ;;  %v1725_v23 = vmul.f32 %v3416_v47, %v3106_v12  ;;  %v850_v11 = vmul.f32 %v3496_v26, %v846_v17  ;;  %v1703_v25 = vadd.f32 %v1700_v54, %v1696_v15  ;;  %v1752_v40 = vmul.f32 %v3419_v56, %v3112_v14 }
 0x4fe   : > { %1678 = vrot.lane.b32.xlu1 %v1672_v7, %s2819_s7  ;;  %v1729_v7 = vmul.f32 %v3404_v35, %v3119_v2  ;;  %v820_v49 = vmul.f32 %v3460_v34, %v816_v41  ;;  %v878_v18 = vmul.f32 %v3500_v53, %v874_v9  ;;  %v1730_v30 = vadd.f32 %v1727_v50, %v1723_v61 }
 0x4ff   : > { %1680 = vrot.lane.b32.xlu0 %v1673_v19, %s2819_s7  ;;  %v1731_v29 = vadd.f32 %v1728_v57, %v1724_v1  ;;  %v821_v47 = vmul.f32 %v3474_v38, %v817_v58  ;;  %v879_v21 = vmul.f32 %v3513_v44, %v875_v16  ;;  %v932_v19 = vsel %vm931_vm4, %v3285_v48, %v3287_v51 }
 0x500   : > { %v3605_v22 = vpop.permute.xlu1 %1130  ;;  %vm1047_vm11 = vcmask 801792   ;;  %v851_v35 = vadd.f32 %v849_v39, %v820_v49  ;;  %v1732_v15 = vadd.f32 %v1729_v7, %v1725_v23  ;;  %v1756_v54 = vmul.f32 %v3412_v45, %v3103_v63 }
 0x501   : > { %v3607_v8 = vpop.permute.xlu0 %1132  ;;  %v1753_v61 = vmul.f32 %v3419_v56, %v3109_v13  ;;  %v852_v17 = vadd.f32 %v850_v11, %v821_v47  ;;  %v903_v50 = vsel %vm902_vm7, %v3271_v31, %v3277_v36  ;;  %v961_v48 = vsel %vm960_vm8, %v3299_v4, %v3321_v0 }
 0x502   : > { %1682 = vrot.lane.b32.xlu1 %v1674_v6, %s2819_s7  ;;  %v1757_v1 = vmul.f32 %v3412_v45, %v3100_v62  ;;  %v880_v41 = vadd.f32 %v878_v18, %v851_v35  ;;  %v936_v9 = vmul.f32 %v3517_v20, %v932_v19  ;;  %v933_v57 = vsel %vm931_vm4, %v3287_v51, %v3297_v3  ;;  %v4158_v18 = vld [vmem:[#allocation36_spill] sm:$0xff]  ;;  %v4160_v19 = vld [vmem:[#allocation27_spill] sm:$0xff]  ;;  %s3817_s7 = sld [smem:[#allocation6 + $0x2a]] }
 0x503   : > { %1707 = vrot.lane.b32.xlu0 %v1701_v59, %s2820_s14  ;;  %v1759_v58 = vadd.f32 %v1756_v54, %v1752_v40  ;;  %v881_v31 = vadd.f32 %v879_v21, %v852_v17  ;;  %v990_v4 = vsel %vm989_vm10, %v3349_v42, %v3351_v43  ;;  %v1754_v39 = vmul.f32 %v3419_v56, %v3106_v12  ;;  %v4159_v21 = vld [vmem:[#allocation28_spill] sm:$0xff]  ;;  %v4161_v17 = vld [vmem:[#allocation21_spill] sm:$0xff] }
 0x504   : > { %v3630_v6 = vpop.permute.xlu1 %1157  ;;  %v909_v16 = vadd.f32 %v903_v50, %v880_v41  ;;  %v904_v23 = vsel %vm902_vm7, %v3277_v36, %v3279_v37  ;;  %v965_v11 = vmul.f32 %v3532_v27, %v961_v48  ;;  %v962_v51 = vsel %vm960_vm8, %v3321_v0, %v3323_v28  ;;  %v4156_v37 = vld [vmem:[#allocation22_spill] sm:$0xff]  ;;  %v4157_v28 = vld [vmem:[#allocation19_spill] sm:$0xff]  ;;  %v4163_v41 = vld [vmem:[#allocation32_spill] sm:$0xff] }
 0x505   : > { %v3632_v59 = vpop.permute.xlu0 %1159  ;;  %v937_v3 = vmul.f32 %v3521_v55, %v933_v57  ;;  %v1019_v42 = vsel %vm1018_vm12, %v3390_v5, %v3424_v24  ;;  %v1758_v36 = vmul.f32 %v3412_v45, %v3119_v2  ;;  %v994_v0 = vmul.f32 %v3557_v52, %v990_v4 }
 0x506   : > { %1709 = vrot.lane.b32.xlu1 %v1702_v33, %s2820_s14  ;;  %v938_v7 = vadd.f32 %v936_v9, %v909_v16  ;;  %v991_v40 = vsel %vm989_vm10, %v3351_v43, %v4157_v28  ;;  %vm1105_vm15 = vcmask 785408   ;;  %v1760_v49 = vadd.f32 %v1757_v1, %v1753_v61  ;;  %v4162_v61 = vld [vmem:[#allocation20_spill] sm:$0xff]  ;;  %v4164_v9 = vld [vmem:[#allocation31_spill] sm:$0xff]  ;;  %v4166_v28 = vld [vmem:[#allocation33_spill] sm:$0xff] }
 0x507   : > { %1711 = vrot.lane.b32.xlu0 %v1703_v25, %s2820_s14  ;;  %v1781_v25 = vmul.f32 %v4156_v37, %v3112_v14  ;;  %v910_v5 = vadd.f32 %v904_v23, %v881_v31  ;;  %v966_v47 = vmul.f32 %v4158_v18, %v962_v51  ;;  %v1048_v35 = vsel %vm1047_vm11, %v4160_v19, %v4159_v21  ;;  %v4165_v23 = vld [vmem:[#allocation30_spill] sm:$0xff]  ;;  %s3823_s14 = sld [smem:[#allocation6 + $0x5b]] }
 0x508   : > { %v3656_v33 = vpop.permute.xlu1 %1161  ;;  %vm1163_vm0 = vcmask 769024   ;;  %v967_v45 = vadd.f32 %v965_v11, %v938_v7  ;;  %v1023_v54 = vmul.f32 %v3460_v34, %v1019_v42  ;;  %v1020_v43 = vsel %vm1018_vm12, %v3424_v24, %v4161_v17  ;;  %v4168_v17 = vld [vmem:[#allocation23_spill] sm:$0xff] }
 0x509   : > { %v3658_v56 = vpop.permute.xlu0 %1186  ;;  %v1785_v50 = vmul.f32 %v4162_v61, %v3103_v63  ;;  %v939_v48 = vadd.f32 %v937_v3, %v910_v5  ;;  %v995_v1 = vmul.f32 %v3591_v32, %v991_v40  ;;  %v1077_v57 = vsel %vm1076_vm13, %v4164_v9, %v4163_v41 }
 0x50a   : > { %1736 = vrot.lane.b32.xlu1 %v1730_v30, %s2821_s22  ;;  %v996_v4 = vadd.f32 %v994_v0, %v967_v45  ;;  %v1052_v16 = vmul.f32 %v3487_v46, %v1048_v35  ;;  %v1049_v24 = vsel %vm1047_vm11, %v4159_v21, %v4165_v23  ;;  %v1786_v11 = vmul.f32 %v4162_v61, %v3100_v62 }
 0x50b   : > { %1738 = vrot.lane.b32.xlu0 %v1731_v29, %s2821_s22  ;;  %v1782_v29 = vmul.f32 %v4156_v37, %v3109_v13  ;;  %v968_v51 = vadd.f32 %v966_v47, %v939_v48  ;;  %v1024_v3 = vmul.f32 %v3474_v38, %v1020_v43  ;;  %v1761_v42 = vadd.f32 %v1758_v36, %v1754_v39 }
 0x50c   : > { %v1189_v31 = vpop.permute.xlu1 %1188  ;;  %v1025_v7 = vadd.f32 %v1023_v54, %v996_v4  ;;  %v1081_v0 = vmul.f32 %v3500_v53, %v1077_v57  ;;  %v1078_v40 = vsel %vm1076_vm13, %v4163_v41, %v4166_v28  ;;  %v1783_v5 = vmul.f32 %v4156_v37, %v3106_v12  ;;  %v4169_v57 = vld [vmem:[#allocation35_spill] sm:$0xff] }
 0x50d   : > { %v1191_v30 = vpop.permute.xlu0 %1190  ;;  %v997_v21 = vadd.f32 %v995_v1, %v968_v51  ;;  %v1053_v47 = vmul.f32 %v3496_v26, %v1049_v24  ;;  %v1788_v45 = vadd.f32 %v1785_v50, %v1781_v25  ;;  %v1789_v54 = vadd.f32 %v1786_v11, %v1782_v29  ;;  %v4170_v29 = vld [vmem:[#allocation34_spill] sm:$0xff] }
 0x50e   : > { %1740 = vrot.lane.b32.xlu1 %v1732_v15, %s2821_s22  ;;  %v1787_v15 = vmul.f32 %v4162_v61, %v3119_v2  ;;  %v1054_v36 = vadd.f32 %v1052_v16, %v1025_v7  ;;  %v1814_v43 = vmul.f32 %v4168_v17, %v3103_v63  ;;  %v1082_v37 = vmul.f32 %v3513_v44, %v1078_v40  ;;  %s3831_s22 = sld [smem:[#allocation6 + $0x2b]] }
 0x50f   : > { %1765 = vrot.lane.b32.xlu0 %v1759_v58, %s2822_s5  ;;  %v4167_v58 = vld [vmem:[#allocation25_spill] sm:$0xff]  ;;  %v1026_v48 = vadd.f32 %v1024_v3, %v997_v21  ;;  %v1135_v1 = vsel %vm1134_vm14, %v3570_v60, %v3605_v22  ;;  %v1136_v41 = vsel %vm1134_vm14, %v3605_v22, %v3607_v8  ;;  %v1106_v4 = vsel %vm1105_vm15, %v4170_v29, %v4169_v57 }
 0x510   : > { %v1216_v19 = vpop.permute.xlu1 %1215  ;;  %v1810_v39 = vmul.f32 %v4167_v58, %v3112_v14  ;;  %v1083_v61 = vadd.f32 %v1081_v0, %v1054_v36  ;;  %v1790_v25 = vadd.f32 %v1787_v15, %v1783_v5  ;;  %v1811_v50 = vmul.f32 %v4167_v58, %v3109_v13  ;;  %v4171_v5 = vld [vmem:[#allocation26_spill] sm:$0xff] }
 0x511   : > { %v1218_v35 = vpop.permute.xlu0 %1217  ;;  %v1055_v9 = vadd.f32 %v1053_v47, %v1026_v48  ;;  %v1164_v60 = vsel %vm1163_vm0, %v3630_v6, %v3632_v59  ;;  %v1815_v23 = vmul.f32 %v4168_v17, %v3100_v62  ;;  %v1107_v22 = vsel %vm1105_vm15, %v4169_v57, %v3568_v10 }
 0x512   : > { %1767 = vrot.lane.b32.xlu1 %v1760_v49, %s2822_s5  ;;  %v1139_v8 = vmul.f32 %v3517_v20, %v1135_v1  ;;  %v1165_v24 = vsel %vm1163_vm0, %v3632_v59, %v3656_v33  ;;  %v1812_v11 = vmul.f32 %v4167_v58, %v3106_v12  ;;  %v1140_v6 = vmul.f32 %v3521_v55, %v1136_v41 }
 0x513   : > { %1769 = vrot.lane.b32.xlu0 %v1761_v42, %s2822_s5  ;;  %v1084_v51 = vadd.f32 %v1082_v37, %v1055_v9  ;;  %v1193_v3 = vsel %vm1192_vm1, %v3658_v56, %v1189_v31  ;;  %vm1250_vm4 = vcmask 670720   ;;  %v1112_v10 = vadd.f32 %v1106_v4, %v1083_v61  ;;  %s2829_s5 = smov 30  }
 0x514   : > { %v1220_v49 = vpop.permute.xlu1 %1219  ;;  %v1168_v42 = vmul.f32 %v3532_v27, %v1164_v60  ;;  %v1194_v59 = vsel %vm1192_vm1, %v1189_v31, %v1191_v30  ;;  %v1817_v33 = vadd.f32 %v1814_v43, %v1810_v39  ;;  %v1169_v0 = vmul.f32 %v4158_v18, %v1165_v24 }
 0x515   : > { %v1245_v16 = vpop.permute.xlu0 %1244  ;;  %v1113_v7 = vadd.f32 %v1107_v22, %v1084_v51  ;;  %v1816_v56 = vmul.f32 %v4168_v17, %v3119_v2  ;;  %v1839_v21 = vmul.f32 %v4171_v5, %v3112_v14  ;;  %v1141_v47 = vadd.f32 %v1139_v8, %v1112_v10 }
 0x516   : > { %1794 = vrot.lane.b32.xlu1 %v1788_v45, %s2823_s10  ;;  %v1197_v15 = vmul.f32 %v3557_v52, %v1193_v3  ;;  %v1222_v58 = vsel %vm1221_vm3, %v1216_v19, %v1218_v35  ;;  %v1223_v36 = vsel %vm1221_vm3, %v1218_v35, %v1220_v49  ;;  %v1198_v30 = vmul.f32 %v3591_v32, %v1194_v59  ;;  %v4173_v3 = vld [vmem:[#allocation29_spill] sm:$0xff] }
 0x517   : > { %1796 = vrot.lane.b32.xlu0 %v1789_v54, %s2823_s10  ;;  %v1142_v31 = vadd.f32 %v1140_v6, %v1113_v7  ;;  %v1818_v39 = vadd.f32 %v1815_v23, %v1811_v50  ;;  %v1170_v45 = vadd.f32 %v1168_v42, %v1141_v47  ;;  %v1840_v43 = vmul.f32 %v4171_v5, %v3109_v13  ;;  %v4172_v50 = vld [vmem:[#allocation24_spill] sm:$0xff] }
 0x518   : > { %v1247_v28 = vpop.permute.xlu1 %1246  ;;  %v1226_v35 = vmul.f32 %v3460_v34, %v1222_v58  ;;  %v1227_v48 = vmul.f32 %v3474_v38, %v1223_v36  ;;  %v1819_v61 = vadd.f32 %v1816_v56, %v1812_v11  ;;  %v1843_v9 = vmul.f32 %v4172_v50, %v3103_v63 }
 0x519   : > { %v1249_v40 = vpop.permute.xlu0 %1248  ;;  %v1251_v54 = vsel %vm1250_vm4, %v1245_v16, %v1247_v28  ;;  %v1171_v19 = vadd.f32 %v1169_v0, %v1142_v31  ;;  %v1199_v41 = vadd.f32 %v1197_v15, %v1170_v45  ;;  %v1844_v57 = vmul.f32 %v4172_v50, %v3100_v62 }
 0x51a   : > { %1798 = vrot.lane.b32.xlu1 %v1790_v25, %s2823_s10  ;;  %v1252_v17 = vsel %vm1250_vm4, %v1247_v28, %v1249_v40  ;;  %v1255_v4 = vmul.f32 %v3487_v46, %v1251_v54  ;;  %v1871_v49 = vstv %s3733_s11  ;;  %v1846_v16 = vadd.f32 %v1843_v9, %v1839_v21  ;;  %s3838_s10 = sld [smem:[#allocation6 + $0x5c]]  ;;  %s2830_s11 = smov 29  }
 0x51b   : > { %1823 = vrot.lane.b32.xlu0 %v1817_v33, %s2824_s26  ;;  %v1200_v29 = vadd.f32 %v1198_v30, %v1171_v19  ;;  %v1256_v60 = vmul.f32 %v3496_v26, %v1252_v17  ;;  %v1847_v23 = vadd.f32 %v1844_v57, %v1840_v43  ;;  %v1841_v22 = vmul.f32 %v4171_v5, %v3106_v12 }
 0x51c   : > { %v1274_v37 = vpop.permute.xlu1 %1273  ;;  %v1228_v8 = vadd.f32 %v1226_v35, %v1199_v41  ;;  %v1868_v10 = vmul.f32 %v4173_v3, %v3112_v14  ;;  %v1845_v59 = vmul.f32 %v4172_v50, %v3119_v2  ;;  %v1872_v33 = vmul.f32 %v1871_v49, %v3103_v63 }
 0x51d   : > { %v1276_v1 = vpop.permute.xlu0 %1275  ;;  %v1229_v24 = vadd.f32 %v1227_v48, %v1200_v29  ;;  %vm1308_vm7 = vcmask 654336   ;;  %v1869_v56 = vmul.f32 %v4173_v3, %v3109_v13  ;;  %v1896_v5 = vstv %s3750_s29  ;;  %s3856_s29 = sld [smem:[#allocation6 + $0x5d]] }
 0x51e   : > { %v1280_v25 = vsel %vm1279_vm6, %v1274_v37, %v1276_v1  ;;  %1825 = vrot.lane.b32.xlu1 %v1818_v39, %s2824_s26  ;;  %v1257_v7 = vadd.f32 %v1255_v4, %v1228_v8  ;;  %v1848_v40 = vadd.f32 %v1845_v59, %v1841_v22  ;;  %v1875_v36 = vadd.f32 %v1872_v33, %v1868_v10 }
 0x51f   : > { %1827 = vrot.lane.b32.xlu0 %v1819_v61, %s2824_s26  ;;  %v1284_v11 = vmul.f32 %v3500_v53, %v1280_v25  ;;  %v1258_v0 = vadd.f32 %v1256_v60, %v1229_v24  ;;  %v1870_v31 = vmul.f32 %v4173_v3, %v3106_v12  ;;  %v1873_v45 = vmul.f32 %v1871_v49, %v3100_v62  ;;  %s3847_s26 = sld [smem:[#allocation6 + $0x2c]] }
 0x520   : > { %v1278_v51 = vpop.permute.xlu1 %1277  ;;  %v1900_v54 = vstv %s3759_s9  ;;  %vm1337_vm8 = vcmask 646144   ;;  %v1874_v19 = vmul.f32 %v1871_v49, %v3119_v2  ;;  %v1897_v35 = vmul.f32 %v1896_v5, %v3112_v14  ;;  %s3861_s9 = sld [smem:[#allocation6 + $0x2d]] }
 0x521   : > { %v1303_v6 = vpop.permute.xlu0 %1302  ;;  %v1281_v42 = vsel %vm1279_vm6, %v1276_v1, %v1278_v51  ;;  %v1286_v47 = vadd.f32 %v1284_v11, %v1257_v7  ;;  %v1876_v1 = vadd.f32 %v1873_v45, %v1869_v56  ;;  %v1898_v41 = vmul.f32 %v1896_v5, %v3109_v13 }
 0x522   : > { %v1285_v28 = vmul.f32 %v3513_v44, %v1281_v42  ;;  %1852 = vrot.lane.b32.xlu1 %v1846_v16, %s2825_s23  ;;  %v1877_v61 = vadd.f32 %v1874_v19, %v1870_v31  ;;  %v1901_v50 = vmul.f32 %v1900_v54, %v3103_v63  ;;  %v1924_v9 = vstv %s3773_s20  ;;  %s2831_s20 = smov 19  }
 0x523   : > { %1854 = vrot.lane.b32.xlu0 %v1847_v23, %s2825_s23  ;;  %v1902_v29 = vmul.f32 %v1900_v54, %v3100_v62  ;;  %v1928_v60 = vstv %s3779_s25  ;;  %v1899_v8 = vmul.f32 %v1896_v5, %v3106_v12  ;;  %v1925_v24 = vmul.f32 %v1924_v9, %v3112_v14  ;;  %s2832_s25 = smov 18  }
 0x524   : > { %v1305_v21 = vpop.permute.xlu1 %1304  ;;  %v1287_v15 = vadd.f32 %v1285_v28, %v1258_v0  ;;  %v1904_v4 = vadd.f32 %v1901_v50, %v1897_v35  ;;  %vm1366_vm9 = vcmask 637952   ;;  %v1929_v3 = vmul.f32 %v1928_v60, %v3103_v63 }
 0x525   : > { %v1307_v58 = vpop.permute.xlu0 %1306  ;;  %v1309_v30 = vsel %vm1308_vm7, %v1303_v6, %v1305_v21  ;;  %v1905_v22 = vadd.f32 %v1902_v29, %v1898_v41  ;;  %v1903_v6 = vmul.f32 %v1900_v54, %v3119_v2  ;;  %v1926_v10 = vmul.f32 %v1924_v9, %v3109_v13 }
 0x526   : > { %v1310_v39 = vsel %vm1308_vm7, %v1305_v21, %v1307_v58  ;;  %v1315_v17 = vadd.f32 %v1309_v30, %v1286_v47  ;;  %1856 = vrot.lane.b32.xlu1 %v1848_v40, %s2825_s23  ;;  %v1953_v42 = vstv %s3787_s12  ;;  %v1932_v28 = vadd.f32 %v1929_v3, %v1925_v24  ;;  %s3868_s23 = sld [smem:[#allocation6 + $0x5e]]  ;;  %s3882_s12 = sld [smem:[#allocation6 + $0x5f]] }
 0x527   : > { %v1316_v43 = vadd.f32 %v1310_v39, %v1287_v15  ;;  %1881 = vrot.lane.b32.xlu0 %v1875_v36, %s2826_s30  ;;  %v1906_v0 = vadd.f32 %v1903_v6, %v1899_v8  ;;  %v1927_v40 = vmul.f32 %v1924_v9, %v3106_v12  ;;  %v1930_v21 = vmul.f32 %v1928_v60, %v3100_v62 }
 0x528   : > { %v1332_v48 = vpop.permute.xlu1 %1331  ;;  %v1957_v47 = vstv %s3793_s8  ;;  %vm1395_vm10 = vcmask 629760   ;;  %v1931_v36 = vmul.f32 %v1928_v60, %v3119_v2  ;;  %v1954_v30 = vmul.f32 %v1953_v42, %v3112_v14  ;;  %s3890_s8 = sld [smem:[#allocation6 + $0x2f]] }
 0x529   : > { %v1334_v37 = vpop.permute.xlu0 %1333  ;;  %v1933_v31 = vadd.f32 %v1930_v21, %v1926_v10  ;;  %v1955_v19 = vmul.f32 %v1953_v42, %v3109_v13  ;;  %vm1424_vm12 = vcmask 547840   ;;  %v2011_v24 = vstv %s3817_s7  ;;  %s3917_s7 = sld [smem:[#allocation6 + $0x61]] }
 0x52a   : > { %v1338_v25 = vsel %vm1337_vm8, %v1332_v48, %v1334_v37  ;;  %1883 = vrot.lane.b32.xlu1 %v1876_v1, %s2826_s30  ;;  %v1958_v48 = vmul.f32 %v1957_v47, %v3103_v63  ;;  %vm1453_vm11 = vcmask 539648   ;;  %v2012_v21 = vmul.f32 %v2011_v24, %v3112_v14 }
 0x52b   : > { %v1342_v57 = vmul.f32 %v3517_v20, %v1338_v25  ;;  %1885 = vrot.lane.b32.xlu0 %v1877_v61, %s2826_s30  ;;  %v1959_v61 = vmul.f32 %v1957_v47, %v3100_v62  ;;  %v1986_v25 = vstv %s3808_s1  ;;  %vm1482_vm13 = vcmask 531456   ;;  %s3877_s30 = sld [smem:[#allocation6 + $0x2e]]  ;;  %s2834_s1 = smov 16  }
 0x52c   : > { %v1336_v16 = vpop.permute.xlu1 %1335  ;;  %v1961_v41 = vadd.f32 %v1958_v48, %v1954_v30  ;;  %v2013_v30 = vmul.f32 %v2011_v24, %v3109_v13  ;;  %vm1539_vm14 = vcmask 515072   ;;  %vm1597_vm15 = vcmask 498688  }
 0x52d   : > { %v1344_v49 = vadd.f32 %v1342_v57, %v1315_v17  ;;  %v1361_v23 = vpop.permute.xlu0 %1360  ;;  %v1339_v11 = vsel %vm1337_vm8, %v1334_v37, %v1336_v16  ;;  %v1982_v37 = vstv %s3801_s13  ;;  %v1962_v29 = vadd.f32 %v1959_v61, %v1955_v19  ;;  %s2833_s13 = smov 17  }
 0x52e   : > { %v1343_v51 = vmul.f32 %v3521_v55, %v1339_v11  ;;  %1910 = vrot.lane.b32.xlu1 %v1904_v4, %s2827_s0  ;;  %v1956_v4 = vmul.f32 %v1953_v42, %v3106_v12  ;;  %v1983_v60 = vmul.f32 %v1982_v37, %v3112_v14  ;;  %v1984_v8 = vmul.f32 %v1982_v37, %v3109_v13 }
 0x52f   : > { %1912 = vrot.lane.b32.xlu0 %v1905_v22, %s2827_s0  ;;  %v1987_v22 = vmul.f32 %v1986_v25, %v3103_v63  ;;  %v1985_v42 = vmul.f32 %v1982_v37, %v3106_v12  ;;  %vm1626_vm0 = vcmask 416768   ;;  %vm1655_vm1 = vcmask 408576  }
 0x530   : > { %v1345_v59 = vadd.f32 %v1343_v51, %v1316_v43  ;;  %v1363_v33 = vpop.permute.xlu1 %1362  ;;  %v1934_v43 = vadd.f32 %v1931_v36, %v1927_v40  ;;  %vm1684_vm3 = vcmask 400384   ;;  %vm1713_vm4 = vcmask 392192  }
 0x531   : > { %v1365_v7 = vpop.permute.xlu0 %1364  ;;  %v1367_v56 = vsel %vm1366_vm9, %v1361_v23, %v1363_v33  ;;  %v1960_v23 = vmul.f32 %v1957_v47, %v3119_v2  ;;  %v1990_v10 = vadd.f32 %v1987_v22, %v1983_v60  ;;  %v2069_v60 = vstv %s3847_s26 }
 0x532   : > { %v1368_v5 = vsel %vm1366_vm9, %v1363_v33, %v1365_v7  ;;  %v1371_v15 = vmul.f32 %v3532_v27, %v1367_v56  ;;  %1914 = vrot.lane.b32.xlu1 %v1906_v0, %s2827_s0  ;;  %v1988_v7 = vmul.f32 %v1986_v25, %v3100_v62  ;;  %v2015_v0 = vstv %s3823_s14  ;;  %s3895_s0 = sld [smem:[#allocation6 + $0x60]]  ;;  %s2835_s14 = smov 15  }
 0x533   : > { %v1372_v58 = vmul.f32 %v4158_v18, %v1368_v5  ;;  %1938 = vrot.lane.b32.xlu0 %v1932_v28, %s2828_s2  ;;  %v1963_v3 = vadd.f32 %v1960_v23, %v1956_v4  ;;  %v1989_v56 = vmul.f32 %v1986_v25, %v3119_v2  ;;  %vm1742_vm6 = vcmask 384000  }
 0x534   : > { %v1373_v39 = vadd.f32 %v1371_v15, %v1344_v49  ;;  %v1390_v54 = vpop.permute.xlu1 %1389  ;;  %v1991_v5 = vadd.f32 %v1988_v7, %v1984_v8  ;;  %v2073_v7 = vstv %s3856_s29  ;;  %vm1771_vm7 = vcmask 375808  }
 0x535   : > { %v1374_v45 = vadd.f32 %v1372_v58, %v1345_v59  ;;  %v1392_v17 = vpop.permute.xlu0 %1391  ;;  %vm1800_vm8 = vcmask 367616   ;;  %vm1829_vm9 = vcmask 285696  }
 0x536   : > { %v1396_v35 = vsel %vm1395_vm10, %v1390_v54, %v1392_v17  ;;  %1940 = vrot.lane.b32.xlu1 %v1933_v31, %s2828_s2  ;;  %v1992_v31 = vadd.f32 %v1989_v56, %v1985_v42  ;;  %v2040_v54 = vstv %s3831_s22  ;;  %s2836_s22 = smov 14  }
 0x537   : > { %v1400_v1 = vmul.f32 %v3557_v52, %v1396_v35  ;;  %1942 = vrot.lane.b32.xlu0 %v1934_v43, %s2828_s2  ;;  %v2017_v43 = vmul.f32 %v2015_v0, %v3100_v62  ;;  %v2044_v35 = vstv %s3838_s10  ;;  %v2041_v25 = vmul.f32 %v2040_v54, %v3112_v14  ;;  %s3907_s2 = sld [smem:[#allocation6 + $0x30]]  ;;  %s2487_s10 = sshll.u32 %s2886_s19, 10 }
 0x538   : > { %v1394_v9 = vpop.permute.xlu1 %1393  ;;  %v2042_v4 = vmul.f32 %v2040_v54, %v3109_v13  ;;  %v2047_v42 = vmul.f32 %v2044_v35, %v3119_v2  ;;  %s2251_s19 = scalar_lea.sflag [#allocation4], %s2992_s6 }
 0x539   : > { %v1402_v50 = vadd.f32 %v1400_v1, %v1373_v39  ;;  %v1419_v57 = vpop.permute.xlu0 %1418  ;;  %v1397_v49 = vsel %vm1395_vm10, %v1392_v17, %v1394_v9  ;;  %v2020_v61 = vadd.f32 %v2017_v43, %v2013_v30  ;;  %v2102_v30 = vstv %s3868_s23  ;;  %s4031_s23 = scalar_lea.hbm %s4086_s4, %s2487_s10 }
 0x53a   : > { %v1401_v16 = vmul.f32 %v3591_v32, %v1397_v49  ;;  %1967 = vrot.lane.b32.xlu1 %v1961_v41, %s2829_s5  ;;  %v2014_v41 = vmul.f32 %v2011_v24, %v3106_v12  ;;  %v2043_v24 = vmul.f32 %v2040_v54, %v3106_v12  ;;  %v2072_v43 = vmul.f32 %v2069_v60, %v3106_v12 }
 0x53b   : > { %1969 = vrot.lane.b32.xlu0 %v1962_v29, %s2829_s5  ;;  %v2045_v29 = vmul.f32 %v2044_v35, %v3103_v63  ;;  %vm1858_vm10 = vcmask 277504  }
 0x53c   : > { %v1403_v11 = vadd.f32 %v1401_v16, %v1374_v45  ;;  %v1421_v51 = vpop.permute.xlu1 %1420  ;;  %v2016_v45 = vmul.f32 %v2015_v0, %v3103_v63  ;;  %v2050_v56 = vadd.f32 %v2047_v42, %v2043_v24 }
 0x53d   : > { %v1423_v6 = vpop.permute.xlu0 %1422  ;;  %v1425_v59 = vsel %vm1424_vm12, %v1419_v57, %v1421_v51  ;;  %v2018_v57 = vmul.f32 %v2015_v0, %v3119_v2  ;;  %v2048_v8 = vadd.f32 %v2045_v29, %v2041_v25 }
 0x53e   : > { %v1426_v33 = vsel %vm1424_vm12, %v1421_v51, %v1423_v6  ;;  %v1429_v28 = vmul.f32 %v3460_v34, %v1425_v59  ;;  %1971 = vrot.lane.b32.xlu1 %v1963_v3, %s2829_s5  ;;  %v2019_v19 = vadd.f32 %v2016_v45, %v2012_v21  ;;  %v2046_v6 = vmul.f32 %v2044_v35, %v3100_v62  ;;  %s2837_s5 = smov 13  }
 0x53f   : > { %v1430_v40 = vmul.f32 %v3474_v38, %v1426_v33  ;;  %1996 = vrot.lane.b32.xlu0 %v1990_v10, %s2830_s11  ;;  %v2021_v22 = vadd.f32 %v2018_v57, %v2014_v41  ;;  %v2070_v33 = vmul.f32 %v2069_v60, %v3112_v14  ;;  %v2071_v21 = vmul.f32 %v2069_v60, %v3109_v13 }
 0x540   : > { %v1431_v47 = vadd.f32 %v1429_v28, %v1402_v50  ;;  %v1448_v58 = vpop.permute.xlu1 %1447  ;;  %v2049_v59 = vadd.f32 %v2046_v6, %v2042_v4  ;;  %vm1887_vm12 = vcmask 269312  }
 0x541   : > { %v1432_v15 = vadd.f32 %v1430_v40, %v1403_v11  ;;  %v1450_v36 = vpop.permute.xlu0 %1449 }
 0x542   : > { %v1454_v39 = vsel %vm1453_vm11, %v1448_v58, %v1450_v36  ;;  %1998 = vrot.lane.b32.xlu1 %v1991_v5, %s2830_s11 }
 0x543   : > { %v1458_v17 = vmul.f32 %v3487_v46, %v1454_v39  ;;  %2000 = vrot.lane.b32.xlu0 %v1992_v31, %s2830_s11  ;;  %v2075_v31 = vmul.f32 %v2073_v7, %v3100_v62  ;;  %s4179_s11 = sshll.u32 %s2992_s6, 6 }
 0x544   : > { %v1452_v37 = vpop.permute.xlu1 %1451  ;;  %s229_s26 = scalar_lea.vmem [#allocation7], %s4179_s11 }
 0x545   : > { %v1460_v48 = vadd.f32 %v1458_v17, %v1431_v47  ;;  %v1477_v1 = vpop.permute.xlu0 %1476  ;;  %v1455_v50 = vsel %vm1453_vm11, %v1450_v36, %v1452_v37  ;;  %v2074_v36 = vmul.f32 %v2073_v7, %v3103_v63  ;;  %v2078_v17 = vadd.f32 %v2075_v31, %v2071_v21  ;;  %s2264_s29 = sshll.u32 %s229_s26, 4  ;;  %s4037_s29 = int_to_ptr.vmem [resolvable:$true] %s2264_s29 }
 0x546   : > { %v1459_v9 = vmul.f32 %v3496_v26, %v1455_v50  ;;  %2025 = vrot.lane.b32.xlu1 %v2019_v19, %s2831_s20  ;;  %v2076_v37 = vmul.f32 %v2073_v7, %v3119_v2  ;;  %vm1944_vm11 = vcmask 252928  }
 0x547   : > { %2027 = vrot.lane.b32.xlu0 %v2020_v61, %s2831_s20  ;;  %v2077_v54 = vadd.f32 %v2074_v36, %v2070_v33  ;;  %v2127_v61 = vstv %s3877_s30  ;;  %s2838_s30 = smov [#allocation7]  }
 0x548   : > { %v1461_v49 = vadd.f32 %v1459_v9, %v1432_v15  ;;  %v1479_v16 = vpop.permute.xlu1 %1478  ;;  %v2098_v15 = vstv %s3861_s9  ;;  %v2079_v50 = vadd.f32 %v2076_v37, %v2072_v43  ;;  %v2128_v24 = vmul.f32 %v2127_v61, %v3112_v14 }
 0x549   : > { %v1481_v23 = vpop.permute.xlu0 %1480  ;;  %v1483_v11 = vsel %vm1482_vm13, %v1477_v1, %v1479_v16  ;;  %v2099_v19 = vmul.f32 %v2098_v15, %v3112_v14  ;;  %v2103_v1 = vmul.f32 %v2102_v30, %v3103_v63  ;;  %v2100_v57 = vmul.f32 %v2098_v15, %v3109_v13 }
 0x54a   : > { %v1484_v51 = vsel %vm1482_vm13, %v1479_v16, %v1481_v23  ;;  %v1487_v3 = vmul.f32 %v3500_v53, %v1483_v11  ;;  %2029 = vrot.lane.b32.xlu1 %v2021_v22, %s2831_s20  ;;  %v2101_v29 = vmul.f32 %v2098_v15, %v3106_v12  ;;  %v2131_v16 = vstv %s3882_s12  ;;  %s2712_s12 = sshll.u32 %s2838_s30, 4  ;;  %s2713_s12 = int_to_ptr.vmem [resolvable:$false] %s2712_s12 }
 0x54b   : > { %v1488_v10 = vmul.f32 %v3513_v44, %v1484_v51  ;;  %2054 = vrot.lane.b32.xlu0 %v2048_v8, %s2832_s25  ;;  %v2106_v9 = vadd.f32 %v2103_v1, %v2099_v19  ;;  %v2105_v8 = vmul.f32 %v2102_v30, %v3119_v2  ;;  %v2129_v11 = vmul.f32 %v2127_v61, %v3109_v13  ;;  %p2715_p10 = scmp.lt.s32.totalorder %s4037_s29, %s2713_s12 }
 0x54c   : > { %v1506_v0 = vpop.permute.xlu1 %1505  ;;  %v1489_v28 = vadd.f32 %v1487_v3, %v1460_v48  ;;  %v2132_v7 = vmul.f32 %v2131_v16, %v3103_v63  ;;  %v2130_v36 = vmul.f32 %v2127_v61, %v3106_v12  ;;  %v2185_v43 = vstv %s3907_s2 }
 0x54d   : > { %v1508_v40 = vpop.permute.xlu0 %1507  ;;  %v1490_v5 = vadd.f32 %v1488_v10, %v1461_v49  ;;  %v2104_v49 = vmul.f32 %v2102_v30, %v3100_v62  ;;  %vm1973_vm13 = vcmask 244736  }
 0x54e   : > { %v1511_v47 = vsel %vm776_vm5, %v1506_v0, %v1508_v40  ;;  %2056 = vrot.lane.b32.xlu1 %v2049_v59, %s2832_s25  ;;  %v2108_v59 = vadd.f32 %v2105_v8, %v2101_v29  ;;  %v2156_v0 = vstv %s3890_s8  ;;  %s2714_s8 = scalar_lea.vmem %s2713_s12, 2048 }
 0x54f   : > { %v1517_v58 = vadd.f32 %v1511_v47, %v1489_v28  ;;  %2058 = vrot.lane.b32.xlu0 %v2050_v56, %s2832_s25  ;;  %v2107_v42 = vadd.f32 %v2104_v49, %v2100_v57  ;;  %v2135_v56 = vadd.f32 %v2132_v7, %v2128_v24  ;;  %v2157_v31 = vmul.f32 %v2156_v0, %v3112_v14  ;;  %s2708_s25 = scalar_lea.vmem %s4037_s29, 1024 }
 0x550   : > { %v1510_v39 = vpop.permute.xlu1 %1509  ;;  %v2159_v61 = vmul.f32 %v2156_v0, %v3106_v12  ;;  %v2189_v49 = vstv %s3917_s7  ;;  %p2709_p5 = scmp.ne.s32.totalorder %s4037_s29, %s2708_s25  ;;  %p2716_p1 = scmp.lt.s32.totalorder %s2714_s8, %s2708_s25 }
 0x551   : > { %v1534_v45 = vpop.permute.xlu0 %1533  ;;  %v1512_v35 = vsel %vm776_vm5, %v1508_v40, %v1510_v39  ;;  %vm1568_vm5 = vcmask 506880   ;;  %v2133_v40 = vmul.f32 %v2131_v16, %v3100_v62 }
 0x552   : > { %v1518_v48 = vadd.f32 %v1512_v35, %v1490_v5  ;;  %2083 = vrot.lane.b32.xlu1 %v2077_v54, %s2833_s13  ;;  %v2160_v5 = vstv %s3895_s0  ;;  %p2710_p8 = pnand %p2709_p5, %p4184_p12  ;;  %p2717_p4 = por %p2716_p1, %p2715_p10 }
 0x553   : > { %2085 = vrot.lane.b32.xlu0 %v2078_v17, %s2833_s13  ;;  %v2161_v54 = vmul.f32 %v2160_v5, %v3103_v63  ;;  %v2158_v17 = vmul.f32 %v2156_v0, %v3109_v13  ;;  %v2163_v29 = vmul.f32 %v2160_v5, %v3119_v2  ;;  %v2188_v0 = vmul.f32 %v2185_v43, %v3106_v12 }
 0x554   : > { %v1536_v41 = vpop.permute.xlu1 %1535  ;;  %p2711_p9 = pneg %p2710_p8 }
 0x555   : > { %v1538_v25 = vpop.permute.xlu0 %1537  ;;  %v1540_v4 = vsel %vm1539_vm14, %v1534_v45, %v1536_v41  ;;  %v2134_v45 = vmul.f32 %v2131_v16, %v3119_v2  ;;  %v2164_v1 = vadd.f32 %v2161_v54, %v2157_v31  ;;  %v2166_v24 = vadd.f32 %v2163_v29, %v2159_v61 }
 0x556   : > { %v1541_v60 = vsel %vm1539_vm14, %v1536_v41, %v1538_v25  ;;  %v1544_v23 = vmul.f32 %v3517_v20, %v1540_v4  ;;  %2087 = vrot.lane.b32.xlu1 %v2079_v50, %s2833_s13  ;;  %v2162_v50 = vmul.f32 %v2160_v5, %v3100_v62  ;;  %vm2002_vm14 = vcmask 236544   ;;  %p2718_p11 = pnand %p2717_p4, %p2711_p9 }
 0x557   : > { %v1545_v22 = vmul.f32 %v3521_v55, %v1541_v60  ;;  %2112 = vrot.lane.b32.xlu0 %v2106_v9, %s2834_s1  ;;  %v2137_v37 = vadd.f32 %v2134_v45, %v2130_v36  ;;  %v2186_v60 = vmul.f32 %v2185_v43, %v3112_v14 }
 0x558   : > { %v1546_v51 = vadd.f32 %v1544_v23, %v1517_v58  ;;  %v1563_v3 = vpop.permute.xlu1 %1562  ;;  %v2136_v58 = vadd.f32 %v2133_v40, %v2129_v11  ;;  %v2165_v4 = vadd.f32 %v2162_v50, %v2158_v17  ;;  %v2187_v11 = vmul.f32 %v2185_v43, %v3109_v13 }
 0x559   : > { %v1547_v6 = vadd.f32 %v1545_v22, %v1518_v48  ;;  %v1565_v10 = vpop.permute.xlu0 %1564  ;;  %v2192_v40 = vmul.f32 %v2189_v49, %v3119_v2 }
 0x55a   : > { %v1569_v33 = vsel %vm1568_vm5, %v1563_v3, %v1565_v10  ;;  %2114 = vrot.lane.b32.xlu1 %v2107_v42, %s2834_s1  ;;  %v2190_v3 = vmul.f32 %v2189_v49, %v3103_v63 }
 0x55b   : > { %v1573_v28 = vmul.f32 %v3532_v27, %v1569_v33  ;;  %2116 = vrot.lane.b32.xlu0 %v2108_v59, %s2834_s1  ;;  %v2195_v5 = vadd.f32 %v2192_v40, %v2188_v0 }
 0x55c   : > { %v1567_v47 = vpop.permute.xlu1 %1566  ;;  %v2193_v33 = vadd.f32 %v2190_v3, %v2186_v60 }
 0x55d   : > { %v1575_v21 = vadd.f32 %v1573_v28, %v1546_v51  ;;  %v1592_v15 = vpop.permute.xlu0 %1591  ;;  %v1570_v30 = vsel %vm1568_vm5, %v1565_v10, %v1567_v47  ;;  %v2191_v10 = vmul.f32 %v2189_v49, %v3100_v62  ;;  %vm2031_vm5 = vcmask 154624  }
 0x55e   : > { %v1574_v39 = vmul.f32 %v4158_v18, %v1570_v30  ;;  %2141 = vrot.lane.b32.xlu1 %v2135_v56, %s2835_s14 }
 0x55f   : > { %2143 = vrot.lane.b32.xlu0 %v2136_v58, %s2835_s14  ;;  %v2194_v7 = vadd.f32 %v2191_v10, %v2187_v11 }
 0x560   : > { %v1576_v19 = vadd.f32 %v1574_v39, %v1547_v6  ;;  %v1594_v35 = vpop.permute.xlu1 %1593 }
 0x561   : > { %v1596_v48 = vpop.permute.xlu0 %1595  ;;  %v1598_v41 = vsel %vm1597_vm15, %v1592_v15, %v1594_v35 }
 0x562   : > { %v1599_v25 = vsel %vm1597_vm15, %v1594_v35, %v1596_v48  ;;  %v1602_v9 = vmul.f32 %v3557_v52, %v1598_v41  ;;  %2145 = vrot.lane.b32.xlu1 %v2137_v37, %s2835_s14  ;;  %vm2060_vm15 = vcmask 146432  }
 0x563   : > { %v1603_v57 = vmul.f32 %v3591_v32, %v1599_v25  ;;  %2170 = vrot.lane.b32.xlu0 %v2164_v1, %s2836_s22 }
 0x564   : > { %v1604_v16 = vadd.f32 %v1602_v9, %v1575_v21  ;;  %v1621_v22 = vpop.permute.xlu1 %1620 }
 0x565   : > { %v1605_v23 = vadd.f32 %v1603_v57, %v1576_v19  ;;  %v1623_v8 = vpop.permute.xlu0 %1622 }
 0x566   : > { %v1627_v51 = vsel %vm1626_vm0, %v1621_v22, %v1623_v8  ;;  %2172 = vrot.lane.b32.xlu1 %v2165_v4, %s2836_s22 }
 0x567   : > { %v1631_v6 = vmul.f32 %v3460_v34, %v1627_v51  ;;  %2174 = vrot.lane.b32.xlu0 %v2166_v24, %s2836_s22 }
 0x568   : > { %v1625_v14 = vpop.permute.xlu1 %1624 }
 0x569   : > { %v1633_v42 = vadd.f32 %v1631_v6, %v1604_v16  ;;  %v1650_v59 = vpop.permute.xlu0 %1649  ;;  %v1628_v28 = vsel %vm1626_vm0, %v1623_v8, %v1625_v14  ;;  %vm2147_vm0 = vcmask 121856  }
 0x56a   : > { %v1632_v13 = vmul.f32 %v3474_v38, %v1628_v28  ;;  %2199 = vrot.lane.b32.xlu1 %v2193_v33, %s2837_s5 }
 0x56b   : > { %2201 = vrot.lane.b32.xlu0 %v2194_v7, %s2837_s5 }
 0x56c   : > { %v1634_v63 = vadd.f32 %v1632_v13, %v1605_v23  ;;  %v1652_v56 = vpop.permute.xlu1 %1651 }
 0x56d   : > { %v1654_v62 = vpop.permute.xlu0 %1653  ;;  %v1656_v21 = vsel %vm1655_vm1, %v1650_v59, %v1652_v56 }
 0x56e   : > { %v1657_v47 = vsel %vm1655_vm1, %v1652_v56, %v1654_v62  ;;  %v1660_v15 = vmul.f32 %v3487_v46, %v1656_v21  ;;  %2203 = vrot.lane.b32.xlu1 %v2195_v5, %s2837_s5  ;;  %vm2118_vm1 = vcmask 130048  }
 0x56f   : > { %v1661_v12 = vmul.f32 %v3496_v26, %v1657_v47 }
 0x570   : > { %v1662_v58 = vadd.f32 %v1660_v15, %v1633_v42  ;;  %v1679_v31 = vpop.permute.xlu1 %1678 }
 0x571   : > { %v1663_v36 = vadd.f32 %v1661_v12, %v1634_v63  ;;  %v1681_v30 = vpop.permute.xlu0 %1680 }
 0x572   : > { %v1685_v39 = vsel %vm1684_vm3, %v1679_v31, %v1681_v30 }
 0x573   : > { %v1689_v45 = vmul.f32 %v3500_v53, %v1685_v39 }
 0x574   : > { %v1683_v2 = vpop.permute.xlu1 %1682 }
 0x575   : > { %v1708_v54 = vpop.permute.xlu0 %1707  ;;  %v1691_v17 = vadd.f32 %v1689_v45, %v1662_v58  ;;  %v1686_v43 = vsel %vm1684_vm3, %v1681_v30, %v1683_v2  ;;  %vm2176_vm3 = vcmask 113664  }
 0x576   : > { %v1690_v19 = vmul.f32 %v3513_v44, %v1686_v43 }
 0x578   : > { %v1710_v35 = vpop.permute.xlu1 %1709  ;;  %v1692_v48 = vadd.f32 %v1690_v19, %v1663_v36 }
 0x579   : > { %v1712_v37 = vpop.permute.xlu0 %1711  ;;  %v1714_v1 = vsel %vm1713_vm4, %v1708_v54, %v1710_v35 }
 0x57a   : > { %v1715_v61 = vsel %vm1713_vm4, %v1710_v35, %v1712_v37  ;;  %v1720_v41 = vadd.f32 %v1714_v1, %v1691_v17  ;;  %vm2205_vm4 = vcmask 105472  }
 0x57b   : > { %v1721_v25 = vadd.f32 %v1715_v61, %v1692_v48 }
 0x57c   : > { %v1737_v50 = vpop.permute.xlu1 %1736 }
 0x57d   : > { %v1739_v9 = vpop.permute.xlu0 %1738 }
 0x57e   : > { %v1743_v57 = vsel %vm1742_vm6, %v1737_v50, %v1739_v9 }
 0x57f   : > { %v1747_v29 = vmul.f32 %v3517_v20, %v1743_v57 }
 0x580   : > { %v1741_v60 = vpop.permute.xlu1 %1740 }
 0x581   : > { %v1749_v4 = vadd.f32 %v1747_v29, %v1720_v41  ;;  %v1766_v49 = vpop.permute.xlu0 %1765  ;;  %v1744_v16 = vsel %vm1742_vm6, %v1739_v9, %v1741_v60 }
 0x582   : > { %v1748_v23 = vmul.f32 %v3521_v55, %v1744_v16 }
 0x584   : > { %v1750_v22 = vadd.f32 %v1748_v23, %v1721_v25  ;;  %v1768_v8 = vpop.permute.xlu1 %1767 }
 0x585   : > { %v1770_v24 = vpop.permute.xlu0 %1769  ;;  %v1772_v39 = vsel %vm1771_vm7, %v1766_v49, %v1768_v8 }
 0x586   : > { %v1776_v2 = vmul.f32 %v3532_v27, %v1772_v39  ;;  %v1773_v43 = vsel %vm1771_vm7, %v1768_v8, %v1770_v24 }
 0x587   : > { %v1777_v61 = vmul.f32 %v4158_v18, %v1773_v43 }
 0x588   : > { %v1795_v11 = vpop.permute.xlu1 %1794  ;;  %v1778_v1 = vadd.f32 %v1776_v2, %v1749_v4 }
 0x589   : > { %v1797_v51 = vpop.permute.xlu0 %1796  ;;  %v1779_v23 = vadd.f32 %v1777_v61, %v1750_v22 }
 0x58a   : > { %v1801_v45 = vsel %vm1800_vm8, %v1795_v11, %v1797_v51 }
 0x58b   : > { %v1805_v35 = vmul.f32 %v3557_v52, %v1801_v45 }
 0x58c   : > { %v1799_v6 = vpop.permute.xlu1 %1798 }
 0x58d   : > { %v1824_v3 = vpop.permute.xlu0 %1823  ;;  %v1802_v48 = vsel %vm1800_vm8, %v1797_v51, %v1799_v6  ;;  %v1807_v29 = vadd.f32 %v1805_v35, %v1778_v1 }
 0x58e   : > { %v1806_v60 = vmul.f32 %v3591_v32, %v1802_v48 }
 0x590   : > { %v1826_v10 = vpop.permute.xlu1 %1825 }
 0x591   : > { %v1828_v42 = vpop.permute.xlu0 %1827  ;;  %v1830_v19 = vsel %vm1829_vm9, %v1824_v3, %v1826_v10  ;;  %v1808_v3 = vadd.f32 %v1806_v60, %v1779_v23 }
 0x592   : > { %v1834_v41 = vmul.f32 %v3460_v34, %v1830_v19  ;;  %v1831_v9 = vsel %vm1829_vm9, %v1826_v10, %v1828_v42 }
 0x593   : > { %v1835_v8 = vmul.f32 %v3474_v38, %v1831_v9 }
 0x594   : > { %v1853_v14 = vpop.permute.xlu1 %1852  ;;  %v1836_v4 = vadd.f32 %v1834_v41, %v1807_v29 }
 0x595   : > { %v1855_v59 = vpop.permute.xlu0 %1854 }
 0x596   : > { %v1859_v37 = vsel %vm1858_vm10, %v1853_v14, %v1855_v59 }
 0x597   : > { %v1863_v49 = vmul.f32 %v3487_v46, %v1859_v37 }
 0x598   : > { %v1857_v33 = vpop.permute.xlu1 %1856 }
 0x599   : > { %v1882_v7 = vpop.permute.xlu0 %1881  ;;  %v1860_v16 = vsel %vm1858_vm10, %v1855_v59, %v1857_v33  ;;  %v1865_v10 = vadd.f32 %v1863_v49, %v1836_v4 }
 0x59a   : > { %v1864_v42 = vmul.f32 %v3496_v26, %v1860_v16 }
 0x59c   : > { %v1884_v0 = vpop.permute.xlu1 %1883 }
 0x59d   : > { %v1886_v28 = vpop.permute.xlu0 %1885  ;;  %v1888_v57 = vsel %vm1887_vm12, %v1882_v7, %v1884_v0  ;;  %v1837_v7 = vadd.f32 %v1835_v8, %v1808_v3 }
 0x59e   : > { %v1892_v24 = vmul.f32 %v3500_v53, %v1888_v57  ;;  %v1889_v6 = vsel %vm1887_vm12, %v1884_v0, %v1886_v28 }
 0x59f   : > { %v1893_v59 = vmul.f32 %v3513_v44, %v1889_v6  ;;  %v1866_v28 = vadd.f32 %v1864_v42, %v1837_v7 }
 0x5a0   : > { %v1911_v13 = vpop.permute.xlu1 %1910  ;;  %v1894_v22 = vadd.f32 %v1892_v24, %v1865_v10 }
 0x5a1   : > { %v3949_v40 = vpop.permute.xlu0 %1912  ;;  %v1895_v37 = vadd.f32 %v1893_v59, %v1866_v28 }
 0x5a2   : > { %v1916_v45 = vsel %vm483_vm2, %v1911_v13, %v3949_v40 }
 0x5a3   : > { %v1922_v48 = vadd.f32 %v1916_v45, %v1894_v22 }
 0x5a4   : > { %v3951_v63 = vpop.permute.xlu1 %1914 }
 0x5a5   : > { %v1939_v56 = vpop.permute.xlu0 %1938 }
 0x5a8   : > { %v1941_v62 = vpop.permute.xlu1 %1940 }
 0x5a9   : > { %v1943_v5 = vpop.permute.xlu0 %1942  ;;  %v1945_v14 = vsel %vm1944_vm11, %v1939_v56, %v1941_v62  ;;  %v1917_v56 = vsel %vm483_vm2, %v3949_v40, %v3951_v63  ;;  %vm2089_vm2 = vcmask 138240  }
 0x5aa   : > { %v1946_v2 = vsel %vm1944_vm11, %v1941_v62, %v1943_v5  ;;  %v1949_v43 = vmul.f32 %v3517_v20, %v1945_v14  ;;  %v1923_v63 = vadd.f32 %v1917_v56, %v1895_v37 }
 0x5ab   : > { %v1950_v13 = vmul.f32 %v3521_v55, %v1946_v2 }
 0x5ac   : > { %v1968_v21 = vpop.permute.xlu1 %1967 }
 0x5ad   : > { %v1970_v47 = vpop.permute.xlu0 %1969  ;;  %v1952_v9 = vadd.f32 %v1950_v13, %v1923_v63 }
 0x5ae   : > { %v1974_v0 = vsel %vm1973_vm13, %v1968_v21, %v1970_v47 }
 0x5af   : > { %v1978_v62 = vmul.f32 %v3532_v27, %v1974_v0 }
 0x5b0   : > { %v1972_v15 = vpop.permute.xlu1 %1971 }
 0x5b1   : > { %v1997_v12 = vpop.permute.xlu0 %1996  ;;  %v1975_v19 = vsel %vm1973_vm13, %v1970_v47, %v1972_v15  ;;  %v1951_v47 = vadd.f32 %v1949_v43, %v1922_v48 }
 0x5b2   : > { %v1979_v15 = vmul.f32 %v4158_v18, %v1975_v19 }
 0x5b3   : > { %v1980_v57 = vadd.f32 %v1978_v62, %v1951_v47 }
 0x5b4   : > { %v3953_v58 = vpop.permute.xlu1 %1998  ;;  %v1981_v16 = vadd.f32 %v1979_v15, %v1952_v9  ;;  %v4175_v9 = vld [vmem:[#allocation13_spill] sm:$0xff] }
 0x5b5   : > { %v3955_v36 = vpop.permute.xlu0 %2000  ;;  %v2003_v35 = vsel %vm2002_vm14, %v1997_v12, %v3953_v58 }
 0x5b6   : > { %v2004_v1 = vsel %vm2002_vm14, %v3953_v58, %v3955_v36  ;;  %v2007_v12 = vmul.f32 %v3557_v52, %v2003_v35 }
 0x5b7   : > { %v2008_v58 = vmul.f32 %v3591_v32, %v2004_v1 }
 0x5b8   : > { %v3957_v31 = vpop.permute.xlu1 %2025  ;;  %v2009_v23 = vadd.f32 %v2007_v12, %v1980_v57 }
 0x5b9   : > { %v3959_v30 = vpop.permute.xlu0 %2027 }
 0x5ba   : > { %v2032_v40 = vsel %vm2031_vm5, %v3957_v31, %v3959_v30 }
 0x5bb   : > { %v2036_v36 = vmul.f32 %v3460_v34, %v2032_v40 }
 0x5bc   : > { %v2030_v54 = vpop.permute.xlu1 %2029 }
 0x5bd   : > { %v2055_v17 = vpop.permute.xlu0 %2054  ;;  %v2033_v61 = vsel %vm2031_vm5, %v3959_v30, %v2030_v54  ;;  %v2038_v8 = vadd.f32 %v2036_v36, %v2009_v23  ;;  %v4177_v36 = vld [vmem:[#allocation15_spill] sm:$0xff]  ;;  %v4180_v23 = vld [vmem:[#allocation14_spill] sm:$0xff] }
 0x5be   : > { %v2037_v4 = vmul.f32 %v3474_v38, %v2033_v61 }
 0x5c0   : > { %v2057_v25 = vpop.permute.xlu1 %2056 }
 0x5c1   : > { %v2059_v50 = vpop.permute.xlu0 %2058  ;;  %v2061_v41 = vsel %vm2060_vm15, %v2055_v17, %v2057_v25  ;;  %v2010_v17 = vadd.f32 %v2008_v58, %v1981_v16 }
 0x5c2   : > { %v2062_v60 = vsel %vm2060_vm15, %v2057_v25, %v2059_v50  ;;  %v2065_v30 = vmul.f32 %v3487_v46, %v2061_v41 }
 0x5c3   : > { %v2066_v34 = vmul.f32 %v3496_v26, %v2062_v60 }
 0x5c4   : > { %v2084_v11 = vpop.permute.xlu1 %2083  ;;  %v2067_v3 = vadd.f32 %v2065_v30, %v2038_v8  ;;  %v4181_v30 = vld [vmem:[#allocation12_spill] sm:$0xff] }
 0x5c5   : > { %v2086_v51 = vpop.permute.xlu0 %2085 }
 0x5c6   : > { %v2090_v49 = vsel %vm2089_vm2, %v2084_v11, %v2086_v51  ;;  %v2039_v11 = vadd.f32 %v2037_v4, %v2010_v17  ;;  %v4182_v17 = vld [vmem:[#allocation16_spill] sm:$0xff] }
 0x5c7   : > { %v2094_v24 = vmul.f32 %v3500_v53, %v2090_v49 }
 0x5c8   : > { %v2088_v33 = vpop.permute.xlu1 %2087  ;;  %v2068_v46 = vadd.f32 %v2066_v34, %v2039_v11  ;;  %v4183_v34 = vld [vmem:[#allocation18_spill] sm:$0xff] }
 0x5c9   : > { %v2113_v39 = vpop.permute.xlu0 %2112  ;;  %v2091_v54 = vsel %vm2089_vm2, %v2086_v51, %v2088_v33  ;;  %v2096_v51 = vadd.f32 %v2094_v24, %v2067_v3 }
 0x5ca   : > { %v2095_v10 = vmul.f32 %v3513_v44, %v2091_v54 }
 0x5cc   : > { %v2115_v5 = vpop.permute.xlu1 %2114  ;;  %v2097_v22 = vadd.f32 %v2095_v10, %v2068_v46 }
 0x5cd   : > { %v2117_v21 = vpop.permute.xlu0 %2116  ;;  %v2119_v38 = vsel %vm2118_vm1, %v2113_v39, %v2115_v5 }
 0x5ce   : > { %v2125_v59 = vadd.f32 %v2119_v38, %v2096_v51  ;;  %v2120_v45 = vsel %vm2118_vm1, %v2115_v5, %v2117_v21 }
 0x5d0   : > { %v2142_v29 = vpop.permute.xlu1 %2141 }
 0x5d1   : > { %v2144_v31 = vpop.permute.xlu0 %2143 }
 0x5d2   : > { %v2148_v50 = vsel %vm2147_vm0, %v2142_v29, %v2144_v31 }
 0x5d3   : > { %v2152_v42 = vmul.f32 %v3517_v20, %v2148_v50  ;;  %v2126_v20 = vadd.f32 %v2120_v45, %v2097_v22 }
 0x5d4   : > { %v2146_v6 = vpop.permute.xlu1 %2145 }
 0x5d5   : > { %v2171_v25 = vpop.permute.xlu0 %2170  ;;  %v2149_v26 = vsel %vm2147_vm0, %v2144_v31, %v2146_v6  ;;  %v2154_v2 = vadd.f32 %v2152_v42, %v2125_v59  ;;  %v4178_v31 = vld [vmem:[#allocation17_spill] sm:$0xff] }
 0x5d6   : > { %v2153_v39 = vmul.f32 %v3521_v55, %v2149_v26 }
 0x5d8   : > { %v2173_v14 = vpop.permute.xlu1 %2172  ;;  %v2155_v48 = vadd.f32 %v2153_v39, %v2126_v20 }
 0x5d9   : > { %v2175_v7 = vpop.permute.xlu0 %2174  ;;  %v2177_v53 = vsel %vm2176_vm3, %v2171_v25, %v2173_v14 }
 0x5da   : > { %v2181_v33 = vmul.f32 %v3532_v27, %v2177_v53  ;;  %v2178_v44 = vsel %vm2176_vm3, %v2173_v14, %v2175_v7 }
 0x5db   : > { %v2182_v19 = vmul.f32 %v4158_v18, %v2178_v44 }
 0x5dc   : > { %v2200_v0 = vpop.permute.xlu1 %2199  ;;  %v2183_v56 = vadd.f32 %v2181_v33, %v2154_v2 }
 0x5dd   : > { %v2202_v28 = vpop.permute.xlu0 %2201  ;;  %v2184_v62 = vadd.f32 %v2182_v19, %v2155_v48 }
 0x5de   : > { %v2206_v43 = vsel %vm2205_vm4, %v2200_v0, %v2202_v28 }
 0x5df   : > { %v2210_v35 = vmul.f32 %v3557_v52, %v2206_v43  ;;  %v4174_v52 = vlaneseq }
 0x5e0   : > { %v2204_v13 = vpop.permute.xlu1 %2203 }
 0x5e1   : > { %v2212_v37 = vadd.f32 %v2210_v35, %v2183_v56  ;;  %v2207_v27 = vsel %vm2205_vm4, %v2202_v28, %v2204_v13  ;;  %v2227_v15 = vshrl.u32 %v4174_v52, 7 }
 0x5e2   : > { %v2211_v5 = vmul.f32 %v3591_v32, %v2207_v27  ;;  %v4176_v32 = vld [vmem:[#allocation11_spill] sm:$0xff] }
 0x5e3   : > { %v2479_v1 = vmul.f32 -1.442695, %v2212_v37  ;;  %v2228_v12 = vsub.s32 0, %v2227_v15 }
 0x5e4   : > { %v2213_v21 = vadd.f32 %v2211_v5, %v2184_v62 }
 0x5e5   : > { %2655 = vpow2.f32 %v2479_v1 }
 0x5e6   : > { %v2480_v55 = vmul.f32 -1.442695, %v2213_v21 }
 0x5e8   : > { %2657 = vpow2.f32 %v2480_v55 }
 0x5ef   : > { %v2656_v40 = vpop.eup %2655 }
 0x5f0   : > { %v2220_v63 = vadd.f32 1.0, %v2656_v40 }
 0x5f2   : > { %2659 = vrcp.f32 %v2220_v63  ;;  %v2658_v18 = vpop.eup %2657 }
 0x5f3   : > { %v2221_v47 = vadd.f32 1.0, %v2658_v18 }
 0x5f5   : > { %2661 = vrcp.f32 %v2221_v47 }
 0x5fc   : > { %v2660_v61 = vpop.eup %2659 }
 0x5fd   : > { %v2229_v41 = vrot.slane %v2660_v61, %v2228_v12 }
 0x5ff   : > { %v2234_v57 = vmul.f32 %v2229_v41, %v4175_v9  ;;  %v2236_v58 = vmul.f32 %v2229_v41, %v4176_v32  ;;  %v2238_v29 = vmul.f32 %v2229_v41, %v4177_v36  ;;  %v2240_v60 = vmul.f32 %v2229_v41, %v4178_v31  ;;  %v2662_v49 = vpop.eup %2661 }
 0x600   : > { %v2233_v16 = vrot.slane %v2662_v49, %v2228_v12 }
 0x601   : > { %2242 = vst [vmem:[%s229_s26] sm:$0xff] %v2234_v57  ;;  %2244 = vst [vmem:[%s229_s26 + $0x10] sm:$0xff] %v2236_v58 }
 0x602   : > { %2246 = vst [vmem:[%s229_s26 + $0x20] sm:$0xff] %v2238_v29  ;;  %2248 = vst [vmem:[%s229_s26 + $0x30] sm:$0xff] %v2240_v60  ;;  %v2235_v4 = vmul.f32 %v2233_v16, %v4180_v23  ;;  %v2237_v54 = vmul.f32 %v2233_v16, %v4181_v30  ;;  %v2239_v8 = vmul.f32 %v2233_v16, %v4182_v17 }
 0x603   : > { %v2241_v24 = vmul.f32 %v2233_v16, %v4183_v34 }
 0x604   : > { %2243 = vst [vmem:[%s229_s26 + $0x8] sm:$0xff] %v2235_v4  ;;  %2245 = vst [vmem:[%s229_s26 + $0x18] sm:$0xff] %v2237_v54 }
 0x605   : > { %2247 = vst [vmem:[%s229_s26 + $0x28] sm:$0xff] %v2239_v8  ;;  %2249 = vst [vmem:[%s229_s26 + $0x38] sm:$0xff] %v2241_v24 }
 0x606   : > { %2721 = shalt.err (!%p2718_p11)
}
 0x607   : > { %s2722_s13 = scalar_lea.hbm %s4031_s23, 1024  ;;  %s2726_s7 = scalar_lea.hbm %s4086_s4, 2048 }
 0x608   : > { %p2723_p0 = scmp.ne.s32.totalorder %s4031_s23, %s2722_s13  ;;  %p2727_p6 = scmp.lt.u32.totalorder %s4031_s23, %s4086_s4 }
 0x609   : > { %p2728_p3 = scmp.lt.u32.totalorder %s2726_s7, %s2722_s13  ;;  %p2730_p5 = scmp.lt.u32.totalorder %s2722_s13, %s4031_s23 }
 0x60a   : > { %p2724_p2 = pnand %p2723_p0, %p4184_p12 }
 0x60b   : > { %p2729_p13 = por %p2728_p3, %p2727_p6 }
 0x60c   : > { %p2725_p7 = pneg %p2724_p2 }
 0x60d   : > { %p2731_p8 = por %p2730_p5, %p2729_p13 }
 0x60f   : > { %p2732_p9 = pnand %p2731_p8, %p2725_p7 }
 0x611   : > { %2735 = shalt.err (!%p2732_p9)
}
 0x612   : > { %s2839_s5 = smov 256  }
 0x613   : > { %2529 = dma.vmem_to_hbm [thread:$0]  (%p4184_p12), %s4037_s29, 1024, %s4031_s23, %s2251_s19, %s2839_s5, %s2839_s5, %s2834_s1  }
 0x614 PF: > { %s2279_s10 = sand.u32 1, %s2766_s15   ;;  %p4185_p10 = scmp.ne.s32.totalorder %s4119_s28, 0 }
 0x615   : > { %p4186_p1 = scmp.ge.s32.totalorder %s2778_s18, 2  ;;  %s2280_s11 = scalar_lea.sflag [#allocation4], %s2279_s10 }
 0x617   : > { %p2540_p4 = pnand %p4186_p1, %p4185_p10 }
 0x619   : > { %2761 = dma.done.wait (!%p2540_p4), %s2280_s11, 1024  }
 0x61a   : > { %2763 = vsyncadd (!%p2540_p4), %s2280_s11, 4294966272  ;;  %p18_p11 = scmp.ge.s32.totalorder %s2890_s21, 4   ;;  %s4187_s15 = smov %s2770_s16 }
 0x61b   : > { %s4188_s16 = smov %s2774_s17  ;;  %s4189_s17 = smov %s2902_s24 }
 0x61c   : > { %s4190_s18 = smov %s2890_s21  ;;  %20 = sbr.rel (!%p18_p11) target bundleno = 10 (0xa), region = 86 }
 0x623   :  { %2285 = vsyncpa [#allocation3], 1 }
 0x624   :  { %2287 = vsyncpa [#allocation3 + $0x1], 1 }
 0x625   :  { %2288 = vsyncpa [#allocation4], 1 }
 0x626   :  { %2290 = vsyncpa [#allocation4 + $0x1], 1 }
 0x627   :  { %2291 = vsyncpa [#allocation5], 1 }
 0x628   :  { %2293 = vsyncpa [#allocation5 + $0x1], 1 }

</bundles_post_ra>
